<compile_context>
chip_gen: v7x
topology: tpu7x:2x2x1
jax: 0.10.0
libtpu: 0.0.40
codegen_flags: <defaults>
</compile_context>

<pallas_src>
import functools

import jax
import jax.numpy as jnp
from jax.experimental import pallas as pl
from jax.experimental.pallas import tpu as pltpu

C_IN = 2
C_OUT = 768
KSIZE = 3
NEG_SLOPE = 0.01          # nn.LeakyReLU default
MAX_L_TILE = 1024         # L tile (multiple of 128)


def _round_up(x, m):
    return (x + m - 1) // m * m


def _adapter_kernel(xt_ref, w2_ref, wr8_ref, o_ref, xsum_ref, *, inv_l):
    # xt_ref:   (1, 8, Lt)  rows 0..5 = conv taps (row j = k*2 + ic),
    #                       row 6 = 1 on valid positions (0 in L padding), row 7 = 0
    # w2_ref:   (768, 8)    cols 0..5 = conv weight, col 6 = conv bias, col 7 = 0
    # wr8_ref:  (768, 8)    cols 2,3 = residual 1x1 weight, col 6 = residual bias,
    #                       other cols = 0 (column layout matches xsum rows)
    # o_ref:    (1, 768, 1) pooled output for this batch element (accumulator)
    # xsum_ref: (8, 1) f32  running per-tap-row sums over L (rows 2,3 = sum of x,
    #                       row 6 = number of valid positions)
    l = pl.program_id(1)

    @pl.when(l == 0)
    def _init():
        o_ref[...] = jnp.zeros_like(o_ref)
        xsum_ref[...] = jnp.zeros_like(xsum_ref)

    xt = xt_ref[0]                                              # (8, Lt)

    # conv (k=3) + bias in a single MXU matmul: (768, 8) @ (8, Lt) -> (768, Lt)
    y = jnp.dot(w2_ref[...], xt, preferred_element_type=jnp.float32)
    # LeakyReLU (padded positions stay exactly 0: all taps incl. bias row are 0)
    y = jnp.maximum(y, NEG_SLOPE * y)

    # partial average pool on the MXU: (768, Lt) @ (Lt, 1) -> (768, 1)
    ones_col = jnp.ones((xt.shape[1], 1), dtype=jnp.float32)
    o_ref[0] += jnp.dot(y, ones_col, preferred_element_type=jnp.float32)
    # per-tap-row sums for the fused residual path: (8, Lt) @ (Lt, 1) -> (8, 1)
    xsum_ref[...] += jnp.dot(xt, ones_col, preferred_element_type=jnp.float32)

    @pl.when(l == pl.num_programs(1) - 1)
    def _finalize():
        # residual path: Wr @ mean_L(x) + br, via (768,8)@(8,1).
        # xsum*inv_l rows 2,3 = mean_L(x); row 6 = L*inv_l = 1 (carries the bias).
        res = jnp.dot(wr8_ref[...], xsum_ref[...] * inv_l,
                      preferred_element_type=jnp.float32)
        o_ref[0] = o_ref[0] * inv_l + res


def vision_adapter_forward(x, w_conv, b_conv, w_res, b_res):
    """x: (B, 2, L) float32 (PyTorch NCL).  Returns (B, 768) float32."""
    B, cin, L = x.shape
    assert cin == C_IN
    x = x.astype(jnp.float32)

    l_tile = min(MAX_L_TILE, _round_up(L, 128))
    l_pad = _round_up(L, l_tile)
    n_l = l_pad // l_tile

    # ----- lane-dense tap tensor: (B, 8, L_pad), taps on sublanes, L on lanes.
    x_zp = jnp.pad(x, ((0, 0), (0, 0), (1, 1)))                 # (B, 2, L+2)
    rows = [x_zp[:, ic, k:k + L] for k in range(KSIZE) for ic in range(C_IN)]
    rows.append(jnp.ones((B, L), jnp.float32))                  # bias (ones) row
    rows.append(jnp.zeros((B, L), jnp.float32))                 # pad row
    x_taps = jnp.stack(rows, axis=1)                            # (B, 8, L)
    x_taps = jnp.pad(x_taps, ((0, 0), (0, 0), (0, l_pad - L)))  # zero beyond L

    # ----- conv weights as (768, 8): col j=k*2+ic = w[c, ic, k]; col 6 = bias
    w_main = jnp.transpose(w_conv, (0, 2, 1)).reshape(C_OUT, KSIZE * C_IN)
    w2 = jnp.concatenate(
        [w_main.astype(jnp.float32),
         b_conv.reshape(C_OUT, 1).astype(jnp.float32),
         jnp.zeros((C_OUT, 1), jnp.float32)], axis=1)           # (768, 8)

    # ----- residual weights as (768, 8), columns aligned with the tap rows:
    #       cols 2,3 = Wr (centre taps = raw x), col 6 = br (ones/count row).
    zc = jnp.zeros((C_OUT, 1), jnp.float32)
    wr8 = jnp.concatenate(
        [zc, zc,
         w_res[:, :, 0].astype(jnp.float32),                    # cols 2,3
         zc, zc,
         b_res.reshape(C_OUT, 1).astype(jnp.float32),           # col 6
         zc], axis=1)                                           # (768, 8)

    kernel = functools.partial(_adapter_kernel, inv_l=float(1.0 / L))

    out = pl.pallas_call(
        kernel,
        out_shape=jax.ShapeDtypeStruct((B, C_OUT, 1), jnp.float32),
        grid_spec=pltpu.PrefetchScalarGridSpec(
            num_scalar_prefetch=0,
            grid=(B, n_l),
            in_specs=[
                pl.BlockSpec((1, 8, l_tile), lambda b, l: (b, 0, l)),
                pl.BlockSpec((C_OUT, 8), lambda b, l: (0, 0)),
                pl.BlockSpec((C_OUT, 8), lambda b, l: (0, 0)),
            ],
            out_specs=pl.BlockSpec((1, C_OUT, 1), lambda b, l: (b, 0, 0)),
            scratch_shapes=[pltpu.VMEM((8, 1), jnp.float32)],
        ),
        compiler_params=pltpu.CompilerParams(
            dimension_semantics=("parallel", "arbitrary")),
    )(x_taps, w2, wr8)

    return out.reshape(B, C_OUT)


def _reference(x, w_conv, b_conv, w_res, b_res):
    """Pure-JAX reference mirroring the PyTorch forward."""
    res = jax.lax.conv_general_dilated(
        x, w_res, window_strides=(1,), padding=[(0, 0)],
        dimension_numbers=("NCH", "OIH", "NCH")) + b_res[None, :, None]
    y = jax.lax.conv_general_dilated(
        x, w_conv, window_strides=(1,), padding=[(1, 1)],
        dimension_numbers=("NCH", "OIH", "NCH")) + b_conv[None, :, None]
    y = jnp.where(y >= 0, y, NEG_SLOPE * y)
    y = y + res
    return jnp.mean(y, axis=-1)


if __name__ == "__main__":
    key = jax.random.PRNGKey(0)
    k_x, k_w, k_b, k_wr, k_br = jax.random.split(key, 5)

    B, L = 2, 16
    x = jax.random.normal(k_x, (B, C_IN, L), dtype=jnp.float32)

    # Deterministic synthetic parameters (shapes from nn.Conv1d in __init__)
    w_conv = 0.1 * jax.random.normal(k_w, (C_OUT, C_IN, KSIZE), dtype=jnp.float32)
    b_conv = 0.1 * jax.random.normal(k_b, (C_OUT,), dtype=jnp.float32)
    w_res = 0.1 * jax.random.normal(k_wr, (C_OUT, C_IN, 1), dtype=jnp.float32)
    b_res = 0.1 * jax.random.normal(k_br, (C_OUT,), dtype=jnp.float32)

    out = vision_adapter_forward(x, w_conv, b_conv, w_res, b_res)
    out = jax.block_until_ready(out)

    ref = _reference(x, w_conv, b_conv, w_res, b_res)
    assert out.shape == (B, C_OUT)
    assert jnp.allclose(out, ref, atol=2e-4, rtol=2e-4), \
        float(jnp.max(jnp.abs(out - ref)))

    print("KERNEL_OK")
</pallas_src>

<mosaic_0001>
module attributes {stable_mosaic.version = 11 : i64} {
  func.func @_adapter_kernel(%arg0: i32, %arg1: i32, %arg2: memref<1x8x128xf32, #tpu.memory_space<vmem>>, %arg3: memref<768x8xf32, #tpu.memory_space<vmem>>, %arg4: memref<768x8xf32, #tpu.memory_space<vmem>>, %arg5: memref<1x768x1xf32, #tpu.memory_space<vmem>>, %arg6: memref<8x1xf32, #tpu.memory_space<vmem>>) attributes {dimension_semantics = [#tpu.dimension_semantics<parallel>, #tpu.dimension_semantics<arbitrary>], iteration_bounds = array<i64: 2, 1>, scalar_prefetch = 0 : i64, scratch_operands = 1 : i64, tpu.core_type = #tpu.core_type<tc>, window_params = [{transform_indices = @transform_0, window_bounds = array<i64: 1, 8, 128>}, {pipeline_mode = #tpu.pipeline_mode<synchronous>, transform_indices = @transform_1, window_bounds = array<i64: 768, 8>}, {pipeline_mode = #tpu.pipeline_mode<synchronous>, transform_indices = @transform_2, window_bounds = array<i64: 768, 8>}, {transform_indices = @transform_3, window_bounds = array<i64: 1, 768, 1>}]} {
    %c0_i32 = arith.constant 0 : i32
    %0 = arith.cmpi eq, %arg1, %c0_i32 : i32
    %1 = arith.extui %0 : i1 to i32
    %c0_i32_0 = arith.constant 0 : i32
    %2 = arith.cmpi ne, %1, %c0_i32_0 : i32
    scf.if %2 {
      %cst_21 = arith.constant 0.000000e+00 : f32
      %25 = vector.broadcast %cst_21 : f32 to vector<1x768x1xf32>
      %c0_22 = arith.constant 0 : index
      %c0_23 = arith.constant 0 : index
      %c0_24 = arith.constant 0 : index
      %26 = vector.load %arg5[%c0_22, %c0_23, %c0_24] : memref<1x768x1xf32, #tpu.memory_space<vmem>>, vector<1x768x1xf32>
      tpu.vector_store %arg5[%c0_22, %c0_23, %c0_24], %25 {strides = array<i32>} : memref<1x768x1xf32, #tpu.memory_space<vmem>>, vector<1x768x1xf32>,
      %cst_25 = arith.constant 0.000000e+00 : f32
      %27 = vector.broadcast %cst_25 : f32 to vector<8x1xf32>
      %c0_26 = arith.constant 0 : index
      %c0_27 = arith.constant 0 : index
      %28 = vector.load %arg6[%c0_26, %c0_27] : memref<8x1xf32, #tpu.memory_space<vmem>>, vector<8x1xf32>
      tpu.vector_store %arg6[%c0_26, %c0_27], %27 {strides = array<i32>} : memref<8x1xf32, #tpu.memory_space<vmem>>, vector<8x1xf32>,
    } else {
    }
    %c0 = arith.constant 0 : index
    %c0_1 = arith.constant 0 : index
    %c0_2 = arith.constant 0 : index
    %3 = vector.load %arg2[%c0, %c0_1, %c0_2] : memref<1x8x128xf32, #tpu.memory_space<vmem>>, vector<1x8x128xf32>
    %4 = vector.shape_cast %3 : vector<1x8x128xf32> to vector<8x128xf32>
    %c0_3 = arith.constant 0 : index
    %c0_4 = arith.constant 0 : index
    %5 = vector.load %arg3[%c0_3, %c0_4] : memref<768x8xf32, #tpu.memory_space<vmem>>, vector<768x8xf32>
    %cst = arith.constant dense<0.000000e+00> : vector<768x128xf32>
    %6 = tpu.matmul %5, %4, %cst {dimension_numbers = #tpu.dot_dimension_numbers<[1], [0], [0], [1], [0, 0, 1, 1], [], []>} : vector<768x8xf32>, vector<8x128xf32>, vector<768x128xf32> -> vector<768x128xf32>
    %cst_5 = arith.constant 0.00999999977 : f32
    %7 = vector.broadcast %cst_5 : f32 to vector<768x128xf32>
    %8 = arith.mulf %7, %6 : vector<768x128xf32>
    %9 = arith.maximumf %6, %8 : vector<768x128xf32>
    %cst_6 = arith.constant 1.000000e+00 : f32
    %10 = vector.broadcast %cst_6 : f32 to vector<128x1xf32>
    %c0_7 = arith.constant 0 : index
    %c0_8 = arith.constant 0 : index
    %c0_9 = arith.constant 0 : index
    %11 = vector.load %arg5[%c0_7, %c0_8, %c0_9] : memref<1x768x1xf32, #tpu.memory_space<vmem>>, vector<1x768x1xf32>
    %12 = vector.shape_cast %11 : vector<1x768x1xf32> to vector<768x1xf32>
    %cst_10 = arith.constant dense<0.000000e+00> : vector<768x1xf32>
    %13 = tpu.matmul %9, %10, %cst_10 {dimension_numbers = #tpu.dot_dimension_numbers<[1], [0], [0], [1], [0, 0, 1, 1], [], []>} : vector<768x128xf32>, vector<128x1xf32>, vector<768x1xf32> -> vector<768x1xf32>
    %14 = arith.addf %12, %13 : vector<768x1xf32>
    %c0_11 = arith.constant 0 : index
    %c0_12 = arith.constant 0 : index
    %c0_13 = arith.constant 0 : index
    %15 = vector.load %arg5[%c0_11, %c0_12, %c0_13] : memref<1x768x1xf32, #tpu.memory_space<vmem>>, vector<1x768x1xf32>
    %16 = vector.shape_cast %15 : vector<1x768x1xf32> to vector<768x1xf32>
    %17 = vector.shape_cast %14 : vector<768x1xf32> to vector<1x768x1xf32>
    tpu.vector_store %arg5[%c0_11, %c0_12, %c0_13], %17 {strides = array<i32>} : memref<1x768x1xf32, #tpu.memory_space<vmem>>, vector<1x768x1xf32>,
    %c0_14 = arith.constant 0 : index
    %c0_15 = arith.constant 0 : index
    %18 = vector.load %arg6[%c0_14, %c0_15] : memref<8x1xf32, #tpu.memory_space<vmem>>, vector<8x1xf32>
    %cst_16 = arith.constant dense<0.000000e+00> : vector<8x1xf32>
    %19 = tpu.matmul %4, %10, %cst_16 {dimension_numbers = #tpu.dot_dimension_numbers<[1], [0], [0], [1], [0, 0, 1, 1], [], []>} : vector<8x128xf32>, vector<128x1xf32>, vector<8x1xf32> -> vector<8x1xf32>
    %20 = arith.addf %18, %19 : vector<8x1xf32>
    %c0_17 = arith.constant 0 : index
    %c0_18 = arith.constant 0 : index
    %21 = vector.load %arg6[%c0_17, %c0_18] : memref<8x1xf32, #tpu.memory_space<vmem>>, vector<8x1xf32>
    tpu.vector_store %arg6[%c0_17, %c0_18], %20 {strides = array<i32>} : memref<8x1xf32, #tpu.memory_space<vmem>>, vector<8x1xf32>,
    %c0_i32_19 = arith.constant 0 : i32
    %22 = arith.cmpi eq, %arg1, %c0_i32_19 : i32
    %23 = arith.extui %22 : i1 to i32
    %c0_i32_20 = arith.constant 0 : i32
    %24 = arith.cmpi ne, %23, %c0_i32_20 : i32
    scf.if %24 {
      %c0_21 = arith.constant 0 : index
      %c0_22 = arith.constant 0 : index
      %25 = vector.load %arg4[%c0_21, %c0_22] : memref<768x8xf32, #tpu.memory_space<vmem>>, vector<768x8xf32>
      %c0_23 = arith.constant 0 : index
      %c0_24 = arith.constant 0 : index
      %26 = vector.load %arg6[%c0_23, %c0_24] : memref<8x1xf32, #tpu.memory_space<vmem>>, vector<8x1xf32>
      %cst_25 = arith.constant 6.250000e-02 : f32
      %27 = vector.broadcast %cst_25 : f32 to vector<8x1xf32>
      %28 = arith.mulf %26, %27 : vector<8x1xf32>
      %cst_26 = arith.constant dense<0.000000e+00> : vector<768x1xf32>
      %29 = tpu.matmul %25, %28, %cst_26 {dimension_numbers = #tpu.dot_dimension_numbers<[1], [0], [0], [1], [0, 0, 1, 1], [], []>} : vector<768x8xf32>, vector<8x1xf32>, vector<768x1xf32> -> vector<768x1xf32>
      %c0_27 = arith.constant 0 : index
      %c0_28 = arith.constant 0 : index
      %c0_29 = arith.constant 0 : index
      %30 = vector.load %arg5[%c0_27, %c0_28, %c0_29] : memref<1x768x1xf32, #tpu.memory_space<vmem>>, vector<1x768x1xf32>
      %31 = vector.shape_cast %30 : vector<1x768x1xf32> to vector<768x1xf32>
      %cst_30 = arith.constant 6.250000e-02 : f32
      %32 = vector.broadcast %cst_30 : f32 to vector<768x1xf32>
      %33 = arith.mulf %31, %32 : vector<768x1xf32>
      %34 = arith.addf %33, %29 : vector<768x1xf32>
      %c0_31 = arith.constant 0 : index
      %c0_32 = arith.constant 0 : index
      %c0_33 = arith.constant 0 : index
      %35 = vector.load %arg5[%c0_31, %c0_32, %c0_33] : memref<1x768x1xf32, #tpu.memory_space<vmem>>, vector<1x768x1xf32>
      %36 = vector.shape_cast %35 : vector<1x768x1xf32> to vector<768x1xf32>
      %37 = vector.shape_cast %34 : vector<768x1xf32> to vector<1x768x1xf32>
      tpu.vector_store %arg5[%c0_31, %c0_32, %c0_33], %37 {strides = array<i32>} : memref<1x768x1xf32, #tpu.memory_space<vmem>>, vector<1x768x1xf32>,
    } else {
    }
    return
  }
  func.func @transform_0(%arg0: i32, %arg1: i32) -> (i32, i32, i32) {
    %c0_i32 = arith.constant 0 : i32
    %c0_i32_0 = arith.constant 0 : i32
    return %arg0, %c0_i32, %arg1 : i32, i32, i32
  }
  func.func @transform_1(%arg0: i32, %arg1: i32) -> (i32, i32) {
    %c0_i32 = arith.constant 0 : i32
    %c0_i32_0 = arith.constant 0 : i32
    %c0_i32_1 = arith.constant 0 : i32
    return %c0_i32, %c0_i32_0 : i32, i32
  }
  func.func @transform_2(%arg0: i32, %arg1: i32) -> (i32, i32) {
    %c0_i32 = arith.constant 0 : i32
    %c0_i32_0 = arith.constant 0 : i32
    %c0_i32_1 = arith.constant 0 : i32
    return %c0_i32, %c0_i32_0 : i32, i32
  }
  func.func @transform_3(%arg0: i32, %arg1: i32) -> (i32, i32, i32) {
    %c0_i32 = arith.constant 0 : i32
    %c0_i32_0 = arith.constant 0 : i32
    %c0_i32_1 = arith.constant 0 : i32
    return %arg0, %c0_i32, %c0_i32_0 : i32, i32, i32
  }
}

</mosaic_0001>

<bundles_post_ra>
// kernel: tpu_custom_call.1
= control target key start
LH: loop header
LB: loop body
LE: loop exit
PB: predicated region body
PF: predicated region fallthrough
CT: control target
= control target key end

     0   :  { %s4845_s12 = smov 0   ;;  %s4847_s13 = smov 0   ;;  %s6751_s0 = inlined_call_operand.vmem [shape: f32[2,8,128], index: 0, kind: input, shape index: {}]   ;;  %s6752_s1 = inlined_call_operand.vmem [shape: f32[768,8], index: 1, kind: input, shape index: {}]   ;;  %s6753_s2 = inlined_call_operand.vmem [shape: f32[768,8], index: 2, kind: input, shape index: {}]   ;;  %s6754_s3 = inlined_call_operand.vmem [shape: f32[2,768,1], index: 3, kind: output, shape index: {}]  }
   0x1   :  { %s4849_s14 = smov 0  }
   0x2 LB: > { %s25_s15 = sadd.s32 1, %s4815_s13  ;;  %p3711_p0 = scmp.ge.s32.totalorder %s4819_s14, 1  ;;  %s4819_s14 = sphi %s4849_s14, %s13_s14   ;;  %s4815_s13 = sphi %s4847_s13, %s6756_s13   ;;  %s4811_s12 = sphi %s4845_s12, %s6755_s12  }
   0x3   : > { %p27_p1 = scmp.ge.s32.totalorder %s25_s15, 2  ;;  %p153_p2 = scmp.lt.s32.totalorder %s4819_s14, 3 }
   0x5   : > { %s6758_s15 = smov (%p27_p1, %s25_s15), 0  ;;  %p154_p3 = pnand %p3711_p0, %p153_p2 }
   0x6   : > { %p179_p4 = scmp.lt.s32.totalorder (!%p154_p3), %s4811_s12, 1  ;;  %v294_v0 = vld [vmem:[%s6752_s1] sm:$0xff] (!%p154_p3)  ;;  %vm390_vm0 = vcmask (!%p154_p3), 64512   ;;  %v295_v2 = vld [vmem:[%s6752_s1 + $0x8] sm:$0xff] (!%p154_p3)  ;;  %v296_v3 = vld [vmem:[%s6752_s1 + $0x10] sm:$0xff] (!%p154_p3)  ;;  %v4821_v4 = vmov (!%p154_p3), 0.0|0.0  }
   0x7   : > { %157 = sbr.rel (%p154_p3) target bundleno = 746 (0x2ea), region = 32  ;;  %4233 = vmatprep.mubr.msk.f32.mxu0 (!%p154_p3), %vm390_vm0, %v294_v0  ;;  %v4822_v5 = vmov (!%p154_p3), 1.0|1.0   ;;  %v297_v6 = vld [vmem:[%s6752_s1 + $0x18] sm:$0xff] (!%p154_p3)  ;;  %v298_v7 = vld [vmem:[%s6752_s1 + $0x20] sm:$0xff] (!%p154_p3)  ;;  %v299_v8 = vld [vmem:[%s6752_s1 + $0x28] sm:$0xff] (!%p154_p3) }
   0x8   : > { %v300_v9 = vld [vmem:[%s6752_s1 + $0x30] sm:$0xff] (!%p154_p3)  ;;  %v342_v10 = vld [vmem:[%s6752_s1 + $0x180] sm:$0xff] (!%p154_p3)  ;;  %v343_v11 = vld [vmem:[%s6752_s1 + $0x188] sm:$0xff] (!%p154_p3)  ;;  %vm4823_vm1 = vmmov (!%p154_p3), 0   ;;  %vm195_vm2 = vcmask (!%p154_p3), 7168  }
   0x9   : > { %4305 = vmatprep.mubr.msk.f32.mxu1 (!%p154_p3), %vm390_vm0, %v342_v10  ;;  %v344_v12 = vld [vmem:[%s6752_s1 + $0x190] sm:$0xff] (!%p154_p3)  ;;  %v301_v13 = vld [vmem:[%s6752_s1 + $0x38] sm:$0xff] (!%p154_p3)  ;;  %v302_v14 = vld [vmem:[%s6752_s1 + $0x40] sm:$0xff] (!%p154_p3) }
   0xa   : > { %v345_v15 = vld [vmem:[%s6752_s1 + $0x198] sm:$0xff] (!%p154_p3)  ;;  %v346_v16 = vld [vmem:[%s6752_s1 + $0x1a0] sm:$0xff] (!%p154_p3)  ;;  %v303_v17 = vld [vmem:[%s6752_s1 + $0x48] sm:$0xff] (!%p154_p3) }
   0xb   : > { %v304_v18 = vld [vmem:[%s6752_s1 + $0x50] sm:$0xff] (!%p154_p3)  ;;  %v347_v19 = vld [vmem:[%s6752_s1 + $0x1a8] sm:$0xff] (!%p154_p3)  ;;  %v305_v21 = vld [vmem:[%s6752_s1 + $0x58] sm:$0xff] (!%p154_p3) }
   0xc   : > { %v348_v20 = vld [vmem:[%s6752_s1 + $0x1b0] sm:$0xff] (!%p154_p3)  ;;  %v306_v22 = vld [vmem:[%s6752_s1 + $0x60] sm:$0xff] (!%p154_p3)  ;;  %v349_v23 = vld [vmem:[%s6752_s1 + $0x1b8] sm:$0xff] (!%p154_p3) }
   0xd   : > { %v350_v24 = vld [vmem:[%s6752_s1 + $0x1c0] sm:$0xff] (!%p154_p3)  ;;  %v307_v25 = vld [vmem:[%s6752_s1 + $0x68] sm:$0xff] (!%p154_p3)  ;;  %v308_v26 = vld [vmem:[%s6752_s1 + $0x70] sm:$0xff] (!%p154_p3) }
   0xe   : > { %s6760_s12 = smov (!%p179_p4, %s4811_s12), 1  ;;  %v351_v27 = vld [vmem:[%s6752_s1 + $0x1c8] sm:$0xff]  ;;  %v352_v28 = vld [vmem:[%s6752_s1 + $0x1d0] sm:$0xff]  ;;  %v309_v29 = vld [vmem:[%s6752_s1 + $0x78] sm:$0xff] }
   0xf   : > { %s3712_s18 = sshll.u32 %s6760_s12, 3  ;;  %v310_v30 = vld [vmem:[%s6752_s1 + $0x80] sm:$0xff]  ;;  %v353_v31 = vld [vmem:[%s6752_s1 + $0x1d8] sm:$0xff]  ;;  %v311_v33 = vld [vmem:[%s6752_s1 + $0x88] sm:$0xff]  ;;  %s4768_s28 = smul.u32 768, %s6760_s12 }
  0x10   : > { %s185_s21 = scalar_lea.vmem %s6751_s0, %s3712_s18  ;;  %v354_v32 = vld [vmem:[%s6752_s1 + $0x1e0] sm:$0xff]  ;;  %v312_v34 = vld [vmem:[%s6752_s1 + $0x90] sm:$0xff]  ;;  %v355_v35 = vld [vmem:[%s6752_s1 + $0x1e8] sm:$0xff] }
  0x11   : > { %v4873_v1 = vld [vmem:[%s185_s21] sm:$0xff]  ;;  %v356_v36 = vld [vmem:[%s6752_s1 + $0x1f0] sm:$0xff]  ;;  %v313_v37 = vld [vmem:[%s6752_s1 + $0x98] sm:$0xff]  ;;  %s5297_s4 = scalar_lea.vmem %s6754_s3, %s4768_s28 }
  0x12   : > { %4231 = vmatprep.subr.mxu0 %v4873_v1  ;;  %4766 = vmatprep.subr.mxu1 %v4873_v1  ;;  %v314_v38 = vld [vmem:[%s6752_s1 + $0xa0] sm:$0xff]  ;;  %v357_v39 = vld [vmem:[%s6752_s1 + $0x1f8] sm:$0xff]  ;;  %v315_v41 = vld [vmem:[%s6752_s1 + $0xa8] sm:$0xff] }
  0x13   : > { %4232 = vmatpush3.msra.mxu0 %v4873_v1  ;;  %4767 = vmatpush3.msra.mxu1 %v4873_v1  ;;  %v358_v40 = vld [vmem:[%s6752_s1 + $0x200] sm:$0xff]  ;;  %v316_v42 = vld [vmem:[%s6752_s1 + $0xb0] sm:$0xff]  ;;  %v359_v43 = vld [vmem:[%s6752_s1 + $0x208] sm:$0xff] }
  0x14   : > { %4234 = vmatmul.mubr.msk.f32.vlgmr.msra.gmra.mrb[0].mxu0 %vm390_vm0, %v295_v2  ;;  %4750 = vmatprep.subr.bf16.mxu0 %v4821_v4  ;;  %v360_v44 = vld [vmem:[%s6752_s1 + $0x210] sm:$0xff]  ;;  %v317_v45 = vld [vmem:[%s6752_s1 + $0xb8] sm:$0xff]  ;;  %v318_v46 = vld [vmem:[%s6752_s1 + $0xc0] sm:$0xff] }
  0x15   : > { %4236 = vmatprep.mubr.msk.f32.mxu0 %vm390_vm0, %v296_v3  ;;  %4751 = vmatpush3.bf16.msra.mxu0 %v4822_v5  ;;  %v361_v47 = vld [vmem:[%s6752_s1 + $0x218] sm:$0xff]  ;;  %v362_v48 = vld [vmem:[%s6752_s1 + $0x220] sm:$0xff]  ;;  %v319_v49 = vld [vmem:[%s6752_s1 + $0xc8] sm:$0xff] }
  0x16   : > { %4752 = vmatprep.subr.bf16.mxu0 %v4821_v4  ;;  %4734 = vmatprep.subr.bf16.mxu1 %v4822_v5  ;;  %v320_v50 = vld [vmem:[%s6752_s1 + $0xd0] sm:$0xff]  ;;  %v363_v51 = vld [vmem:[%s6752_s1 + $0x228] sm:$0xff]  ;;  %v321_v53 = vld [vmem:[%s6752_s1 + $0xd8] sm:$0xff] }
  0x17   : > { %4306 = vmatmul.mubr.msk.f32.vlgmr.msra.gmra.mrb[0].mxu1 %vm390_vm0, %v343_v11  ;;  %v364_v52 = vld [vmem:[%s6752_s1 + $0x230] sm:$0xff]  ;;  %v322_v54 = vld [vmem:[%s6752_s1 + $0xe0] sm:$0xff]  ;;  %v365_v55 = vld [vmem:[%s6752_s1 + $0x238] sm:$0xff] }
  0x18   : > { %4237 = vmatmul.mubr.msk.f32.gmra.mrb[2].mxu0 %vm390_vm0, %v297_v6  ;;  %4308 = vmatprep.mubr.msk.f32.mxu1 %vm390_vm0, %v344_v12  ;;  %v366_v56 = vld [vmem:[%s6752_s1 + $0x240] sm:$0xff]  ;;  %v323_v57 = vld [vmem:[%s6752_s1 + $0xe8] sm:$0xff]  ;;  %v324_v58 = vld [vmem:[%s6752_s1 + $0xf0] sm:$0xff] }
  0x19   : > { %4239 = vmatprep.mubr.msk.f32.mxu0 %vm390_vm0, %v298_v7  ;;  %4753 = vmatpush3.bf16.msra.mxu0 %v4822_v5  ;;  %v367_v59 = vld [vmem:[%s6752_s1 + $0x248] sm:$0xff]  ;;  %v368_v60 = vld [vmem:[%s6752_s1 + $0x250] sm:$0xff]  ;;  %v325_v61 = vld [vmem:[%s6752_s1 + $0xf8] sm:$0xff] }
  0x1a   : > { %4754 = vmatprep.subr.bf16.mxu0 %v4821_v4  ;;  %4735 = vmatpush3.bf16.msra.mxu1 %v4822_v5  ;;  %v326_v62 = vld [vmem:[%s6752_s1 + $0x100] sm:$0xff]  ;;  %v369_v63 = vld [vmem:[%s6752_s1 + $0x258] sm:$0xff]  ;;  %v327_v2 = vld [vmem:[%s6752_s1 + $0x108] sm:$0xff] }
  0x1b   : > { %4736 = vmatprep.subr.bf16.mxu1 %v4822_v5  ;;  %4309 = vmatmul.mubr.msk.f32.gmra.mrb[2].mxu1 %vm390_vm0, %v345_v15  ;;  %v370_v0 = vld [vmem:[%s6752_s1 + $0x260] sm:$0xff]  ;;  %v328_v3 = vld [vmem:[%s6752_s1 + $0x110] sm:$0xff]  ;;  %v329_v6 = vld [vmem:[%s6752_s1 + $0x118] sm:$0xff] }
  0x1c   : > { %4240 = vmatmul.mubr.msk.f32.gmra.mrb[4].mxu0 %vm390_vm0, %v299_v8  ;;  %4311 = vmatprep.mubr.msk.f32.mxu1 %vm390_vm0, %v346_v16  ;;  %v330_v7 = vld [vmem:[%s6752_s1 + $0x120] sm:$0xff]  ;;  %v373_v8 = vld [vmem:[%s6752_s1 + $0x278] sm:$0xff]  ;;  %v331_v10 = vld [vmem:[%s6752_s1 + $0x128] sm:$0xff] }
  0x1d   : > { %4242 = vmatprep.mubr.msk.f32.mxu0 %vm390_vm0, %v300_v9  ;;  %4755 = vmatpush3.bf16.msra.mxu0 %v4822_v5  ;;  %v374_v9 = vld [vmem:[%s6752_s1 + $0x280] sm:$0xff]  ;;  %v332_v11 = vld [vmem:[%s6752_s1 + $0x130] sm:$0xff]  ;;  %v375_v12 = vld [vmem:[%s6752_s1 + $0x288] sm:$0xff] }
  0x1e   : > { %4756 = vmatprep.subr.bf16.mxu0 %v4821_v4  ;;  %4737 = vmatpush3.bf16.msra.mxu1 %v4822_v5  ;;  %v334_v15 = vld [vmem:[%s6752_s1 + $0x140] sm:$0xff]  ;;  %v377_v16 = vld [vmem:[%s6752_s1 + $0x298] sm:$0xff] }
  0x1f   : > { %4738 = vmatprep.subr.bf16.mxu1 %v4822_v5  ;;  %4312 = vmatmul.mubr.msk.f32.gmra.mrb[4].mxu1 %vm390_vm0, %v347_v19  ;;  %v336_v19 = vld [vmem:[%s6752_s1 + $0x150] sm:$0xff] }
  0x20   : > { %4243 = vmatmul.mubr.msk.f32.gmra.mrb[6].mxu0 %vm390_vm0, %v301_v13  ;;  %4314 = vmatprep.mubr.msk.f32.mxu1 %vm390_vm0, %v348_v20  ;;  %v376_v13 = vld [vmem:[%s6752_s1 + $0x290] sm:$0xff]  ;;  %v379_v20 = vld [vmem:[%s6752_s1 + $0x2a8] sm:$0xff] }
  0x21   : > { %4245 = vmatprep.mubr.msk.f32.mxu0 %vm390_vm0, %v302_v14  ;;  %4757 = vmatpush3.bf16.msra.mxu0 %v4822_v5  ;;  %v333_v14 = vld [vmem:[%s6752_s1 + $0x138] sm:$0xff] }
  0x22   : > { %4758 = vmatprep.subr.bf16.mxu0 %v4821_v4  ;;  %4739 = vmatpush3.bf16.msra.mxu1 %v4822_v5 }
  0x23   : > { %4740 = vmatprep.subr.bf16.mxu1 %v4822_v5  ;;  %4315 = vmatmul.mubr.msk.f32.gmra.mrb[6].mxu1 %vm390_vm0, %v349_v23  ;;  %v338_v23 = vld [vmem:[%s6752_s1 + $0x160] sm:$0xff] }
  0x24   : > { %4246 = vmatmul.mubr.msk.f32.gmra.mrb[8].mxu0 %vm390_vm0, %v303_v17  ;;  %4317 = vmatprep.mubr.msk.f32.mxu1 %vm390_vm0, %v350_v24  ;;  %v378_v17 = vld [vmem:[%s6752_s1 + $0x2a0] sm:$0xff]  ;;  %v381_v24 = vld [vmem:[%s6752_s1 + $0x2b8] sm:$0xff] }
  0x25   : > { %4248 = vmatprep.mubr.msk.f32.mxu0 %vm390_vm0, %v304_v18  ;;  %4759 = vmatpush3.bf16.msra.mxu0 %v4822_v5  ;;  %v335_v18 = vld [vmem:[%s6752_s1 + $0x148] sm:$0xff] }
  0x26   : > { %4760 = vmatprep.subr.bf16.mxu0 %v4821_v4  ;;  %4741 = vmatpush3.bf16.msra.mxu1 %v4822_v5 }
  0x27   : > { %4742 = vmatprep.subr.bf16.mxu1 %v4822_v5  ;;  %4318 = vmatmul.mubr.msk.f32.gmra.mrb[8].mxu1 %vm390_vm0, %v351_v27  ;;  %v340_v27 = vld [vmem:[%s6752_s1 + $0x170] sm:$0xff] }
  0x28   : > { %4249 = vmatmul.mubr.msk.f32.gmra.mrb[10].mxu0 %vm390_vm0, %v305_v21  ;;  %4320 = vmatprep.mubr.msk.f32.mxu1 %vm390_vm0, %v352_v28  ;;  %v380_v21 = vld [vmem:[%s6752_s1 + $0x2b0] sm:$0xff]  ;;  %v383_v28 = vld [vmem:[%s6752_s1 + $0x2c8] sm:$0xff] }
  0x29   : > { %4251 = vmatprep.mubr.msk.f32.mxu0 %vm390_vm0, %v306_v22  ;;  %4761 = vmatpush3.bf16.msra.mxu0 %v4822_v5  ;;  %v337_v22 = vld [vmem:[%s6752_s1 + $0x158] sm:$0xff] }
  0x2a   : > { %4762 = vmatprep.subr.bf16.mxu0 %v4821_v4  ;;  %4743 = vmatpush3.bf16.msra.mxu1 %v4822_v5 }
  0x2b   : > { %4744 = vmatprep.subr.bf16.mxu1 %v4822_v5  ;;  %4321 = vmatmul.mubr.msk.f32.gmra.mrb[10].mxu1 %vm390_vm0, %v353_v31  ;;  %v385_v31 = vld [vmem:[%s6752_s1 + $0x2d8] sm:$0xff] }
  0x2c   : > { %4252 = vmatmul.mubr.msk.f32.gmra.mrb[12].mxu0 %vm390_vm0, %v307_v25  ;;  %4323 = vmatprep.mubr.msk.f32.mxu1 %vm390_vm0, %v354_v32  ;;  %v382_v25 = vld [vmem:[%s6752_s1 + $0x2c0] sm:$0xff] }
  0x2d   : > { %4254 = vmatprep.mubr.msk.f32.mxu0 %vm390_vm0, %v308_v26  ;;  %4763 = vmatpush3.bf16.msra.mxu0 %v4822_v5  ;;  %v339_v26 = vld [vmem:[%s6752_s1 + $0x168] sm:$0xff]  ;;  %v386_v32 = vld [vmem:[%s6752_s1 + $0x2e0] sm:$0xff] }
  0x2e   : > { %4764 = vmatprep.subr.bf16.mxu0 %v4821_v4  ;;  %4745 = vmatpush3.bf16.msra.mxu1 %v4822_v5  ;;  %v371_v4 = vld [vmem:[%s6752_s1 + $0x268] sm:$0xff] }
  0x2f   : > { %4746 = vmatprep.subr.bf16.mxu1 %v4822_v5  ;;  %4324 = vmatmul.mubr.msk.f32.gmra.mrb[12].mxu1 %vm390_vm0, %v355_v35  ;;  %v388_v35 = vld [vmem:[%s6752_s1 + $0x2f0] sm:$0xff] }
  0x30   : > { %4255 = vmatmul.mubr.msk.f32.gmra.mrb[14].mxu0 %vm390_vm0, %v309_v29  ;;  %4326 = vmatprep.mubr.msk.f32.mxu1 %vm390_vm0, %v356_v36  ;;  %v384_v29 = vld [vmem:[%s6752_s1 + $0x2d0] sm:$0xff]  ;;  %v389_v36 = vld [vmem:[%s6752_s1 + $0x2f8] sm:$0xff] }
  0x31   : > { %4257 = vmatprep.mubr.msk.f32.mxu0 %vm390_vm0, %v310_v30  ;;  %4765 = vmatpush3.bf16.msra.mxu0 %v4822_v5  ;;  %v341_v30 = vld [vmem:[%s6752_s1 + $0x178] sm:$0xff] }
  0x32   : > { %4747 = vmatpush3.bf16.msra.mxu1 %v4822_v5 }
  0x33   : > { %4748 = vmatprep.subr.bf16.mxu1 %v4822_v5  ;;  %4327 = vmatmul.mubr.msk.f32.gmra.mrb[14].mxu1 %vm390_vm0, %v357_v39 }
  0x34   : > { %4258 = vmatmul.mubr.msk.f32.gmra.mrb[16].mxu0 %vm390_vm0, %v311_v33  ;;  %4329 = vmatprep.mubr.msk.f32.mxu1 %vm390_vm0, %v358_v40  ;;  %v4824_v33 = vmov 0.0  }
  0x35   : > { %4260 = vmatprep.mubr.msk.f32.mxu0 %vm390_vm0, %v312_v34  ;;  %v387_v34 = vld [vmem:[%s6752_s1 + $0x2e8] sm:$0xff]  ;;  %292 = vst.msk [vmem:[#allocation2] sm:$0xff] %vm195_vm2, %v4824_v33  ;;  %196 = vst.msk [vmem:[%s5297_s4] sm:$0xff] %vm195_vm2, %v4824_v33 }
  0x36   : > { %4749 = vmatpush3.bf16.msra.mxu1 %v4822_v5  ;;  %v372_v5 = vld [vmem:[%s6752_s1 + $0x270] sm:$0xff]  ;;  %197 = vst.msk [vmem:[%s5297_s4 + $0x8] sm:$0xff] %vm195_vm2, %v4824_v33  ;;  %198 = vst.msk [vmem:[%s5297_s4 + $0x10] sm:$0xff] %vm195_vm2, %v4824_v33 }
  0x37   : > { %4330 = vmatmul.mubr.msk.f32.gmra.mrb[16].mxu1 %vm390_vm0, %v359_v43  ;;  %199 = vst.msk [vmem:[%s5297_s4 + $0x18] sm:$0xff] %vm195_vm2, %v4824_v33  ;;  %200 = vst.msk [vmem:[%s5297_s4 + $0x20] sm:$0xff] %vm195_vm2, %v4824_v33 }
  0x38   : > { %4261 = vmatmul.mubr.msk.f32.gmra.mrb[18].mxu0 %vm390_vm0, %v313_v37  ;;  %4332 = vmatprep.mubr.msk.f32.mxu1 %vm390_vm0, %v360_v44  ;;  %201 = vst.msk [vmem:[%s5297_s4 + $0x28] sm:$0xff] %vm195_vm2, %v4824_v33  ;;  %202 = vst.msk [vmem:[%s5297_s4 + $0x30] sm:$0xff] %vm195_vm2, %v4824_v33 }
  0x39   : > { %4263 = vmatprep.mubr.msk.f32.mxu0 %vm390_vm0, %v314_v38  ;;  %203 = vst.msk [vmem:[%s5297_s4 + $0x38] sm:$0xff] %vm195_vm2, %v4824_v33  ;;  %204 = vst.msk [vmem:[%s5297_s4 + $0x40] sm:$0xff] %vm195_vm2, %v4824_v33 }
  0x3a   : > { %205 = vst.msk [vmem:[%s5297_s4 + $0x48] sm:$0xff] %vm195_vm2, %v4824_v33  ;;  %206 = vst.msk [vmem:[%s5297_s4 + $0x50] sm:$0xff] %vm195_vm2, %v4824_v33 }
  0x3b   : > { %4333 = vmatmul.mubr.msk.f32.gmra.mrb[18].mxu1 %vm390_vm0, %v361_v47  ;;  %207 = vst.msk [vmem:[%s5297_s4 + $0x58] sm:$0xff] %vm195_vm2, %v4824_v33  ;;  %208 = vst.msk [vmem:[%s5297_s4 + $0x60] sm:$0xff] %vm195_vm2, %v4824_v33 }
  0x3c   : > { %4264 = vmatmul.mubr.msk.f32.gmra.mrb[20].mxu0 %vm390_vm0, %v315_v41  ;;  %4335 = vmatprep.mubr.msk.f32.mxu1 %vm390_vm0, %v362_v48  ;;  %209 = vst.msk [vmem:[%s5297_s4 + $0x68] sm:$0xff] %vm195_vm2, %v4824_v33  ;;  %210 = vst.msk [vmem:[%s5297_s4 + $0x70] sm:$0xff] %vm195_vm2, %v4824_v33 }
  0x3d   : > { %4266 = vmatprep.mubr.msk.f32.mxu0 %vm390_vm0, %v316_v42  ;;  %211 = vst.msk [vmem:[%s5297_s4 + $0x78] sm:$0xff] %vm195_vm2, %v4824_v33  ;;  %212 = vst.msk [vmem:[%s5297_s4 + $0x80] sm:$0xff] %vm195_vm2, %v4824_v33 }
  0x3e   : > { %213 = vst.msk [vmem:[%s5297_s4 + $0x88] sm:$0xff] %vm195_vm2, %v4824_v33  ;;  %214 = vst.msk [vmem:[%s5297_s4 + $0x90] sm:$0xff] %vm195_vm2, %v4824_v33 }
  0x3f   : > { %4336 = vmatmul.mubr.msk.f32.gmra.mrb[20].mxu1 %vm390_vm0, %v363_v51  ;;  %215 = vst.msk [vmem:[%s5297_s4 + $0x98] sm:$0xff] %vm195_vm2, %v4824_v33  ;;  %216 = vst.msk [vmem:[%s5297_s4 + $0xa0] sm:$0xff] %vm195_vm2, %v4824_v33 }
  0x40   : > { %4267 = vmatmul.mubr.msk.f32.gmra.mrb[22].mxu0 %vm390_vm0, %v317_v45  ;;  %4338 = vmatprep.mubr.msk.f32.mxu1 %vm390_vm0, %v364_v52  ;;  %217 = vst.msk [vmem:[%s5297_s4 + $0xa8] sm:$0xff] %vm195_vm2, %v4824_v33  ;;  %218 = vst.msk [vmem:[%s5297_s4 + $0xb0] sm:$0xff] %vm195_vm2, %v4824_v33 }
  0x41   : > { %4269 = vmatprep.mubr.msk.f32.mxu0 %vm390_vm0, %v318_v46  ;;  %219 = vst.msk [vmem:[%s5297_s4 + $0xb8] sm:$0xff] %vm195_vm2, %v4824_v33  ;;  %220 = vst.msk [vmem:[%s5297_s4 + $0xc0] sm:$0xff] %vm195_vm2, %v4824_v33 }
  0x42   : > { %221 = vst.msk [vmem:[%s5297_s4 + $0xc8] sm:$0xff] %vm195_vm2, %v4824_v33  ;;  %222 = vst.msk [vmem:[%s5297_s4 + $0xd0] sm:$0xff] %vm195_vm2, %v4824_v33 }
  0x43   : > { %4339 = vmatmul.mubr.msk.f32.gmra.mrb[22].mxu1 %vm390_vm0, %v365_v55  ;;  %223 = vst.msk [vmem:[%s5297_s4 + $0xd8] sm:$0xff] %vm195_vm2, %v4824_v33  ;;  %224 = vst.msk [vmem:[%s5297_s4 + $0xe0] sm:$0xff] %vm195_vm2, %v4824_v33 }
  0x44   : > { %4270 = vmatmul.mubr.msk.f32.gmra.mrb[24].mxu0 %vm390_vm0, %v319_v49  ;;  %4341 = vmatprep.mubr.msk.f32.mxu1 %vm390_vm0, %v366_v56  ;;  %225 = vst.msk [vmem:[%s5297_s4 + $0xe8] sm:$0xff] %vm195_vm2, %v4824_v33  ;;  %226 = vst.msk [vmem:[%s5297_s4 + $0xf0] sm:$0xff] %vm195_vm2, %v4824_v33 }
  0x45   : > { %4272 = vmatprep.mubr.msk.f32.mxu0 %vm390_vm0, %v320_v50  ;;  %227 = vst.msk [vmem:[%s5297_s4 + $0xf8] sm:$0xff] %vm195_vm2, %v4824_v33  ;;  %228 = vst.msk [vmem:[%s5297_s4 + $0x100] sm:$0xff] %vm195_vm2, %v4824_v33 }
  0x46   : > { %229 = vst.msk [vmem:[%s5297_s4 + $0x108] sm:$0xff] %vm195_vm2, %v4824_v33  ;;  %230 = vst.msk [vmem:[%s5297_s4 + $0x110] sm:$0xff] %vm195_vm2, %v4824_v33 }
  0x47   : > { %4342 = vmatmul.mubr.msk.f32.gmra.mrb[24].mxu1 %vm390_vm0, %v367_v59  ;;  %231 = vst.msk [vmem:[%s5297_s4 + $0x118] sm:$0xff] %vm195_vm2, %v4824_v33  ;;  %232 = vst.msk [vmem:[%s5297_s4 + $0x120] sm:$0xff] %vm195_vm2, %v4824_v33 }
  0x48   : > { %4273 = vmatmul.mubr.msk.f32.gmra.mrb[26].mxu0 %vm390_vm0, %v321_v53  ;;  %4344 = vmatprep.mubr.msk.f32.mxu1 %vm390_vm0, %v368_v60  ;;  %233 = vst.msk [vmem:[%s5297_s4 + $0x128] sm:$0xff] %vm195_vm2, %v4824_v33  ;;  %234 = vst.msk [vmem:[%s5297_s4 + $0x130] sm:$0xff] %vm195_vm2, %v4824_v33 }
  0x49   : > { %4275 = vmatprep.mubr.msk.f32.mxu0 %vm390_vm0, %v322_v54  ;;  %235 = vst.msk [vmem:[%s5297_s4 + $0x138] sm:$0xff] %vm195_vm2, %v4824_v33  ;;  %236 = vst.msk [vmem:[%s5297_s4 + $0x140] sm:$0xff] %vm195_vm2, %v4824_v33 }
  0x4a   : > { %237 = vst.msk [vmem:[%s5297_s4 + $0x148] sm:$0xff] %vm195_vm2, %v4824_v33  ;;  %238 = vst.msk [vmem:[%s5297_s4 + $0x150] sm:$0xff] %vm195_vm2, %v4824_v33 }
  0x4b   : > { %4345 = vmatmul.mubr.msk.f32.gmra.mrb[26].mxu1 %vm390_vm0, %v369_v63  ;;  %239 = vst.msk [vmem:[%s5297_s4 + $0x158] sm:$0xff] %vm195_vm2, %v4824_v33  ;;  %240 = vst.msk [vmem:[%s5297_s4 + $0x160] sm:$0xff] %vm195_vm2, %v4824_v33 }
  0x4c   : > { %4276 = vmatmul.mubr.msk.f32.gmra.mrb[28].mxu0 %vm390_vm0, %v323_v57  ;;  %4347 = vmatprep.mubr.msk.f32.mxu1 %vm390_vm0, %v370_v0  ;;  %241 = vst.msk [vmem:[%s5297_s4 + $0x168] sm:$0xff] %vm195_vm2, %v4824_v33  ;;  %242 = vst.msk [vmem:[%s5297_s4 + $0x170] sm:$0xff] %vm195_vm2, %v4824_v33 }
  0x4d   : > { %4278 = vmatprep.mubr.msk.f32.mxu0 %vm390_vm0, %v324_v58  ;;  %243 = vst.msk [vmem:[%s5297_s4 + $0x178] sm:$0xff] %vm195_vm2, %v4824_v33  ;;  %244 = vst.msk [vmem:[%s5297_s4 + $0x180] sm:$0xff] %vm195_vm2, %v4824_v33 }
  0x4e   : > { %245 = vst.msk [vmem:[%s5297_s4 + $0x188] sm:$0xff] %vm195_vm2, %v4824_v33  ;;  %246 = vst.msk [vmem:[%s5297_s4 + $0x190] sm:$0xff] %vm195_vm2, %v4824_v33 }
  0x4f   : > { %4348 = vmatmul.mubr.msk.f32.gmra.mrb[28].mxu1 %vm390_vm0, %v371_v4  ;;  %247 = vst.msk [vmem:[%s5297_s4 + $0x198] sm:$0xff] %vm195_vm2, %v4824_v33  ;;  %248 = vst.msk [vmem:[%s5297_s4 + $0x1a0] sm:$0xff] %vm195_vm2, %v4824_v33 }
  0x50   : > { %4279 = vmatmul.mubr.msk.f32.gmra.mrb[30].mxu0 %vm390_vm0, %v325_v61  ;;  %4350 = vmatprep.mubr.msk.f32.mxu1 %vm390_vm0, %v372_v5  ;;  %249 = vst.msk [vmem:[%s5297_s4 + $0x1a8] sm:$0xff] %vm195_vm2, %v4824_v33  ;;  %250 = vst.msk [vmem:[%s5297_s4 + $0x1b0] sm:$0xff] %vm195_vm2, %v4824_v33 }
  0x51   : > { %4281 = vmatprep.mubr.msk.f32.mxu0 %vm390_vm0, %v326_v62  ;;  %251 = vst.msk [vmem:[%s5297_s4 + $0x1b8] sm:$0xff] %vm195_vm2, %v4824_v33  ;;  %252 = vst.msk [vmem:[%s5297_s4 + $0x1c0] sm:$0xff] %vm195_vm2, %v4824_v33 }
  0x52   : > { %253 = vst.msk [vmem:[%s5297_s4 + $0x1c8] sm:$0xff] %vm195_vm2, %v4824_v33  ;;  %254 = vst.msk [vmem:[%s5297_s4 + $0x1d0] sm:$0xff] %vm195_vm2, %v4824_v33 }
  0x53   : > { %4351 = vmatmul.mubr.msk.f32.gmra.mrb[30].mxu1 %vm390_vm0, %v373_v8  ;;  %255 = vst.msk [vmem:[%s5297_s4 + $0x1d8] sm:$0xff] %vm195_vm2, %v4824_v33  ;;  %256 = vst.msk [vmem:[%s5297_s4 + $0x1e0] sm:$0xff] %vm195_vm2, %v4824_v33 }
  0x54   : > { %4282 = vmatmul.mubr.msk.f32.gmra.mrb[32].mxu0 %vm390_vm0, %v327_v2  ;;  %4353 = vmatprep.mubr.msk.f32.mxu1 %vm390_vm0, %v374_v9  ;;  %257 = vst.msk [vmem:[%s5297_s4 + $0x1e8] sm:$0xff] %vm195_vm2, %v4824_v33  ;;  %258 = vst.msk [vmem:[%s5297_s4 + $0x1f0] sm:$0xff] %vm195_vm2, %v4824_v33 }
  0x55   : > { %4284 = vmatprep.mubr.msk.f32.mxu0 %vm390_vm0, %v328_v3  ;;  %259 = vst.msk [vmem:[%s5297_s4 + $0x1f8] sm:$0xff] %vm195_vm2, %v4824_v33  ;;  %260 = vst.msk [vmem:[%s5297_s4 + $0x200] sm:$0xff] %vm195_vm2, %v4824_v33 }
  0x56   : > { %261 = vst.msk [vmem:[%s5297_s4 + $0x208] sm:$0xff] %vm195_vm2, %v4824_v33  ;;  %262 = vst.msk [vmem:[%s5297_s4 + $0x210] sm:$0xff] %vm195_vm2, %v4824_v33 }
  0x57   : > { %4354 = vmatmul.mubr.msk.f32.gmra.mrb[32].mxu1 %vm390_vm0, %v375_v12  ;;  %263 = vst.msk [vmem:[%s5297_s4 + $0x218] sm:$0xff] %vm195_vm2, %v4824_v33  ;;  %264 = vst.msk [vmem:[%s5297_s4 + $0x220] sm:$0xff] %vm195_vm2, %v4824_v33 }
  0x58   : > { %4285 = vmatmul.mubr.msk.f32.gmra.mrb[34].mxu0 %vm390_vm0, %v329_v6  ;;  %4356 = vmatprep.mubr.msk.f32.mxu1 %vm390_vm0, %v376_v13  ;;  %265 = vst.msk [vmem:[%s5297_s4 + $0x228] sm:$0xff] %vm195_vm2, %v4824_v33  ;;  %266 = vst.msk [vmem:[%s5297_s4 + $0x230] sm:$0xff] %vm195_vm2, %v4824_v33 }
  0x59   : > { %4287 = vmatprep.mubr.msk.f32.mxu0 %vm390_vm0, %v330_v7  ;;  %267 = vst.msk [vmem:[%s5297_s4 + $0x238] sm:$0xff] %vm195_vm2, %v4824_v33  ;;  %268 = vst.msk [vmem:[%s5297_s4 + $0x240] sm:$0xff] %vm195_vm2, %v4824_v33 }
  0x5a   : > { %269 = vst.msk [vmem:[%s5297_s4 + $0x248] sm:$0xff] %vm195_vm2, %v4824_v33  ;;  %270 = vst.msk [vmem:[%s5297_s4 + $0x250] sm:$0xff] %vm195_vm2, %v4824_v33 }
  0x5b   : > { %4357 = vmatmul.mubr.msk.f32.gmra.mrb[34].mxu1 %vm390_vm0, %v377_v16  ;;  %271 = vst.msk [vmem:[%s5297_s4 + $0x258] sm:$0xff] %vm195_vm2, %v4824_v33  ;;  %272 = vst.msk [vmem:[%s5297_s4 + $0x260] sm:$0xff] %vm195_vm2, %v4824_v33 }
  0x5c   : > { %4288 = vmatmul.mubr.msk.f32.gmra.mrb[36].mxu0 %vm390_vm0, %v331_v10  ;;  %4359 = vmatprep.mubr.msk.f32.mxu1 %vm390_vm0, %v378_v17  ;;  %273 = vst.msk [vmem:[%s5297_s4 + $0x268] sm:$0xff] %vm195_vm2, %v4824_v33  ;;  %274 = vst.msk [vmem:[%s5297_s4 + $0x270] sm:$0xff] %vm195_vm2, %v4824_v33 }
  0x5d   : > { %4290 = vmatprep.mubr.msk.f32.mxu0 %vm390_vm0, %v332_v11  ;;  %275 = vst.msk [vmem:[%s5297_s4 + $0x278] sm:$0xff] %vm195_vm2, %v4824_v33  ;;  %276 = vst.msk [vmem:[%s5297_s4 + $0x280] sm:$0xff] %vm195_vm2, %v4824_v33 }
  0x5e   : > { %277 = vst.msk [vmem:[%s5297_s4 + $0x288] sm:$0xff] %vm195_vm2, %v4824_v33  ;;  %278 = vst.msk [vmem:[%s5297_s4 + $0x290] sm:$0xff] %vm195_vm2, %v4824_v33 }
  0x5f   : > { %4360 = vmatmul.mubr.msk.f32.gmra.mrb[36].mxu1 %vm390_vm0, %v379_v20  ;;  %279 = vst.msk [vmem:[%s5297_s4 + $0x298] sm:$0xff] %vm195_vm2, %v4824_v33  ;;  %280 = vst.msk [vmem:[%s5297_s4 + $0x2a0] sm:$0xff] %vm195_vm2, %v4824_v33 }
  0x60   : > { %4291 = vmatmul.mubr.msk.f32.gmra.mrb[38].mxu0 %vm390_vm0, %v333_v14  ;;  %4362 = vmatprep.mubr.msk.f32.mxu1 %vm390_vm0, %v380_v21  ;;  %281 = vst.msk [vmem:[%s5297_s4 + $0x2a8] sm:$0xff] %vm195_vm2, %v4824_v33  ;;  %282 = vst.msk [vmem:[%s5297_s4 + $0x2b0] sm:$0xff] %vm195_vm2, %v4824_v33 }
  0x61   : > { %4293 = vmatprep.mubr.msk.f32.mxu0 %vm390_vm0, %v334_v15  ;;  %283 = vst.msk [vmem:[%s5297_s4 + $0x2b8] sm:$0xff] %vm195_vm2, %v4824_v33  ;;  %284 = vst.msk [vmem:[%s5297_s4 + $0x2c0] sm:$0xff] %vm195_vm2, %v4824_v33 }
  0x62   : > { %285 = vst.msk [vmem:[%s5297_s4 + $0x2c8] sm:$0xff] %vm195_vm2, %v4824_v33  ;;  %286 = vst.msk [vmem:[%s5297_s4 + $0x2d0] sm:$0xff] %vm195_vm2, %v4824_v33 }
  0x63   : > { %4363 = vmatmul.mubr.msk.f32.gmra.mrb[38].mxu1 %vm390_vm0, %v381_v24  ;;  %287 = vst.msk [vmem:[%s5297_s4 + $0x2d8] sm:$0xff] %vm195_vm2, %v4824_v33  ;;  %288 = vst.msk [vmem:[%s5297_s4 + $0x2e0] sm:$0xff] %vm195_vm2, %v4824_v33 }
  0x64   : > { %4294 = vmatmul.mubr.msk.f32.gmra.mrb[40].mxu0 %vm390_vm0, %v335_v18  ;;  %4365 = vmatprep.mubr.msk.f32.mxu1 %vm390_vm0, %v382_v25  ;;  %289 = vst.msk [vmem:[%s5297_s4 + $0x2e8] sm:$0xff] %vm195_vm2, %v4824_v33  ;;  %290 = vst.msk [vmem:[%s5297_s4 + $0x2f0] sm:$0xff] %vm195_vm2, %v4824_v33 }
  0x65   : > { %4296 = vmatprep.mubr.msk.f32.mxu0 %vm390_vm0, %v336_v19  ;;  %291 = vst.msk [vmem:[%s5297_s4 + $0x2f8] sm:$0xff] %vm195_vm2, %v4824_v33 }
  0x67   : > { %4366 = vmatmul.mubr.msk.f32.gmra.mrb[40].mxu1 %vm390_vm0, %v383_v28 }
  0x68   : > { %4297 = vmatmul.mubr.msk.f32.gmra.mrb[42].mxu0 %vm390_vm0, %v337_v22  ;;  %4368 = vmatprep.mubr.msk.f32.mxu1 %vm390_vm0, %v384_v29 }
  0x69   : > { %4299 = vmatprep.mubr.msk.f32.mxu0 %vm390_vm0, %v338_v23 }
  0x6b   : > { %4369 = vmatmul.mubr.msk.f32.gmra.mrb[42].mxu1 %vm390_vm0, %v385_v31 }
  0x6c   : > { %4300 = vmatmul.mubr.msk.f32.gmra.mrb[44].mxu0 %vm390_vm0, %v339_v26  ;;  %4371 = vmatprep.mubr.msk.f32.mxu1 %vm390_vm0, %v386_v32 }
  0x6d   : > { %4302 = vmatprep.mubr.msk.f32.mxu0 %vm390_vm0, %v340_v27 }
  0x6f   : > { %4372 = vmatmul.mubr.msk.f32.gmra.mrb[44].mxu1 %vm390_vm0, %v387_v34 }
  0x70   : > { %4303 = vmatmul.mubr.msk.f32.gmra.mrb[46].mxu0 %vm390_vm0, %v341_v30  ;;  %4374 = vmatprep.mubr.msk.f32.mxu1 %vm390_vm0, %v388_v35 }
  0x71   : > { %4585 = vmatprep.mubr.msk.f32.mxu0 %vm4823_vm1, %v4824_v33 }
  0x73   : > { %4375 = vmatmul.mubr.msk.f32.gmra.mrb[46].mxu1 %vm390_vm0, %v389_v36 }
  0x74   : > { %4586 = vmatmul.mubr.f32.vlgmr.msra.gmra.mrb[48].mxu0 %v4873_v1  ;;  %v2326_v1 = vld [vmem:[%s6753_s2] sm:$0xff] }
  0x75   : > { %4590 = vmatprep.mubr.msk.f32.mxu0 %vm390_vm0, %v2326_v1 }
  0xe7   : > { %v4235_v37 = vpop.f32.mrb[0].mxu0 }
  0xe8   : > { %v1225_v38 = vmul.f32 0.01, %v4235_v37  ;;  %v745_v39 = vpop.f32.mrb[1].mxu0 }
  0xe9   : > { %v1224_v40 = vmul.f32 0.01, %v745_v39 }
  0xea   : > { %v1321_v43 = vmax.f32 %v4235_v37, %v1225_v38  ;;  %v5593_v32 = vpop.f32.mrb[0].mxu1 }
  0xeb   : > { %v1320_v41 = vmax.f32 %v745_v39, %v1224_v40  ;;  %v4238_v42 = vpop.f32.mrb[2].mxu0  ;;  %v5595_v35 = vpop.f32.mrb[1].mxu1 }
  0xec   : > { %v1227_v44 = vmul.f32 0.01, %v4238_v42  ;;  %v755_v45 = vpop.f32.mrb[3].mxu0 }
  0xed   : > { %v1226_v46 = vmul.f32 0.01, %v755_v45  ;;  %4409 = vmatprep.mubr.f32.mxu1 %v1320_v41 }
  0xee   : > { %4410 = vmatmul.mubr.f32.vlgmr.msra.gmra.mrb[48].mxu1 %v1321_v43  ;;  %v1323_v49 = vmax.f32 %v4238_v42, %v1227_v44  ;;  %v5597_v39 = vpop.f32.mrb[2].mxu1 }
  0xef   : > { %v1322_v47 = vmax.f32 %v755_v45, %v1226_v46  ;;  %v4241_v48 = vpop.f32.mrb[4].mxu0  ;;  %v5599_v42 = vpop.f32.mrb[3].mxu1 }
  0xf0   : > { %v1229_v50 = vmul.f32 0.01, %v4241_v48  ;;  %v765_v51 = vpop.f32.mrb[5].mxu0 }
  0xf1   : > { %v1228_v52 = vmul.f32 0.01, %v765_v51  ;;  %4412 = vmatprep.mubr.f32.mxu1 %v1322_v47 }
  0xf2   : > { %4413 = vmatmul.mubr.f32.gmra.mrb[50].mxu1 %v1323_v49  ;;  %v1325_v55 = vmax.f32 %v4241_v48, %v1229_v50  ;;  %v5601_v46 = vpop.f32.mrb[4].mxu1 }
  0xf3   : > { %v1324_v53 = vmax.f32 %v765_v51, %v1228_v52  ;;  %v4244_v54 = vpop.f32.mrb[6].mxu0  ;;  %v5603_v48 = vpop.f32.mrb[5].mxu1 }
  0xf4   : > { %v1231_v56 = vmul.f32 0.01, %v4244_v54  ;;  %v775_v57 = vpop.f32.mrb[7].mxu0 }
  0xf5   : > { %v1230_v58 = vmul.f32 0.01, %v775_v57  ;;  %4415 = vmatprep.mubr.f32.mxu1 %v1324_v53 }
  0xf6   : > { %4416 = vmatmul.mubr.f32.gmra.mrb[52].mxu1 %v1325_v55  ;;  %v1327_v61 = vmax.f32 %v4244_v54, %v1231_v56  ;;  %v5605_v49 = vpop.f32.mrb[6].mxu1 }
  0xf7   : > { %v1326_v59 = vmax.f32 %v775_v57, %v1230_v58  ;;  %v4247_v60 = vpop.f32.mrb[8].mxu0  ;;  %v5607_v52 = vpop.f32.mrb[7].mxu1 }
  0xf8   : > { %v1233_v62 = vmul.f32 0.01, %v4247_v60  ;;  %v785_v63 = vpop.f32.mrb[9].mxu0 }
  0xf9   : > { %v1232_v0 = vmul.f32 0.01, %v785_v63  ;;  %4418 = vmatprep.mubr.f32.mxu1 %v1326_v59 }
  0xfa   : > { %4419 = vmatmul.mubr.f32.gmra.mrb[54].mxu1 %v1327_v61  ;;  %v1329_v4 = vmax.f32 %v4247_v60, %v1233_v62  ;;  %v5609_v56 = vpop.f32.mrb[8].mxu1 }
  0xfb   : > { %v1328_v2 = vmax.f32 %v785_v63, %v1232_v0  ;;  %v4250_v3 = vpop.f32.mrb[10].mxu0  ;;  %v5611_v58 = vpop.f32.mrb[9].mxu1 }
  0xfc   : > { %v1235_v5 = vmul.f32 0.01, %v4250_v3  ;;  %v795_v6 = vpop.f32.mrb[11].mxu0 }
  0xfd   : > { %v1234_v7 = vmul.f32 0.01, %v795_v6  ;;  %4421 = vmatprep.mubr.f32.mxu1 %v1328_v2 }
  0xfe   : > { %4422 = vmatmul.mubr.f32.gmra.mrb[56].mxu1 %v1329_v4  ;;  %v1331_v10 = vmax.f32 %v4250_v3, %v1235_v5  ;;  %v5613_v59 = vpop.f32.mrb[10].mxu1 }
  0xff   : > { %v1330_v8 = vmax.f32 %v795_v6, %v1234_v7  ;;  %v4253_v9 = vpop.f32.mrb[12].mxu0  ;;  %v5615_v62 = vpop.f32.mrb[11].mxu1 }
 0x100   : > { %v1237_v11 = vmul.f32 0.01, %v4253_v9  ;;  %v805_v12 = vpop.f32.mrb[13].mxu0 }
 0x101   : > { %v1236_v13 = vmul.f32 0.01, %v805_v12  ;;  %4424 = vmatprep.mubr.f32.mxu1 %v1330_v8 }
 0x102   : > { %4425 = vmatmul.mubr.f32.gmra.mrb[58].mxu1 %v1331_v10  ;;  %v1333_v16 = vmax.f32 %v4253_v9, %v1237_v11  ;;  %v5617_v3 = vpop.f32.mrb[12].mxu1 }
 0x103   : > { %v1332_v14 = vmax.f32 %v805_v12, %v1236_v13  ;;  %v4256_v15 = vpop.f32.mrb[14].mxu0  ;;  %v5619_v5 = vpop.f32.mrb[13].mxu1 }
 0x104   : > { %v1239_v17 = vmul.f32 0.01, %v4256_v15  ;;  %v815_v18 = vpop.f32.mrb[15].mxu0 }
 0x105   : > { %v1238_v19 = vmul.f32 0.01, %v815_v18  ;;  %4427 = vmatprep.mubr.f32.mxu1 %v1332_v14 }
 0x106   : > { %4428 = vmatmul.mubr.f32.gmra.mrb[60].mxu1 %v1333_v16  ;;  %v1335_v22 = vmax.f32 %v4256_v15, %v1239_v17  ;;  %v5621_v6 = vpop.f32.mrb[14].mxu1 }
 0x107   : > { %v1334_v20 = vmax.f32 %v815_v18, %v1238_v19  ;;  %v4259_v21 = vpop.f32.mrb[16].mxu0  ;;  %v5623_v9 = vpop.f32.mrb[15].mxu1 }
 0x108   : > { %v1241_v23 = vmul.f32 0.01, %v4259_v21  ;;  %v825_v24 = vpop.f32.mrb[17].mxu0 }
 0x109   : > { %v1240_v25 = vmul.f32 0.01, %v825_v24  ;;  %4430 = vmatprep.mubr.f32.mxu1 %v1334_v20 }
 0x10a   : > { %4431 = vmatmul.mubr.f32.gmra.mrb[62].mxu1 %v1335_v22  ;;  %v1337_v28 = vmax.f32 %v4259_v21, %v1241_v23  ;;  %v5625_v13 = vpop.f32.mrb[16].mxu1 }
 0x10b   : > { %v1336_v26 = vmax.f32 %v825_v24, %v1240_v25  ;;  %v4262_v27 = vpop.f32.mrb[18].mxu0  ;;  %v5627_v15 = vpop.f32.mrb[17].mxu1 }
 0x10c   : > { %v1243_v29 = vmul.f32 0.01, %v4262_v27  ;;  %v835_v30 = vpop.f32.mrb[19].mxu0 }
 0x10d   : > { %v1242_v31 = vmul.f32 0.01, %v835_v30  ;;  %4433 = vmatprep.mubr.f32.mxu1 %v1336_v26 }
 0x10e   : > { %4434 = vmatmul.mubr.f32.gmra.mrb[64].mxu1 %v1337_v28  ;;  %v1339_v36 = vmax.f32 %v4262_v27, %v1243_v29  ;;  %v5629_v16 = vpop.f32.mrb[18].mxu1 }
 0x10f   : > { %v1338_v33 = vmax.f32 %v835_v30, %v1242_v31  ;;  %v4265_v34 = vpop.f32.mrb[20].mxu0  ;;  %v5631_v19 = vpop.f32.mrb[19].mxu1 }
 0x110   : > { %v1245_v1 = vmul.f32 0.01, %v4265_v34  ;;  %v845_v37 = vpop.f32.mrb[21].mxu0 }
 0x111   : > { %v1244_v38 = vmul.f32 0.01, %v845_v37  ;;  %4436 = vmatprep.mubr.f32.mxu1 %v1338_v33 }
 0x112   : > { %4437 = vmatmul.mubr.f32.gmra.mrb[66].mxu1 %v1339_v36  ;;  %v1341_v43 = vmax.f32 %v4265_v34, %v1245_v1  ;;  %v5633_v23 = vpop.f32.mrb[20].mxu1 }
 0x113   : > { %v1340_v40 = vmax.f32 %v845_v37, %v1244_v38  ;;  %v4268_v41 = vpop.f32.mrb[22].mxu0  ;;  %v5635_v25 = vpop.f32.mrb[21].mxu1 }
 0x114   : > { %v1247_v44 = vmul.f32 0.01, %v4268_v41  ;;  %v855_v45 = vpop.f32.mrb[23].mxu0 }
 0x115   : > { %v1246_v47 = vmul.f32 0.01, %v855_v45  ;;  %4439 = vmatprep.mubr.f32.mxu1 %v1340_v40 }
 0x116   : > { %4440 = vmatmul.mubr.f32.gmra.mrb[68].mxu1 %v1341_v43  ;;  %v1343_v53 = vmax.f32 %v4268_v41, %v1247_v44  ;;  %v5637_v26 = vpop.f32.mrb[22].mxu1 }
 0x117   : > { %v1342_v50 = vmax.f32 %v855_v45, %v1246_v47  ;;  %v4271_v51 = vpop.f32.mrb[24].mxu0  ;;  %v5639_v29 = vpop.f32.mrb[23].mxu1 }
 0x118   : > { %v1249_v54 = vmul.f32 0.01, %v4271_v51  ;;  %v865_v55 = vpop.f32.mrb[25].mxu0 }
 0x119   : > { %v1248_v57 = vmul.f32 0.01, %v865_v55  ;;  %4442 = vmatprep.mubr.f32.mxu1 %v1342_v50 }
 0x11a   : > { %4443 = vmatmul.mubr.f32.gmra.mrb[70].mxu1 %v1343_v53  ;;  %v1345_v63 = vmax.f32 %v4271_v51, %v1249_v54  ;;  %v5641_v34 = vpop.f32.mrb[24].mxu1 }
 0x11b   : > { %v1344_v60 = vmax.f32 %v865_v55, %v1248_v57  ;;  %v4274_v61 = vpop.f32.mrb[26].mxu0  ;;  %v5643_v1 = vpop.f32.mrb[25].mxu1 }
 0x11c   : > { %v1251_v0 = vmul.f32 0.01, %v4274_v61  ;;  %v875_v2 = vpop.f32.mrb[27].mxu0 }
 0x11d   : > { %v1250_v4 = vmul.f32 0.01, %v875_v2  ;;  %4445 = vmatprep.mubr.f32.mxu1 %v1344_v60 }
 0x11e   : > { %4446 = vmatmul.mubr.f32.gmra.mrb[72].mxu1 %v1345_v63  ;;  %v1347_v10 = vmax.f32 %v4274_v61, %v1251_v0  ;;  %v5645_v37 = vpop.f32.mrb[26].mxu1 }
 0x11f   : > { %v1346_v7 = vmax.f32 %v875_v2, %v1250_v4  ;;  %v4277_v8 = vpop.f32.mrb[28].mxu0  ;;  %v5647_v41 = vpop.f32.mrb[27].mxu1 }
 0x120   : > { %v1253_v11 = vmul.f32 0.01, %v4277_v8  ;;  %v885_v12 = vpop.f32.mrb[29].mxu0 }
 0x121   : > { %v1252_v14 = vmul.f32 0.01, %v885_v12  ;;  %4448 = vmatprep.mubr.f32.mxu1 %v1346_v7 }
 0x122   : > { %4449 = vmatmul.mubr.f32.gmra.mrb[74].mxu1 %v1347_v10  ;;  %v1349_v20 = vmax.f32 %v4277_v8, %v1253_v11  ;;  %v5649_v47 = vpop.f32.mrb[28].mxu1 }
 0x123   : > { %v1348_v17 = vmax.f32 %v885_v12, %v1252_v14  ;;  %v4280_v18 = vpop.f32.mrb[30].mxu0  ;;  %v5651_v51 = vpop.f32.mrb[29].mxu1 }
 0x124   : > { %v1255_v21 = vmul.f32 0.01, %v4280_v18  ;;  %v895_v22 = vpop.f32.mrb[31].mxu0 }
 0x125   : > { %v1254_v24 = vmul.f32 0.01, %v895_v22  ;;  %4451 = vmatprep.mubr.f32.mxu1 %v1348_v17 }
 0x126   : > { %4452 = vmatmul.mubr.f32.gmra.mrb[76].mxu1 %v1349_v20  ;;  %v1351_v30 = vmax.f32 %v4280_v18, %v1255_v21  ;;  %v5653_v53 = vpop.f32.mrb[30].mxu1 }
 0x127   : > { %v1350_v27 = vmax.f32 %v895_v22, %v1254_v24  ;;  %v4283_v28 = vpop.f32.mrb[32].mxu0  ;;  %v5655_v57 = vpop.f32.mrb[31].mxu1 }
 0x128   : > { %v1257_v31 = vmul.f32 0.01, %v4283_v28  ;;  %v905_v33 = vpop.f32.mrb[33].mxu0 }
 0x129   : > { %v1256_v36 = vmul.f32 0.01, %v905_v33  ;;  %4454 = vmatprep.mubr.f32.mxu1 %v1350_v27 }
 0x12a   : > { %4455 = vmatmul.mubr.f32.gmra.mrb[78].mxu1 %v1351_v30  ;;  %v1353_v43 = vmax.f32 %v4283_v28, %v1257_v31  ;;  %v5657_v2 = vpop.f32.mrb[32].mxu1 }
 0x12b   : > { %v1352_v38 = vmax.f32 %v905_v33, %v1256_v36  ;;  %v4286_v40 = vpop.f32.mrb[34].mxu0  ;;  %v5659_v4 = vpop.f32.mrb[33].mxu1 }
 0x12c   : > { %v1259_v44 = vmul.f32 0.01, %v4286_v40  ;;  %v915_v45 = vpop.f32.mrb[35].mxu0 }
 0x12d   : > { %v1258_v50 = vmul.f32 0.01, %v915_v45  ;;  %4457 = vmatprep.mubr.f32.mxu1 %v1352_v38 }
 0x12e   : > { %4458 = vmatmul.mubr.f32.gmra.mrb[80].mxu1 %v1353_v43  ;;  %v1355_v60 = vmax.f32 %v4286_v40, %v1259_v44  ;;  %v5661_v17 = vpop.f32.mrb[34].mxu1 }
 0x12f   : > { %v1354_v54 = vmax.f32 %v915_v45, %v1258_v50  ;;  %v4289_v55 = vpop.f32.mrb[36].mxu0  ;;  %v5663_v18 = vpop.f32.mrb[35].mxu1 }
 0x130   : > { %v1261_v61 = vmul.f32 0.01, %v4289_v55  ;;  %v925_v63 = vpop.f32.mrb[37].mxu0 }
 0x131   : > { %v1260_v0 = vmul.f32 0.01, %v925_v63  ;;  %4460 = vmatprep.mubr.f32.mxu1 %v1354_v54 }
 0x132   : > { %4461 = vmatmul.mubr.f32.gmra.mrb[82].mxu1 %v1355_v60  ;;  %v1357_v10 = vmax.f32 %v4289_v55, %v1261_v61  ;;  %v5665_v30 = vpop.f32.mrb[36].mxu1 }
 0x133   : > { %v1356_v7 = vmax.f32 %v925_v63, %v1260_v0  ;;  %v4292_v8 = vpop.f32.mrb[38].mxu0  ;;  %v5667_v31 = vpop.f32.mrb[37].mxu1 }
 0x134   : > { %v1263_v11 = vmul.f32 0.01, %v4292_v8  ;;  %v935_v12 = vpop.f32.mrb[39].mxu0 }
 0x135   : > { %v1262_v14 = vmul.f32 0.01, %v935_v12  ;;  %4463 = vmatprep.mubr.f32.mxu1 %v1356_v7 }
 0x136   : > { %4464 = vmatmul.mubr.f32.gmra.mrb[84].mxu1 %v1357_v10  ;;  %v1359_v22 = vmax.f32 %v4292_v8, %v1263_v11  ;;  %v5669_v45 = vpop.f32.mrb[38].mxu1 }
 0x137   : > { %v1358_v20 = vmax.f32 %v935_v12, %v1262_v14  ;;  %v4295_v21 = vpop.f32.mrb[40].mxu0  ;;  %v5671_v50 = vpop.f32.mrb[39].mxu1  ;;  %v1272_v12 = vmul.f32 0.01, %v5595_v35 }
 0x138   : > { %v1265_v24 = vmul.f32 0.01, %v4295_v21  ;;  %v945_v27 = vpop.f32.mrb[41].mxu0 }
 0x139   : > { %v1264_v28 = vmul.f32 0.01, %v945_v27  ;;  %4466 = vmatprep.mubr.f32.mxu1 %v1358_v20 }
 0x13a   : > { %4467 = vmatmul.mubr.f32.gmra.mrb[86].mxu1 %v1359_v22  ;;  %v1361_v38 = vmax.f32 %v4295_v21, %v1265_v24  ;;  %v5673_v7 = vpop.f32.mrb[40].mxu1  ;;  %v2250_v24 = vld [vmem:[#allocation2] sm:$0xff] }
 0x13b   : > { %v1360_v33 = vmax.f32 %v945_v27, %v1264_v28  ;;  %v4298_v36 = vpop.f32.mrb[42].mxu0  ;;  %v5675_v8 = vpop.f32.mrb[41].mxu1  ;;  %v1273_v28 = vmul.f32 0.01, %v5593_v32 }
 0x13c   : > { %v1267_v40 = vmul.f32 0.01, %v4298_v36  ;;  %v955_v43 = vpop.f32.mrb[43].mxu0 }
 0x13d   : > { %v1266_v44 = vmul.f32 0.01, %v955_v43  ;;  %4469 = vmatprep.mubr.f32.mxu1 %v1360_v33 }
 0x13e   : > { %4470 = vmatmul.mubr.f32.gmra.mrb[88].mxu1 %v1361_v38  ;;  %v1363_v60 = vmax.f32 %v4298_v36, %v1267_v40  ;;  %v5678_v27 = vpop.f32.mrb[42].mxu1  ;;  %v1368_v40 = vmax.f32 %v5595_v35, %v1272_v12  ;;  %v1276_v35 = vmul.f32 0.01, %v5603_v48 }
 0x13f   : > { %v1362_v54 = vmax.f32 %v955_v43, %v1266_v44  ;;  %v4301_v55 = vpop.f32.mrb[44].mxu0  ;;  %v5681_v33 = vpop.f32.mrb[43].mxu1  ;;  %v1274_v43 = vmul.f32 0.01, %v5599_v42 }
 0x140   : > { %v1269_v61 = vmul.f32 0.01, %v4301_v55  ;;  %v965_v63 = vpop.f32.mrb[45].mxu0 }
 0x141   : > { %v1268_v0 = vmul.f32 0.01, %v965_v63  ;;  %4472 = vmatprep.mubr.f32.mxu1 %v1362_v54 }
 0x142   : > { %4473 = vmatmul.mubr.f32.gmra.mrb[90].mxu1 %v1363_v60  ;;  %v1365_v14 = vmax.f32 %v4301_v55, %v1269_v61  ;;  %v5685_v60 = vpop.f32.mrb[44].mxu1  ;;  %v1369_v61 = vmax.f32 %v5593_v32, %v1273_v28  ;;  %v1372_v32 = vmax.f32 %v5603_v48, %v1276_v35  ;;  %v1279_v28 = vmul.f32 0.01, %v5605_v49  ;;  %v2328_v48 = vld [vmem:[%s6753_s2 + $0x10] sm:$0xff] }
 0x143   : > { %v1364_v10 = vmax.f32 %v965_v63, %v1268_v0  ;;  %v4304_v11 = vpop.f32.mrb[46].mxu0  ;;  %v1275_v63 = vmul.f32 0.01, %v5597_v39  ;;  %v5690_v0 = vpop.f32.mrb[45].mxu1  ;;  %v1285_v35 = vmul.f32 0.01, %v5617_v3 }
 0x144   : > { %v1271_v20 = vmul.f32 0.01, %v4304_v11  ;;  %v975_v21 = vpop.f32.mrb[47].mxu0 }
 0x145   : > { %v1270_v22 = vmul.f32 0.01, %v975_v21  ;;  %4475 = vmatprep.mubr.f32.mxu1 %v1364_v10  ;;  %v1370_v10 = vmax.f32 %v5599_v42, %v1274_v43  ;;  %v1371_v12 = vmax.f32 %v5597_v39, %v1275_v63  ;;  %v2327_v39 = vld [vmem:[%s6753_s2 + $0x8] sm:$0xff]  ;;  %v1284_v63 = vmul.f32 0.01, %v5619_v5 }
 0x146   : > { %4476 = vmatmul.mubr.f32.gmra.mrb[92].mxu1 %v1365_v14  ;;  %v1367_v44 = vmax.f32 %v4304_v11, %v1271_v20  ;;  %v5694_v11 = vpop.f32.mrb[46].mxu1  ;;  %v1277_v14 = vmul.f32 0.01, %v5601_v46 }
 0x147   : > { %v1366_v36 = vmax.f32 %v975_v21, %v1270_v22  ;;  %v2317_v38 = vpop.f32.mrb[48].mxu0  ;;  %v5698_v20 = vpop.f32.mrb[47].mxu1  ;;  %v1278_v21 = vmul.f32 0.01, %v5607_v52 }
 0x148   : > { %v2321_v54 = vadd.f32 %v2317_v38, %v2250_v24  ;;  %v4587_v55 = vpop.f32.mrb[49].mxu0  ;;  %v1373_v42 = vmax.f32 %v5601_v46, %v1277_v14  ;;  %v1280_v38 = vmul.f32 0.01, %v5611_v58  ;;  %v1375_v46 = vmax.f32 %v5605_v49, %v1279_v28 }
 0x149   : > { %4478 = vmatprep.mubr.f32.mxu1 %v1366_v36  ;;  %v1374_v36 = vmax.f32 %v5607_v52, %v1278_v21  ;;  %v2329_v52 = vld [vmem:[%s6753_s2 + $0x18] sm:$0xff]  ;;  %v1283_v55 = vmul.f32 0.01, %v5613_v59  ;;  %v1286_v14 = vmul.f32 0.01, %v5623_v9 }
 0x14a   : > { %2322 = vst.msk [vmem:[#allocation2] sm:$0xff] %vm195_vm2, %v2321_v54  ;;  %4479 = vmatmul.mubr.f32.gmra.mrb[94].mxu1 %v1367_v44  ;;  %v1376_v43 = vmax.f32 %v5611_v58, %v1280_v38  ;;  %v1282_v44 = vmul.f32 0.01, %v5615_v62  ;;  %v2330_v54 = vld [vmem:[%s6753_s2 + $0x20] sm:$0xff]  ;;  %v2331_v58 = vld [vmem:[%s6753_s2 + $0x28] sm:$0xff] }
 0x14b   : > { %4481 = vmatprep.mubr.f32.mxu1 %v1368_v40  ;;  %v1281_v40 = vmul.f32 0.01, %v5609_v56  ;;  %v1287_v21 = vmul.f32 0.01, %v5621_v6  ;;  %v1289_v28 = vmul.f32 0.01, %v5625_v13 }
 0x14c   : > { %v2338_v38 = vld [vmem:[%s6753_s2 + $0x60] sm:$0xff] }
 0x14d   : > { %v1377_v49 = vmax.f32 %v5609_v56, %v1281_v40  ;;  %v1379_v56 = vmax.f32 %v5613_v59, %v1283_v55  ;;  %v1381_v59 = vmax.f32 %v5617_v3, %v1285_v35  ;;  %v1383_v3 = vmax.f32 %v5621_v6, %v1287_v21 }
 0x14e   : > { %4482 = vmatmul.mubr.f32.gmra.mrb[96].mxu1 %v1369_v61  ;;  %v1378_v61 = vmax.f32 %v5615_v62, %v1282_v44  ;;  %v2333_v62 = vld [vmem:[%s6753_s2 + $0x38] sm:$0xff]  ;;  %v1385_v6 = vmax.f32 %v5625_v13, %v1289_v28  ;;  %v1292_v40 = vmul.f32 0.01, %v5635_v25  ;;  %v1295_v55 = vmul.f32 0.01, %v5637_v26 }
 0x14f   : > { %4484 = vmatprep.mubr.f32.mxu1 %v1370_v10  ;;  %v2332_v10 = vld [vmem:[%s6753_s2 + $0x30] sm:$0xff]  ;;  %v1298_v35 = vmul.f32 0.01, %v5647_v41  ;;  %v1301_v21 = vmul.f32 0.01, %v5649_v47 }
 0x150   : > { %v1388_v44 = vmax.f32 %v5635_v25, %v1292_v40  ;;  %v2343_v25 = vld [vmem:[%s6753_s2 + $0x88] sm:$0xff]  ;;  %v1304_v28 = vmul.f32 0.01, %v5659_v4  ;;  %v2356_v40 = vld [vmem:[%s6753_s2 + $0xf0] sm:$0xff] }
 0x151   : > { %v2422_v22 = vld [vmem:[#allocation2] sm:$0xff] }
 0x152   : > { %v2423_v24 = vmul.f32 0.0625, %v2422_v22  ;;  %4485 = vmatmul.mubr.f32.gmra.mrb[98].mxu1 %v1371_v12  ;;  %v1380_v12 = vmax.f32 %v5619_v5, %v1284_v63  ;;  %v2335_v5 = vld [vmem:[%s6753_s2 + $0x48] sm:$0xff]  ;;  %v1382_v22 = vmax.f32 %v5623_v9, %v1286_v14  ;;  %v2337_v9 = vld [vmem:[%s6753_s2 + $0x58] sm:$0xff]  ;;  %v2344_v63 = vld [vmem:[%s6753_s2 + $0x90] sm:$0xff]  ;;  %v1394_v14 = vmax.f32 %v5647_v41, %v1298_v35 }
 0x153   : > { %4487 = vmatprep.mubr.f32.mxu1 %v1372_v32  ;;  %v2334_v32 = vld [vmem:[%s6753_s2 + $0x40] sm:$0xff]  ;;  %v2349_v41 = vld [vmem:[%s6753_s2 + $0xb8] sm:$0xff] }
 0x154   : > { %4588 = vmatprep.subr.mxu0 %v2423_v24 }
 0x155   : > { %4589 = vmatpush3.msra.mxu0 %v2423_v24  ;;  %v1288_v24 = vmul.f32 0.01, %v5627_v15 }
 0x156   : > { %4591 = vmatmul.mubr.msk.f32.vlgmr.msra.gmra.mrb[50].mxu0 %vm390_vm0, %v2327_v39  ;;  %4488 = vmatmul.mubr.f32.gmra.mrb[100].mxu1 %v1373_v42  ;;  %v2336_v42 = vld [vmem:[%s6753_s2 + $0x50] sm:$0xff] }
 0x157   : > { %4593 = vmatprep.mubr.msk.f32.mxu0 %vm390_vm0, %v2328_v48  ;;  %4490 = vmatprep.mubr.f32.mxu1 %v1374_v36  ;;  %v1384_v39 = vmax.f32 %v5627_v15, %v1288_v24  ;;  %v1290_v36 = vmul.f32 0.01, %v5631_v19  ;;  %v1291_v48 = vmul.f32 0.01, %v5629_v16  ;;  %v2339_v15 = vld [vmem:[%s6753_s2 + $0x68] sm:$0xff]  ;;  %v2350_v24 = vld [vmem:[%s6753_s2 + $0xc0] sm:$0xff] }
 0x159   : > { %v1387_v13 = vmax.f32 %v5629_v16, %v1291_v48  ;;  %v1307_v48 = vmul.f32 0.01, %v5661_v17 }
 0x15a   : > { %4594 = vmatmul.mubr.msk.f32.gmra.mrb[52].mxu0 %vm390_vm0, %v2329_v52  ;;  %4491 = vmatmul.mubr.f32.gmra.mrb[102].mxu1 %v1375_v46  ;;  %v1386_v46 = vmax.f32 %v5631_v19, %v1290_v36  ;;  %v2340_v52 = vld [vmem:[%s6753_s2 + $0x70] sm:$0xff]  ;;  %v2341_v19 = vld [vmem:[%s6753_s2 + $0x78] sm:$0xff]  ;;  %v1400_v36 = vmax.f32 %v5659_v4, %v1304_v28  ;;  %v2355_v4 = vld [vmem:[%s6753_s2 + $0xe8] sm:$0xff] }
 0x15b   : > { %4596 = vmatprep.mubr.msk.f32.mxu0 %vm390_vm0, %v2330_v54  ;;  %4493 = vmatprep.mubr.f32.mxu1 %v1376_v43  ;;  %v1293_v43 = vmul.f32 0.01, %v5633_v23  ;;  %v1294_v54 = vmul.f32 0.01, %v5639_v29  ;;  %v1416_v28 = vld [vmem:[%s5297_s4] sm:$0xff] }
 0x15d   : > { %v1389_v16 = vmax.f32 %v5633_v23, %v1293_v43  ;;  %v1391_v23 = vmax.f32 %v5637_v26, %v1295_v55  ;;  %v1310_v43 = vmul.f32 0.01, %v5671_v50  ;;  %v1313_v55 = vmul.f32 0.01, %v5673_v7 }
 0x15e   : > { %4597 = vmatmul.mubr.msk.f32.gmra.mrb[54].mxu0 %vm390_vm0, %v2331_v58  ;;  %4494 = vmatmul.mubr.f32.gmra.mrb[104].mxu1 %v1377_v49  ;;  %v2342_v49 = vld [vmem:[%s6753_s2 + $0x80] sm:$0xff]  ;;  %v1390_v58 = vmax.f32 %v5639_v29, %v1294_v54  ;;  %v2345_v29 = vld [vmem:[%s6753_s2 + $0x98] sm:$0xff] }
 0x15f   : > { %4599 = vmatprep.mubr.msk.f32.mxu0 %vm390_vm0, %v2332_v10  ;;  %4496 = vmatprep.mubr.f32.mxu1 %v1378_v61  ;;  %v1296_v61 = vmul.f32 0.01, %v5643_v1  ;;  %v1297_v10 = vmul.f32 0.01, %v5641_v34  ;;  %v1406_v54 = vmax.f32 %v5671_v50, %v1310_v43  ;;  %v2361_v50 = vld [vmem:[%s6753_s2 + $0x118] sm:$0xff] }
 0x161   : > { %v1393_v26 = vmax.f32 %v5641_v34, %v1297_v10  ;;  %v1316_v10 = vmul.f32 0.01, %v5690_v0 }
 0x162   : > { %4600 = vmatmul.mubr.msk.f32.gmra.mrb[56].mxu0 %vm390_vm0, %v2333_v62  ;;  %4497 = vmatmul.mubr.f32.gmra.mrb[106].mxu1 %v1379_v56  ;;  %v1392_v56 = vmax.f32 %v5643_v1, %v1296_v61  ;;  %v2346_v62 = vld [vmem:[%s6753_s2 + $0xa0] sm:$0xff]  ;;  %v2347_v1 = vld [vmem:[%s6753_s2 + $0xa8] sm:$0xff] }
 0x163   : > { %4602 = vmatprep.mubr.msk.f32.mxu0 %vm390_vm0, %v2334_v32  ;;  %4499 = vmatprep.mubr.f32.mxu1 %v1380_v12  ;;  %v1299_v12 = vmul.f32 0.01, %v5645_v37  ;;  %v1300_v32 = vmul.f32 0.01, %v5651_v51  ;;  %v2362_v61 = vld [vmem:[%s6753_s2 + $0x120] sm:$0xff]  ;;  %v1412_v35 = vmax.f32 %v5690_v0, %v1316_v10  ;;  %v2367_v0 = vld [vmem:[%s6753_s2 + $0x148] sm:$0xff] }
 0x165   : > { %v1395_v34 = vmax.f32 %v5645_v37, %v1299_v12  ;;  %v1397_v37 = vmax.f32 %v5649_v47, %v1301_v21  ;;  %v1319_v12 = vmul.f32 0.01, %v5694_v11  ;;  %v2374_v21 = vld [vmem:[%s6753_s2 + $0x180] sm:$0xff] }
 0x166   : > { %4603 = vmatmul.mubr.msk.f32.gmra.mrb[58].mxu0 %vm390_vm0, %v2335_v5  ;;  %4500 = vmatmul.mubr.f32.gmra.mrb[108].mxu1 %v1381_v59  ;;  %v2348_v59 = vld [vmem:[%s6753_s2 + $0xb0] sm:$0xff]  ;;  %v1396_v5 = vmax.f32 %v5651_v51, %v1300_v32  ;;  %v2351_v51 = vld [vmem:[%s6753_s2 + $0xc8] sm:$0xff]  ;;  %v2369_v32 = vld [vmem:[%s6753_s2 + $0x158] sm:$0xff] }
 0x167   : > { %4605 = vmatprep.mubr.msk.f32.mxu0 %vm390_vm0, %v2336_v42  ;;  %4502 = vmatprep.mubr.f32.mxu1 %v1382_v22  ;;  %v1302_v22 = vmul.f32 0.01, %v5655_v57  ;;  %v1303_v42 = vmul.f32 0.01, %v5653_v53 }
 0x169   : > { %v1399_v47 = vmax.f32 %v5653_v53, %v1303_v42  ;;  %v2380_v42 = vld [vmem:[%s6753_s2 + $0x1b0] sm:$0xff] }
 0x16a   : > { %4606 = vmatmul.mubr.msk.f32.gmra.mrb[60].mxu0 %vm390_vm0, %v2337_v9  ;;  %4503 = vmatmul.mubr.f32.gmra.mrb[110].mxu1 %v1383_v3  ;;  %v1398_v3 = vmax.f32 %v5655_v57, %v1302_v22  ;;  %v2352_v9 = vld [vmem:[%s6753_s2 + $0xd0] sm:$0xff]  ;;  %v2353_v57 = vld [vmem:[%s6753_s2 + $0xd8] sm:$0xff] }
 0x16b   : > { %4608 = vmatprep.mubr.msk.f32.mxu0 %vm390_vm0, %v2338_v38  ;;  %4505 = vmatprep.mubr.f32.mxu1 %v1384_v39  ;;  %v1305_v39 = vmul.f32 0.01, %v5657_v2  ;;  %v1306_v38 = vmul.f32 0.01, %v5663_v18  ;;  %v2377_v22 = vld [vmem:[%s6753_s2 + $0x198] sm:$0xff] }
 0x16d   : > { %v1401_v53 = vmax.f32 %v5657_v2, %v1305_v39  ;;  %v1403_v2 = vmax.f32 %v5661_v17, %v1307_v48  ;;  %v2384_v48 = vld [vmem:[%s6753_s2 + $0x1d0] sm:$0xff] }
 0x16e   : > { %4609 = vmatmul.mubr.msk.f32.gmra.mrb[62].mxu0 %vm390_vm0, %v2339_v15  ;;  %4506 = vmatmul.mubr.f32.gmra.mrb[112].mxu1 %v1385_v6  ;;  %v2354_v6 = vld [vmem:[%s6753_s2 + $0xe0] sm:$0xff]  ;;  %v1402_v15 = vmax.f32 %v5663_v18, %v1306_v38  ;;  %v2357_v18 = vld [vmem:[%s6753_s2 + $0xf8] sm:$0xff] }
 0x16f   : > { %4611 = vmatprep.mubr.msk.f32.mxu0 %vm390_vm0, %v2340_v52  ;;  %4508 = vmatprep.mubr.f32.mxu1 %v1386_v46  ;;  %v1308_v46 = vmul.f32 0.01, %v5667_v31  ;;  %v1309_v52 = vmul.f32 0.01, %v5665_v30  ;;  %v1419_v38 = vld [vmem:[%s5297_s4 + $0x18] sm:$0xff] }
 0x171   : > { %v1405_v17 = vmax.f32 %v5665_v30, %v1309_v52  ;;  %v2385_v52 = vld [vmem:[%s6753_s2 + $0x1d8] sm:$0xff] }
 0x172   : > { %4612 = vmatmul.mubr.msk.f32.gmra.mrb[64].mxu0 %vm390_vm0, %v2341_v19  ;;  %4509 = vmatmul.mubr.f32.gmra.mrb[114].mxu1 %v1387_v13  ;;  %v1404_v13 = vmax.f32 %v5667_v31, %v1308_v46  ;;  %v2358_v19 = vld [vmem:[%s6753_s2 + $0x100] sm:$0xff]  ;;  %v2359_v31 = vld [vmem:[%s6753_s2 + $0x108] sm:$0xff] }
 0x173   : > { %4614 = vmatprep.mubr.msk.f32.mxu0 %vm390_vm0, %v2342_v49  ;;  %4511 = vmatprep.mubr.f32.mxu1 %v1388_v44  ;;  %v1311_v44 = vmul.f32 0.01, %v5669_v45  ;;  %v1312_v49 = vmul.f32 0.01, %v5675_v8 }
 0x175   : > { %v1407_v30 = vmax.f32 %v5669_v45, %v1311_v44  ;;  %v1409_v45 = vmax.f32 %v5673_v7, %v1313_v55 }
 0x176   : > { %4615 = vmatmul.mubr.msk.f32.gmra.mrb[66].mxu0 %vm390_vm0, %v2343_v25  ;;  %4512 = vmatmul.mubr.f32.gmra.mrb[116].mxu1 %v1389_v16  ;;  %v2360_v16 = vld [vmem:[%s6753_s2 + $0x110] sm:$0xff]  ;;  %v1408_v25 = vmax.f32 %v5675_v8, %v1312_v49  ;;  %v2363_v8 = vld [vmem:[%s6753_s2 + $0x128] sm:$0xff] }
 0x177   : > { %4617 = vmatprep.mubr.msk.f32.mxu0 %vm390_vm0, %v2344_v63  ;;  %4514 = vmatprep.mubr.f32.mxu1 %v1390_v58  ;;  %v1314_v58 = vmul.f32 0.01, %v5681_v33  ;;  %v1315_v63 = vmul.f32 0.01, %v5678_v27  ;;  %v1422_v49 = vld [vmem:[%s5297_s4 + $0x30] sm:$0xff] }
 0x179   : > { %v1411_v7 = vmax.f32 %v5678_v27, %v1315_v63  ;;  %v2390_v63 = vld [vmem:[%s6753_s2 + $0x200] sm:$0xff] }
 0x17a   : > { %4618 = vmatmul.mubr.msk.f32.gmra.mrb[68].mxu0 %vm390_vm0, %v2345_v29  ;;  %4515 = vmatmul.mubr.f32.gmra.mrb[118].mxu1 %v1391_v23  ;;  %v1410_v23 = vmax.f32 %v5681_v33, %v1314_v58  ;;  %v2364_v29 = vld [vmem:[%s6753_s2 + $0x130] sm:$0xff]  ;;  %v2365_v33 = vld [vmem:[%s6753_s2 + $0x138] sm:$0xff]  ;;  %v1425_v58 = vld [vmem:[%s5297_s4 + $0x48] sm:$0xff] }
 0x17b   : > { %4620 = vmatprep.mubr.msk.f32.mxu0 %vm390_vm0, %v2346_v62  ;;  %4517 = vmatprep.mubr.f32.mxu1 %v1392_v56  ;;  %v1317_v56 = vmul.f32 0.01, %v5685_v60  ;;  %v1318_v62 = vmul.f32 0.01, %v5698_v20 }
 0x17d   : > { %v1413_v27 = vmax.f32 %v5685_v60, %v1317_v56  ;;  %v1415_v60 = vmax.f32 %v5694_v11, %v1319_v12  ;;  %v2371_v11 = vld [vmem:[%s6753_s2 + $0x168] sm:$0xff] }
 0x17e   : > { %4621 = vmatmul.mubr.msk.f32.gmra.mrb[70].mxu0 %vm390_vm0, %v2347_v1  ;;  %4518 = vmatmul.mubr.f32.gmra.mrb[120].mxu1 %v1393_v26  ;;  %v2366_v26 = vld [vmem:[%s6753_s2 + $0x140] sm:$0xff]  ;;  %v1414_v1 = vmax.f32 %v5698_v20, %v1318_v62  ;;  %v2391_v56 = vld [vmem:[%s6753_s2 + $0x208] sm:$0xff] }
 0x17f   : > { %4623 = vmatprep.mubr.msk.f32.mxu0 %vm390_vm0, %v2348_v59  ;;  %4520 = vmatprep.mubr.f32.mxu1 %v1394_v14  ;;  %v2368_v14 = vld [vmem:[%s6753_s2 + $0x150] sm:$0xff]  ;;  %v2370_v20 = vld [vmem:[%s6753_s2 + $0x160] sm:$0xff] }
 0x180   : > { %v2372_v59 = vld [vmem:[%s6753_s2 + $0x170] sm:$0xff] }
 0x182   : > { %4624 = vmatmul.mubr.msk.f32.gmra.mrb[72].mxu0 %vm390_vm0, %v2349_v41  ;;  %4521 = vmatmul.mubr.f32.gmra.mrb[122].mxu1 %v1395_v34  ;;  %v2373_v34 = vld [vmem:[%s6753_s2 + $0x178] sm:$0xff]  ;;  %v2375_v41 = vld [vmem:[%s6753_s2 + $0x188] sm:$0xff] }
 0x183   : > { %4626 = vmatprep.mubr.msk.f32.mxu0 %vm390_vm0, %v2350_v24  ;;  %4523 = vmatprep.mubr.f32.mxu1 %v1396_v5  ;;  %v2376_v5 = vld [vmem:[%s6753_s2 + $0x190] sm:$0xff]  ;;  %v2378_v24 = vld [vmem:[%s6753_s2 + $0x1a0] sm:$0xff] }
 0x186   : > { %4627 = vmatmul.mubr.msk.f32.gmra.mrb[74].mxu0 %vm390_vm0, %v2351_v51  ;;  %4524 = vmatmul.mubr.f32.gmra.mrb[124].mxu1 %v1397_v37  ;;  %v2379_v37 = vld [vmem:[%s6753_s2 + $0x1a8] sm:$0xff] }
 0x187   : > { %4629 = vmatprep.mubr.msk.f32.mxu0 %vm390_vm0, %v2352_v9  ;;  %4526 = vmatprep.mubr.f32.mxu1 %v1398_v3  ;;  %v1417_v51 = vld [vmem:[%s5297_s4 + $0x8] sm:$0xff]  ;;  %v2381_v3 = vld [vmem:[%s6753_s2 + $0x1b8] sm:$0xff]  ;;  %v2382_v9 = vld [vmem:[%s6753_s2 + $0x1c0] sm:$0xff] }
 0x18a   : > { %4630 = vmatmul.mubr.msk.f32.gmra.mrb[76].mxu0 %vm390_vm0, %v2353_v57  ;;  %4527 = vmatmul.mubr.f32.gmra.mrb[126].mxu1 %v1399_v47 }
 0x18b   : > { %4632 = vmatprep.mubr.msk.f32.mxu0 %vm390_vm0, %v2354_v6  ;;  %4529 = vmatprep.mubr.f32.mxu1 %v1400_v36  ;;  %v2383_v6 = vld [vmem:[%s6753_s2 + $0x1c8] sm:$0xff] }
 0x18e   : > { %4633 = vmatmul.mubr.msk.f32.gmra.mrb[78].mxu0 %vm390_vm0, %v2355_v4  ;;  %4530 = vmatmul.mubr.f32.gmra.mrb[128].mxu1 %v1401_v53  ;;  %v1418_v53 = vld [vmem:[%s5297_s4 + $0x10] sm:$0xff] }
 0x18f   : > { %4635 = vmatprep.mubr.msk.f32.mxu0 %vm390_vm0, %v2356_v40  ;;  %4532 = vmatprep.mubr.f32.mxu1 %v1402_v15 }
 0x192   : > { %4636 = vmatmul.mubr.msk.f32.gmra.mrb[80].mxu0 %vm390_vm0, %v2357_v18  ;;  %4533 = vmatmul.mubr.f32.gmra.mrb[130].mxu1 %v1403_v2  ;;  %v1421_v2 = vld [vmem:[%s5297_s4 + $0x28] sm:$0xff]  ;;  %v1420_v18 = vld [vmem:[%s5297_s4 + $0x20] sm:$0xff] }
 0x193   : > { %4638 = vmatprep.mubr.msk.f32.mxu0 %vm390_vm0, %v2358_v19  ;;  %4535 = vmatprep.mubr.f32.mxu1 %v1404_v13  ;;  %v2386_v13 = vld [vmem:[%s6753_s2 + $0x1e0] sm:$0xff] }
 0x196   : > { %4639 = vmatmul.mubr.msk.f32.gmra.mrb[82].mxu0 %vm390_vm0, %v2359_v31  ;;  %4536 = vmatmul.mubr.f32.gmra.mrb[132].mxu1 %v1405_v17  ;;  %v1423_v31 = vld [vmem:[%s5297_s4 + $0x38] sm:$0xff] }
 0x197   : > { %4641 = vmatprep.mubr.msk.f32.mxu0 %vm390_vm0, %v2360_v16  ;;  %4538 = vmatprep.mubr.f32.mxu1 %v1406_v54  ;;  %v2387_v54 = vld [vmem:[%s6753_s2 + $0x1e8] sm:$0xff]  ;;  %v2388_v16 = vld [vmem:[%s6753_s2 + $0x1f0] sm:$0xff] }
 0x19a   : > { %4642 = vmatmul.mubr.msk.f32.gmra.mrb[84].mxu0 %vm390_vm0, %v2361_v50  ;;  %4539 = vmatmul.mubr.f32.gmra.mrb[134].mxu1 %v1407_v30 }
 0x19b   : > { %4644 = vmatprep.mubr.msk.f32.mxu0 %vm390_vm0, %v2362_v61  ;;  %4541 = vmatprep.mubr.f32.mxu1 %v1408_v25  ;;  %v2389_v61 = vld [vmem:[%s6753_s2 + $0x1f8] sm:$0xff] }
 0x19e   : > { %4645 = vmatmul.mubr.msk.f32.gmra.mrb[86].mxu0 %vm390_vm0, %v2363_v8  ;;  %4542 = vmatmul.mubr.f32.gmra.mrb[136].mxu1 %v1409_v45  ;;  %v1424_v45 = vld [vmem:[%s5297_s4 + $0x40] sm:$0xff] }
 0x19f   : > { %4647 = vmatprep.mubr.msk.f32.mxu0 %vm390_vm0, %v2364_v29  ;;  %4544 = vmatprep.mubr.f32.mxu1 %v1410_v23 }
 0x1a2   : > { %4648 = vmatmul.mubr.msk.f32.gmra.mrb[88].mxu0 %vm390_vm0, %v2365_v33  ;;  %4545 = vmatmul.mubr.f32.gmra.mrb[138].mxu1 %v1411_v7  ;;  %v1427_v7 = vld [vmem:[%s5297_s4 + $0x58] sm:$0xff]  ;;  %v1426_v33 = vld [vmem:[%s5297_s4 + $0x50] sm:$0xff] }
 0x1a3   : > { %4650 = vmatprep.mubr.msk.f32.mxu0 %vm390_vm0, %v2366_v26  ;;  %4547 = vmatprep.mubr.f32.mxu1 %v1412_v35  ;;  %v2392_v35 = vld [vmem:[%s6753_s2 + $0x210] sm:$0xff] }
 0x1a6   : > { %4651 = vmatmul.mubr.msk.f32.gmra.mrb[90].mxu0 %vm390_vm0, %v2367_v0  ;;  %4548 = vmatmul.mubr.f32.gmra.mrb[140].mxu1 %v1413_v27  ;;  %v1429_v0 = vld [vmem:[%s5297_s4 + $0x68] sm:$0xff] }
 0x1a7   : > { %4653 = vmatprep.mubr.msk.f32.mxu0 %vm390_vm0, %v2368_v14  ;;  %4550 = vmatprep.mubr.f32.mxu1 %v1414_v1  ;;  %v2393_v1 = vld [vmem:[%s6753_s2 + $0x218] sm:$0xff]  ;;  %v1428_v14 = vld [vmem:[%s5297_s4 + $0x60] sm:$0xff] }
 0x1aa   : > { %4654 = vmatmul.mubr.msk.f32.gmra.mrb[92].mxu0 %vm390_vm0, %v2369_v32  ;;  %4551 = vmatmul.mubr.f32.gmra.mrb[142].mxu1 %v1415_v60  ;;  %v2394_v60 = vld [vmem:[%s6753_s2 + $0x220] sm:$0xff] }
 0x1ab   : > { %4656 = vmatprep.mubr.msk.f32.mxu0 %vm390_vm0, %v2370_v20 }
 0x1ae   : > { %4657 = vmatmul.mubr.msk.f32.gmra.mrb[94].mxu0 %vm390_vm0, %v2371_v11 }
 0x1af   : > { %4659 = vmatprep.mubr.msk.f32.mxu0 %vm390_vm0, %v2372_v59 }
 0x1b2   : > { %4660 = vmatmul.mubr.msk.f32.gmra.mrb[96].mxu0 %vm390_vm0, %v2373_v34  ;;  %v1431_v34 = vld [vmem:[%s5297_s4 + $0x78] sm:$0xff] }
 0x1b3   : > { %4662 = vmatprep.mubr.msk.f32.mxu0 %vm390_vm0, %v2374_v21  ;;  %v2395_v21 = vld [vmem:[%s6753_s2 + $0x228] sm:$0xff] }
 0x1b6   : > { %4663 = vmatmul.mubr.msk.f32.gmra.mrb[98].mxu0 %vm390_vm0, %v2375_v41  ;;  %v1430_v41 = vld [vmem:[%s5297_s4 + $0x70] sm:$0xff] }
 0x1b7   : > { %4665 = vmatprep.mubr.msk.f32.mxu0 %vm390_vm0, %v2376_v5  ;;  %v2396_v5 = vld [vmem:[%s6753_s2 + $0x230] sm:$0xff] }
 0x1ba   : > { %4666 = vmatmul.mubr.msk.f32.gmra.mrb[100].mxu0 %vm390_vm0, %v2377_v22 }
 0x1bb   : > { %4668 = vmatprep.mubr.msk.f32.mxu0 %vm390_vm0, %v2378_v24 }
 0x1be   : > { %4669 = vmatmul.mubr.msk.f32.gmra.mrb[102].mxu0 %vm390_vm0, %v2379_v37 }
 0x1bf   : > { %4671 = vmatprep.mubr.msk.f32.mxu0 %vm390_vm0, %v2380_v42 }
 0x1c1   : > { %v4411_v47 = vpop.f32.mrb[48].mxu1 }
 0x1c2   : > { %v2058_v39 = vadd.f32 %v4411_v47, %v1417_v51  ;;  %v1578_v57 = vpop.f32.mrb[49].mxu1  ;;  %4672 = vmatmul.mubr.msk.f32.gmra.mrb[104].mxu0 %vm390_vm0, %v2381_v3  ;;  %v1433_v51 = vld [vmem:[%s5297_s4 + $0x88] sm:$0xff]  ;;  %v2397_v3 = vld [vmem:[%s6753_s2 + $0x238] sm:$0xff] }
 0x1c3   : > { %v2057_v36 = vadd.f32 %v1578_v57, %v1416_v28  ;;  %4674 = vmatprep.mubr.msk.f32.mxu0 %vm390_vm0, %v2382_v9  ;;  %v1432_v28 = vld [vmem:[%s5297_s4 + $0x80] sm:$0xff] }
 0x1c4   : > { %2155 = vst.msk [vmem:[%s5297_s4 + $0x8] sm:$0xff] %vm195_vm2, %v2058_v39  ;;  %v2398_v9 = vld [vmem:[%s6753_s2 + $0x240] sm:$0xff] }
 0x1c5   : > { %2154 = vst.msk [vmem:[%s5297_s4] sm:$0xff] %vm195_vm2, %v2057_v36  ;;  %v4414_v4 = vpop.f32.mrb[50].mxu1 }
 0x1c6   : > { %v2060_v15 = vadd.f32 %v4414_v4, %v1419_v38  ;;  %v1588_v46 = vpop.f32.mrb[51].mxu1  ;;  %4675 = vmatmul.mubr.msk.f32.gmra.mrb[106].mxu0 %vm390_vm0, %v2383_v6  ;;  %v1435_v38 = vld [vmem:[%s5297_s4 + $0x98] sm:$0xff]  ;;  %v2399_v6 = vld [vmem:[%s6753_s2 + $0x248] sm:$0xff] }
 0x1c7   : > { %v2059_v40 = vadd.f32 %v1588_v46, %v1418_v53  ;;  %4677 = vmatprep.mubr.msk.f32.mxu0 %vm390_vm0, %v2384_v48  ;;  %v1434_v53 = vld [vmem:[%s5297_s4 + $0x90] sm:$0xff] }
 0x1c8   : > { %2157 = vst.msk [vmem:[%s5297_s4 + $0x18] sm:$0xff] %vm195_vm2, %v2060_v15  ;;  %v2400_v48 = vld [vmem:[%s6753_s2 + $0x250] sm:$0xff] }
 0x1c9   : > { %2156 = vst.msk [vmem:[%s5297_s4 + $0x10] sm:$0xff] %vm195_vm2, %v2059_v40  ;;  %v4417_v43 = vpop.f32.mrb[52].mxu1 }
 0x1ca   : > { %v2062_v19 = vadd.f32 %v4417_v43, %v1421_v2  ;;  %v1598_v17 = vpop.f32.mrb[53].mxu1  ;;  %4678 = vmatmul.mubr.msk.f32.gmra.mrb[108].mxu0 %vm390_vm0, %v2385_v52  ;;  %v1437_v2 = vld [vmem:[%s5297_s4 + $0xa8] sm:$0xff]  ;;  %v2401_v52 = vld [vmem:[%s6753_s2 + $0x258] sm:$0xff] }
 0x1cb   : > { %v2061_v44 = vadd.f32 %v1598_v17, %v1420_v18  ;;  %4680 = vmatprep.mubr.msk.f32.mxu0 %vm390_vm0, %v2386_v13  ;;  %v1436_v18 = vld [vmem:[%s5297_s4 + $0xa0] sm:$0xff] }
 0x1cc   : > { %2159 = vst.msk [vmem:[%s5297_s4 + $0x28] sm:$0xff] %vm195_vm2, %v2062_v19  ;;  %v2402_v13 = vld [vmem:[%s6753_s2 + $0x260] sm:$0xff] }
 0x1cd   : > { %2158 = vst.msk [vmem:[%s5297_s4 + $0x20] sm:$0xff] %vm195_vm2, %v2061_v44  ;;  %v4420_v30 = vpop.f32.mrb[54].mxu1 }
 0x1ce   : > { %v2064_v55 = vadd.f32 %v4420_v30, %v1423_v31  ;;  %v1608_v50 = vpop.f32.mrb[55].mxu1  ;;  %4681 = vmatmul.mubr.msk.f32.gmra.mrb[110].mxu0 %vm390_vm0, %v2387_v54  ;;  %v1439_v31 = vld [vmem:[%s5297_s4 + $0xb8] sm:$0xff]  ;;  %v2403_v54 = vld [vmem:[%s6753_s2 + $0x268] sm:$0xff] }
 0x1cf   : > { %v2063_v25 = vadd.f32 %v1608_v50, %v1422_v49  ;;  %4683 = vmatprep.mubr.msk.f32.mxu0 %vm390_vm0, %v2388_v16  ;;  %v1438_v49 = vld [vmem:[%s5297_s4 + $0xb0] sm:$0xff] }
 0x1d0   : > { %2161 = vst.msk [vmem:[%s5297_s4 + $0x38] sm:$0xff] %vm195_vm2, %v2064_v55  ;;  %v2404_v16 = vld [vmem:[%s6753_s2 + $0x270] sm:$0xff] }
 0x1d1   : > { %2160 = vst.msk [vmem:[%s5297_s4 + $0x30] sm:$0xff] %vm195_vm2, %v2063_v25  ;;  %v4423_v8 = vpop.f32.mrb[56].mxu1 }
 0x1d2   : > { %v2066_v23 = vadd.f32 %v4423_v8, %v1425_v58  ;;  %v1618_v10 = vpop.f32.mrb[57].mxu1  ;;  %4684 = vmatmul.mubr.msk.f32.gmra.mrb[112].mxu0 %vm390_vm0, %v2389_v61  ;;  %v1441_v58 = vld [vmem:[%s5297_s4 + $0xc8] sm:$0xff]  ;;  %v2405_v61 = vld [vmem:[%s6753_s2 + $0x278] sm:$0xff] }
 0x1d3   : > { %v2065_v29 = vadd.f32 %v1618_v10, %v1424_v45  ;;  %4686 = vmatprep.mubr.msk.f32.mxu0 %vm390_vm0, %v2390_v63  ;;  %v1440_v45 = vld [vmem:[%s5297_s4 + $0xc0] sm:$0xff] }
 0x1d4   : > { %2163 = vst.msk [vmem:[%s5297_s4 + $0x48] sm:$0xff] %vm195_vm2, %v2066_v23  ;;  %v2406_v63 = vld [vmem:[%s6753_s2 + $0x280] sm:$0xff] }
 0x1d5   : > { %2162 = vst.msk [vmem:[%s5297_s4 + $0x40] sm:$0xff] %vm195_vm2, %v2065_v29  ;;  %v4426_v62 = vpop.f32.mrb[58].mxu1 }
 0x1d6   : > { %v2068_v26 = vadd.f32 %v4426_v62, %v1427_v7  ;;  %v1628_v27 = vpop.f32.mrb[59].mxu1  ;;  %4687 = vmatmul.mubr.msk.f32.gmra.mrb[114].mxu0 %vm390_vm0, %v2391_v56  ;;  %v1443_v7 = vld [vmem:[%s5297_s4 + $0xd8] sm:$0xff]  ;;  %v2407_v56 = vld [vmem:[%s6753_s2 + $0x288] sm:$0xff] }
 0x1d7   : > { %v2067_v12 = vadd.f32 %v1628_v27, %v1426_v33  ;;  %4689 = vmatprep.mubr.msk.f32.mxu0 %vm390_vm0, %v2392_v35  ;;  %v1442_v33 = vld [vmem:[%s5297_s4 + $0xd0] sm:$0xff] }
 0x1d8   : > { %2165 = vst.msk [vmem:[%s5297_s4 + $0x58] sm:$0xff] %vm195_vm2, %v2068_v26  ;;  %v2408_v35 = vld [vmem:[%s6753_s2 + $0x290] sm:$0xff] }
 0x1d9   : > { %2164 = vst.msk [vmem:[%s5297_s4 + $0x50] sm:$0xff] %vm195_vm2, %v2067_v12  ;;  %v4429_v32 = vpop.f32.mrb[60].mxu1 }
 0x1da   : > { %v2070_v20 = vadd.f32 %v4429_v32, %v1429_v0  ;;  %v1638_v11 = vpop.f32.mrb[61].mxu1  ;;  %4690 = vmatmul.mubr.msk.f32.gmra.mrb[116].mxu0 %vm390_vm0, %v2393_v1  ;;  %v1445_v0 = vld [vmem:[%s5297_s4 + $0xe8] sm:$0xff]  ;;  %v2409_v1 = vld [vmem:[%s6753_s2 + $0x298] sm:$0xff] }
 0x1db   : > { %v2069_v59 = vadd.f32 %v1638_v11, %v1428_v14  ;;  %4692 = vmatprep.mubr.msk.f32.mxu0 %vm390_vm0, %v2394_v60  ;;  %v1444_v14 = vld [vmem:[%s5297_s4 + $0xe0] sm:$0xff] }
 0x1dc   : > { %2167 = vst.msk [vmem:[%s5297_s4 + $0x68] sm:$0xff] %vm195_vm2, %v2070_v20  ;;  %v2410_v60 = vld [vmem:[%s6753_s2 + $0x2a0] sm:$0xff] }
 0x1dd   : > { %2166 = vst.msk [vmem:[%s5297_s4 + $0x60] sm:$0xff] %vm195_vm2, %v2069_v59  ;;  %v4432_v22 = vpop.f32.mrb[62].mxu1 }
 0x1de   : > { %v2072_v24 = vadd.f32 %v4432_v22, %v1431_v34  ;;  %v1648_v37 = vpop.f32.mrb[63].mxu1  ;;  %4693 = vmatmul.mubr.msk.f32.gmra.mrb[118].mxu0 %vm390_vm0, %v2395_v21  ;;  %v1447_v34 = vld [vmem:[%s5297_s4 + $0xf8] sm:$0xff]  ;;  %v2411_v21 = vld [vmem:[%s6753_s2 + $0x2a8] sm:$0xff] }
 0x1df   : > { %v2071_v42 = vadd.f32 %v1648_v37, %v1430_v41  ;;  %4695 = vmatprep.mubr.msk.f32.mxu0 %vm390_vm0, %v2396_v5  ;;  %v1446_v41 = vld [vmem:[%s5297_s4 + $0xf0] sm:$0xff] }
 0x1e0   : > { %2169 = vst.msk [vmem:[%s5297_s4 + $0x78] sm:$0xff] %vm195_vm2, %v2072_v24  ;;  %v2412_v5 = vld [vmem:[%s6753_s2 + $0x2b0] sm:$0xff] }
 0x1e1   : > { %2168 = vst.msk [vmem:[%s5297_s4 + $0x70] sm:$0xff] %vm195_vm2, %v2071_v42  ;;  %v4435_v47 = vpop.f32.mrb[64].mxu1 }
 0x1e2   : > { %v2074_v39 = vadd.f32 %v4435_v47, %v1433_v51  ;;  %v1658_v57 = vpop.f32.mrb[65].mxu1  ;;  %4696 = vmatmul.mubr.msk.f32.gmra.mrb[120].mxu0 %vm390_vm0, %v2397_v3  ;;  %v1449_v51 = vld [vmem:[%s5297_s4 + $0x108] sm:$0xff]  ;;  %v2413_v3 = vld [vmem:[%s6753_s2 + $0x2b8] sm:$0xff] }
 0x1e3   : > { %v2073_v36 = vadd.f32 %v1658_v57, %v1432_v28  ;;  %4698 = vmatprep.mubr.msk.f32.mxu0 %vm390_vm0, %v2398_v9  ;;  %v1448_v28 = vld [vmem:[%s5297_s4 + $0x100] sm:$0xff] }
 0x1e4   : > { %2171 = vst.msk [vmem:[%s5297_s4 + $0x88] sm:$0xff] %vm195_vm2, %v2074_v39  ;;  %v2414_v9 = vld [vmem:[%s6753_s2 + $0x2c0] sm:$0xff] }
 0x1e5   : > { %2170 = vst.msk [vmem:[%s5297_s4 + $0x80] sm:$0xff] %vm195_vm2, %v2073_v36  ;;  %v4438_v4 = vpop.f32.mrb[66].mxu1 }
 0x1e6   : > { %v2076_v15 = vadd.f32 %v4438_v4, %v1435_v38  ;;  %v1668_v46 = vpop.f32.mrb[67].mxu1  ;;  %4699 = vmatmul.mubr.msk.f32.gmra.mrb[122].mxu0 %vm390_vm0, %v2399_v6  ;;  %v1451_v38 = vld [vmem:[%s5297_s4 + $0x118] sm:$0xff]  ;;  %v2415_v6 = vld [vmem:[%s6753_s2 + $0x2c8] sm:$0xff] }
 0x1e7   : > { %v2075_v40 = vadd.f32 %v1668_v46, %v1434_v53  ;;  %4701 = vmatprep.mubr.msk.f32.mxu0 %vm390_vm0, %v2400_v48  ;;  %v1450_v53 = vld [vmem:[%s5297_s4 + $0x110] sm:$0xff] }
 0x1e8   : > { %2173 = vst.msk [vmem:[%s5297_s4 + $0x98] sm:$0xff] %vm195_vm2, %v2076_v15  ;;  %v2416_v48 = vld [vmem:[%s6753_s2 + $0x2d0] sm:$0xff] }
 0x1e9   : > { %2172 = vst.msk [vmem:[%s5297_s4 + $0x90] sm:$0xff] %vm195_vm2, %v2075_v40  ;;  %v4441_v43 = vpop.f32.mrb[68].mxu1 }
 0x1ea   : > { %v2078_v19 = vadd.f32 %v4441_v43, %v1437_v2  ;;  %v1678_v17 = vpop.f32.mrb[69].mxu1  ;;  %4702 = vmatmul.mubr.msk.f32.gmra.mrb[124].mxu0 %vm390_vm0, %v2401_v52  ;;  %v1453_v2 = vld [vmem:[%s5297_s4 + $0x128] sm:$0xff]  ;;  %v2417_v52 = vld [vmem:[%s6753_s2 + $0x2d8] sm:$0xff] }
 0x1eb   : > { %v2077_v44 = vadd.f32 %v1678_v17, %v1436_v18  ;;  %4704 = vmatprep.mubr.msk.f32.mxu0 %vm390_vm0, %v2402_v13  ;;  %v1452_v18 = vld [vmem:[%s5297_s4 + $0x120] sm:$0xff] }
 0x1ec   : > { %2175 = vst.msk [vmem:[%s5297_s4 + $0xa8] sm:$0xff] %vm195_vm2, %v2078_v19  ;;  %v2418_v13 = vld [vmem:[%s6753_s2 + $0x2e0] sm:$0xff] }
 0x1ed   : > { %2174 = vst.msk [vmem:[%s5297_s4 + $0xa0] sm:$0xff] %vm195_vm2, %v2077_v44  ;;  %v4444_v30 = vpop.f32.mrb[70].mxu1 }
 0x1ee   : > { %v2080_v55 = vadd.f32 %v4444_v30, %v1439_v31  ;;  %v1688_v50 = vpop.f32.mrb[71].mxu1  ;;  %4705 = vmatmul.mubr.msk.f32.gmra.mrb[126].mxu0 %vm390_vm0, %v2403_v54  ;;  %v1455_v31 = vld [vmem:[%s5297_s4 + $0x138] sm:$0xff]  ;;  %v2419_v54 = vld [vmem:[%s6753_s2 + $0x2e8] sm:$0xff] }
 0x1ef   : > { %v2079_v25 = vadd.f32 %v1688_v50, %v1438_v49  ;;  %4707 = vmatprep.mubr.msk.f32.mxu0 %vm390_vm0, %v2404_v16  ;;  %v1454_v49 = vld [vmem:[%s5297_s4 + $0x130] sm:$0xff] }
 0x1f0   : > { %2177 = vst.msk [vmem:[%s5297_s4 + $0xb8] sm:$0xff] %vm195_vm2, %v2080_v55  ;;  %v2420_v16 = vld [vmem:[%s6753_s2 + $0x2f0] sm:$0xff] }
 0x1f1   : > { %2176 = vst.msk [vmem:[%s5297_s4 + $0xb0] sm:$0xff] %vm195_vm2, %v2079_v25  ;;  %v4447_v8 = vpop.f32.mrb[72].mxu1 }
 0x1f2   : > { %v2082_v23 = vadd.f32 %v4447_v8, %v1441_v58  ;;  %v1698_v10 = vpop.f32.mrb[73].mxu1  ;;  %4708 = vmatmul.mubr.msk.f32.gmra.mrb[128].mxu0 %vm390_vm0, %v2405_v61  ;;  %v1457_v58 = vld [vmem:[%s5297_s4 + $0x148] sm:$0xff]  ;;  %v2421_v61 = vld [vmem:[%s6753_s2 + $0x2f8] sm:$0xff] }
 0x1f3   : > { %v2081_v29 = vadd.f32 %v1698_v10, %v1440_v45  ;;  %4710 = vmatprep.mubr.msk.f32.mxu0 %vm390_vm0, %v2406_v63  ;;  %v1456_v45 = vld [vmem:[%s5297_s4 + $0x140] sm:$0xff] }
 0x1f4   : > { %2179 = vst.msk [vmem:[%s5297_s4 + $0xc8] sm:$0xff] %vm195_vm2, %v2082_v23 }
 0x1f5   : > { %2178 = vst.msk [vmem:[%s5297_s4 + $0xc0] sm:$0xff] %vm195_vm2, %v2081_v29  ;;  %v4450_v62 = vpop.f32.mrb[74].mxu1  ;;  %v1459_v29 = vld [vmem:[%s5297_s4 + $0x158] sm:$0xff] }
 0x1f6   : > { %v2084_v26 = vadd.f32 %v4450_v62, %v1443_v7  ;;  %v1708_v27 = vpop.f32.mrb[75].mxu1  ;;  %4711 = vmatmul.mubr.msk.f32.gmra.mrb[130].mxu0 %vm390_vm0, %v2407_v56  ;;  %v1458_v7 = vld [vmem:[%s5297_s4 + $0x150] sm:$0xff] }
 0x1f7   : > { %v2083_v12 = vadd.f32 %v1708_v27, %v1442_v33  ;;  %4713 = vmatprep.mubr.msk.f32.mxu0 %vm390_vm0, %v2408_v35  ;;  %v1460_v27 = vld [vmem:[%s5297_s4 + $0x160] sm:$0xff] }
 0x1f8   : > { %2181 = vst.msk [vmem:[%s5297_s4 + $0xd8] sm:$0xff] %vm195_vm2, %v2084_v26  ;;  %v1461_v26 = vld [vmem:[%s5297_s4 + $0x168] sm:$0xff] }
 0x1f9   : > { %2180 = vst.msk [vmem:[%s5297_s4 + $0xd0] sm:$0xff] %vm195_vm2, %v2083_v12  ;;  %v4453_v32 = vpop.f32.mrb[76].mxu1 }
 0x1fa   : > { %v2086_v20 = vadd.f32 %v4453_v32, %v1445_v0  ;;  %v1718_v11 = vpop.f32.mrb[77].mxu1  ;;  %4714 = vmatmul.mubr.msk.f32.gmra.mrb[132].mxu0 %vm390_vm0, %v2409_v1  ;;  %v1462_v32 = vld [vmem:[%s5297_s4 + $0x170] sm:$0xff] }
 0x1fb   : > { %v2085_v59 = vadd.f32 %v1718_v11, %v1444_v14  ;;  %4716 = vmatprep.mubr.msk.f32.mxu0 %vm390_vm0, %v2410_v60  ;;  %v1463_v60 = vld [vmem:[%s5297_s4 + $0x178] sm:$0xff] }
 0x1fc   : > { %2183 = vst.msk [vmem:[%s5297_s4 + $0xe8] sm:$0xff] %vm195_vm2, %v2086_v20 }
 0x1fd   : > { %2182 = vst.msk [vmem:[%s5297_s4 + $0xe0] sm:$0xff] %vm195_vm2, %v2085_v59  ;;  %v4456_v22 = vpop.f32.mrb[78].mxu1 }
 0x1fe   : > { %v2088_v24 = vadd.f32 %v4456_v22, %v1447_v34  ;;  %v1728_v37 = vpop.f32.mrb[79].mxu1  ;;  %4717 = vmatmul.mubr.msk.f32.gmra.mrb[134].mxu0 %vm390_vm0, %v2411_v21  ;;  %v1465_v21 = vld [vmem:[%s5297_s4 + $0x188] sm:$0xff] }
 0x1ff   : > { %v2087_v42 = vadd.f32 %v1728_v37, %v1446_v41  ;;  %4719 = vmatprep.mubr.msk.f32.mxu0 %vm390_vm0, %v2412_v5  ;;  %v1464_v41 = vld [vmem:[%s5297_s4 + $0x180] sm:$0xff] }
 0x200   : > { %2185 = vst.msk [vmem:[%s5297_s4 + $0xf8] sm:$0xff] %vm195_vm2, %v2088_v24 }
 0x201   : > { %2184 = vst.msk [vmem:[%s5297_s4 + $0xf0] sm:$0xff] %vm195_vm2, %v2087_v42  ;;  %v4459_v47 = vpop.f32.mrb[80].mxu1  ;;  %v1467_v42 = vld [vmem:[%s5297_s4 + $0x198] sm:$0xff] }
 0x202   : > { %v2090_v39 = vadd.f32 %v4459_v47, %v1449_v51  ;;  %v1738_v57 = vpop.f32.mrb[81].mxu1  ;;  %4720 = vmatmul.mubr.msk.f32.gmra.mrb[136].mxu0 %vm390_vm0, %v2413_v3  ;;  %v1466_v51 = vld [vmem:[%s5297_s4 + $0x190] sm:$0xff]  ;;  %v3258_v3 = vld [vmem:[%s5297_s4 + $0x8] sm:$0xff] }
 0x203   : > { %v2089_v36 = vadd.f32 %v1738_v57, %v1448_v28  ;;  %4722 = vmatprep.mubr.msk.f32.mxu0 %vm390_vm0, %v2414_v9  ;;  %v3257_v9 = vld [vmem:[%s5297_s4] sm:$0xff] }
 0x204   : > { %2187 = vst.msk [vmem:[%s5297_s4 + $0x108] sm:$0xff] %vm195_vm2, %v2090_v39 }
 0x205   : > { %2186 = vst.msk [vmem:[%s5297_s4 + $0x100] sm:$0xff] %vm195_vm2, %v2089_v36  ;;  %v4462_v4 = vpop.f32.mrb[82].mxu1  ;;  %v1469_v36 = vld [vmem:[%s5297_s4 + $0x1a8] sm:$0xff] }
 0x206   : > { %v2092_v15 = vadd.f32 %v4462_v4, %v1451_v38  ;;  %v1748_v46 = vpop.f32.mrb[83].mxu1  ;;  %4723 = vmatmul.mubr.msk.f32.gmra.mrb[138].mxu0 %vm390_vm0, %v2415_v6  ;;  %v3354_v38 = vmul.f32 0.0625, %v3258_v3  ;;  %v1468_v6 = vld [vmem:[%s5297_s4 + $0x1a0] sm:$0xff]  ;;  %v3260_v4 = vld [vmem:[%s5297_s4 + $0x18] sm:$0xff] }
 0x207   : > { %v2091_v40 = vadd.f32 %v1748_v46, %v1450_v53  ;;  %4725 = vmatprep.mubr.msk.f32.mxu0 %vm390_vm0, %v2416_v48  ;;  %v3353_v48 = vmul.f32 0.0625, %v3257_v9  ;;  %v1476_v3 = vld [vmem:[%s5297_s4 + $0x1e0] sm:$0xff] }
 0x208   : > { %2189 = vst.msk [vmem:[%s5297_s4 + $0x118] sm:$0xff] %vm195_vm2, %v2092_v15 }
 0x209   : > { %2188 = vst.msk [vmem:[%s5297_s4 + $0x110] sm:$0xff] %vm195_vm2, %v2091_v40  ;;  %v4465_v43 = vpop.f32.mrb[84].mxu1 }
 0x20a   : > { %v2094_v19 = vadd.f32 %v4465_v43, %v1453_v2  ;;  %v1758_v17 = vpop.f32.mrb[85].mxu1  ;;  %4726 = vmatmul.mubr.msk.f32.gmra.mrb[140].mxu0 %vm390_vm0, %v2417_v52  ;;  %v3259_v2 = vld [vmem:[%s5297_s4 + $0x10] sm:$0xff] }
 0x20b   : > { %v2093_v44 = vadd.f32 %v1758_v17, %v1452_v18  ;;  %4728 = vmatprep.mubr.msk.f32.mxu0 %vm390_vm0, %v2418_v13  ;;  %v3356_v17 = vmul.f32 0.0625, %v3260_v4 }
 0x20c   : > { %2191 = vst.msk [vmem:[%s5297_s4 + $0x128] sm:$0xff] %vm195_vm2, %v2094_v19  ;;  %v1471_v19 = vld [vmem:[%s5297_s4 + $0x1b8] sm:$0xff] }
 0x20d   : > { %2190 = vst.msk [vmem:[%s5297_s4 + $0x120] sm:$0xff] %vm195_vm2, %v2093_v44  ;;  %v4468_v30 = vpop.f32.mrb[86].mxu1  ;;  %v1470_v44 = vld [vmem:[%s5297_s4 + $0x1b0] sm:$0xff] }
 0x20e   : > { %v2096_v55 = vadd.f32 %v4468_v30, %v1455_v31  ;;  %v1768_v50 = vpop.f32.mrb[87].mxu1  ;;  %4729 = vmatmul.mubr.msk.f32.gmra.mrb[142].mxu0 %vm390_vm0, %v2419_v54  ;;  %v3355_v54 = vmul.f32 0.0625, %v3259_v2 }
 0x20f   : > { %v2095_v25 = vadd.f32 %v1768_v50, %v1454_v49  ;;  %4731 = vmatprep.mubr.msk.f32.mxu0 %vm390_vm0, %v2420_v16  ;;  %v3262_v49 = vld [vmem:[%s5297_s4 + $0x28] sm:$0xff]  ;;  %v3261_v50 = vld [vmem:[%s5297_s4 + $0x20] sm:$0xff] }
 0x210   : > { %2193 = vst.msk [vmem:[%s5297_s4 + $0x138] sm:$0xff] %vm195_vm2, %v2096_v55 }
 0x211   : > { %2192 = vst.msk [vmem:[%s5297_s4 + $0x130] sm:$0xff] %vm195_vm2, %v2095_v25  ;;  %v4471_v63 = vpop.f32.mrb[88].mxu1 }
 0x212   : > { %v2098_v8 = vadd.f32 %v4471_v63, %v1457_v58  ;;  %v1778_v23 = vpop.f32.mrb[89].mxu1  ;;  %4732 = vmatmul.mubr.msk.f32.gmra.mrb[144].mxu0 %vm390_vm0, %v2421_v61  ;;  %v1473_v63 = vld [vmem:[%s5297_s4 + $0x1c8] sm:$0xff] }
 0x213   : > { %v2097_v10 = vadd.f32 %v1778_v23, %v1456_v45  ;;  %v1472_v23 = vld [vmem:[%s5297_s4 + $0x1c0] sm:$0xff] }
 0x214   : > { %2195 = vst.msk [vmem:[%s5297_s4 + $0x148] sm:$0xff] %vm195_vm2, %v2098_v8  ;;  %v3358_v8 = vmul.f32 0.0625, %v3262_v49 }
 0x215   : > { %2194 = vst.msk [vmem:[%s5297_s4 + $0x140] sm:$0xff] %vm195_vm2, %v2097_v10  ;;  %v4474_v56 = vpop.f32.mrb[90].mxu1 }
 0x216   : > { %v2100_v33 = vadd.f32 %v4474_v56, %v1459_v29  ;;  %v1788_v35 = vpop.f32.mrb[91].mxu1  ;;  %v3357_v29 = vmul.f32 0.0625, %v3261_v50 }
 0x217   : > { %v2099_v62 = vadd.f32 %v1788_v35, %v1458_v7  ;;  %v3264_v7 = vld [vmem:[%s5297_s4 + $0x38] sm:$0xff] }
 0x218   : > { %2197 = vst.msk [vmem:[%s5297_s4 + $0x158] sm:$0xff] %vm195_vm2, %v2100_v33 }
 0x219   : > { %2196 = vst.msk [vmem:[%s5297_s4 + $0x150] sm:$0xff] %vm195_vm2, %v2099_v62  ;;  %v4477_v12 = vpop.f32.mrb[92].mxu1  ;;  %v3263_v62 = vld [vmem:[%s5297_s4 + $0x30] sm:$0xff] }
 0x21a   : > { %v2102_v0 = vadd.f32 %v4477_v12, %v1461_v26  ;;  %v1798_v1 = vpop.f32.mrb[93].mxu1 }
 0x21b   : > { %v2101_v14 = vadd.f32 %v1798_v1, %v1460_v27  ;;  %v1475_v1 = vld [vmem:[%s5297_s4 + $0x1d8] sm:$0xff] }
 0x21c   : > { %2199 = vst.msk [vmem:[%s5297_s4 + $0x168] sm:$0xff] %vm195_vm2, %v2102_v0 }
 0x21d   : > { %2198 = vst.msk [vmem:[%s5297_s4 + $0x160] sm:$0xff] %vm195_vm2, %v2101_v14  ;;  %v4480_v20 = vpop.f32.mrb[94].mxu1  ;;  %v3360_v14 = vmul.f32 0.0625, %v3264_v7 }
 0x21e   : > { %v2104_v11 = vadd.f32 %v4480_v20, %v1463_v60  ;;  %v1808_v59 = vpop.f32.mrb[95].mxu1  ;;  %v1474_v60 = vld [vmem:[%s5297_s4 + $0x1d0] sm:$0xff]  ;;  %v3359_v20 = vmul.f32 0.0625, %v3263_v62 }
 0x21f   : > { %v2103_v34 = vadd.f32 %v1808_v59, %v1462_v32 }
 0x220   : > { %2201 = vst.msk [vmem:[%s5297_s4 + $0x178] sm:$0xff] %vm195_vm2, %v2104_v11  ;;  %v3266_v11 = vld [vmem:[%s5297_s4 + $0x48] sm:$0xff] }
 0x221   : > { %2200 = vst.msk [vmem:[%s5297_s4 + $0x170] sm:$0xff] %vm195_vm2, %v2103_v34  ;;  %v4483_v5 = vpop.f32.mrb[96].mxu1 }
 0x222   : > { %v2106_v22 = vadd.f32 %v4483_v5, %v1465_v21  ;;  %v1818_v24 = vpop.f32.mrb[97].mxu1 }
 0x223   : > { %v2105_v37 = vadd.f32 %v1818_v24, %v1464_v41  ;;  %v3265_v41 = vld [vmem:[%s5297_s4 + $0x40] sm:$0xff] }
 0x224   : > { %2203 = vst.msk [vmem:[%s5297_s4 + $0x188] sm:$0xff] %vm195_vm2, %v2106_v22  ;;  %v3361_v9 = vmul.f32 0.0625, %v3265_v41 }
 0x225   : > { %2202 = vst.msk [vmem:[%s5297_s4 + $0x180] sm:$0xff] %vm195_vm2, %v2105_v37  ;;  %v4486_v28 = vpop.f32.mrb[98].mxu1 }
 0x226   : > { %v2108_v47 = vadd.f32 %v4486_v28, %v1467_v42  ;;  %v1828_v39 = vpop.f32.mrb[99].mxu1  ;;  %v1477_v42 = vld [vmem:[%s5297_s4 + $0x1e8] sm:$0xff] }
 0x227   : > { %v2107_v57 = vadd.f32 %v1828_v39, %v1466_v51  ;;  %v3362_v51 = vmul.f32 0.0625, %v3266_v11 }
 0x228   : > { %2205 = vst.msk [vmem:[%s5297_s4 + $0x198] sm:$0xff] %vm195_vm2, %v2108_v47  ;;  %v3268_v47 = vld [vmem:[%s5297_s4 + $0x58] sm:$0xff] }
 0x229   : > { %v4592_v53 = vpop.f32.mrb[50].mxu0  ;;  %2204 = vst.msk [vmem:[%s5297_s4 + $0x190] sm:$0xff] %vm195_vm2, %v2107_v57  ;;  %v4489_v15 = vpop.f32.mrb[100].mxu1 }
 0x22a   : > { %v3450_v46 = vadd.f32 %v4592_v53, %v3354_v38  ;;  %v2778_v40 = vpop.f32.mrb[51].mxu0  ;;  %v2110_v52 = vadd.f32 %v4489_v15, %v1469_v36  ;;  %v1838_v18 = vpop.f32.mrb[101].mxu1  ;;  %v3267_v38 = vld [vmem:[%s5297_s4 + $0x50] sm:$0xff]  ;;  %v1479_v15 = vld [vmem:[%s5297_s4 + $0x1f8] sm:$0xff] }
 0x22b   : > { %v3449_v13 = vadd.f32 %v3353_v48, %v2778_v40  ;;  %v2109_v43 = vadd.f32 %v1838_v18, %v1468_v6  ;;  %v1478_v40 = vld [vmem:[%s5297_s4 + $0x1f0] sm:$0xff]  ;;  %v3270_v18 = vld [vmem:[%s5297_s4 + $0x68] sm:$0xff] }
 0x22c   : > { %3546 = vst.msk [vmem:[%s5297_s4 + $0x8] sm:$0xff] %vm195_vm2, %v3450_v46  ;;  %2207 = vst.msk [vmem:[%s5297_s4 + $0x1a8] sm:$0xff] %vm195_vm2, %v2110_v52  ;;  %v3364_v46 = vmul.f32 0.0625, %v3268_v47  ;;  %v3363_v52 = vmul.f32 0.0625, %v3267_v38 }
 0x22d   : > { %3545 = vst.msk [vmem:[%s5297_s4] sm:$0xff] %vm195_vm2, %v3449_v13  ;;  %v4595_v31 = vpop.f32.mrb[52].mxu0  ;;  %2206 = vst.msk [vmem:[%s5297_s4 + $0x1a0] sm:$0xff] %vm195_vm2, %v2109_v43  ;;  %v4492_v16 = vpop.f32.mrb[102].mxu1 }
 0x22e   : > { %v3452_v30 = vadd.f32 %v4595_v31, %v3356_v17  ;;  %v2788_v55 = vpop.f32.mrb[53].mxu0  ;;  %v2112_v25 = vadd.f32 %v4492_v16, %v1471_v19  ;;  %v1848_v58 = vpop.f32.mrb[103].mxu1  ;;  %v3269_v17 = vld [vmem:[%s5297_s4 + $0x60] sm:$0xff]  ;;  %v1481_v16 = vld [vmem:[%s5297_s4 + $0x208] sm:$0xff] }
 0x22f   : > { %v3451_v61 = vadd.f32 %v3355_v54, %v2788_v55  ;;  %v2111_v45 = vadd.f32 %v1848_v58, %v1470_v44  ;;  %v1480_v55 = vld [vmem:[%s5297_s4 + $0x200] sm:$0xff]  ;;  %v3272_v58 = vld [vmem:[%s5297_s4 + $0x78] sm:$0xff] }
 0x230   : > { %3548 = vst.msk [vmem:[%s5297_s4 + $0x18] sm:$0xff] %vm195_vm2, %v3452_v30  ;;  %2209 = vst.msk [vmem:[%s5297_s4 + $0x1b8] sm:$0xff] %vm195_vm2, %v2112_v25  ;;  %v3366_v30 = vmul.f32 0.0625, %v3270_v18  ;;  %v3365_v25 = vmul.f32 0.0625, %v3269_v17 }
 0x231   : > { %3547 = vst.msk [vmem:[%s5297_s4 + $0x10] sm:$0xff] %vm195_vm2, %v3451_v61  ;;  %v4598_v10 = vpop.f32.mrb[54].mxu0  ;;  %2208 = vst.msk [vmem:[%s5297_s4 + $0x1b0] sm:$0xff] %vm195_vm2, %v2111_v45  ;;  %v4495_v56 = vpop.f32.mrb[104].mxu1 }
 0x232   : > { %v3454_v33 = vadd.f32 %v4598_v10, %v3358_v8  ;;  %v2798_v35 = vpop.f32.mrb[55].mxu0  ;;  %v2114_v26 = vadd.f32 %v4495_v56, %v1473_v63  ;;  %v1858_v27 = vpop.f32.mrb[105].mxu1  ;;  %v3271_v8 = vld [vmem:[%s5297_s4 + $0x70] sm:$0xff]  ;;  %v1483_v56 = vld [vmem:[%s5297_s4 + $0x218] sm:$0xff] }
 0x233   : > { %v3453_v12 = vadd.f32 %v3357_v29, %v2798_v35  ;;  %v2113_v0 = vadd.f32 %v1858_v27, %v1472_v23  ;;  %v1482_v35 = vld [vmem:[%s5297_s4 + $0x210] sm:$0xff]  ;;  %v3274_v27 = vld [vmem:[%s5297_s4 + $0x88] sm:$0xff] }
 0x234   : > { %3550 = vst.msk [vmem:[%s5297_s4 + $0x28] sm:$0xff] %vm195_vm2, %v3454_v33  ;;  %2211 = vst.msk [vmem:[%s5297_s4 + $0x1c8] sm:$0xff] %vm195_vm2, %v2114_v26  ;;  %v3368_v33 = vmul.f32 0.0625, %v3272_v58  ;;  %v3367_v26 = vmul.f32 0.0625, %v3271_v8 }
 0x235   : > { %3549 = vst.msk [vmem:[%s5297_s4 + $0x20] sm:$0xff] %vm195_vm2, %v3453_v12  ;;  %v4601_v32 = vpop.f32.mrb[56].mxu0  ;;  %2210 = vst.msk [vmem:[%s5297_s4 + $0x1c0] sm:$0xff] %vm195_vm2, %v2113_v0  ;;  %v4498_v59 = vpop.f32.mrb[106].mxu1 }
 0x236   : > { %v3456_v34 = vadd.f32 %v4601_v32, %v3360_v14  ;;  %v2808_v21 = vpop.f32.mrb[57].mxu0  ;;  %v2116_v5 = vadd.f32 %v4498_v59, %v1475_v1  ;;  %v1868_v22 = vpop.f32.mrb[107].mxu1  ;;  %v3273_v14 = vld [vmem:[%s5297_s4 + $0x80] sm:$0xff]  ;;  %v1485_v59 = vld [vmem:[%s5297_s4 + $0x228] sm:$0xff] }
 0x237   : > { %v3455_v24 = vadd.f32 %v3359_v20, %v2808_v21  ;;  %v2115_v37 = vadd.f32 %v1868_v22, %v1474_v60  ;;  %v1484_v21 = vld [vmem:[%s5297_s4 + $0x220] sm:$0xff]  ;;  %v3276_v22 = vld [vmem:[%s5297_s4 + $0x98] sm:$0xff] }
 0x238   : > { %3552 = vst.msk [vmem:[%s5297_s4 + $0x38] sm:$0xff] %vm195_vm2, %v3456_v34  ;;  %2213 = vst.msk [vmem:[%s5297_s4 + $0x1d8] sm:$0xff] %vm195_vm2, %v2116_v5  ;;  %v3370_v34 = vmul.f32 0.0625, %v3274_v27  ;;  %v3369_v5 = vmul.f32 0.0625, %v3273_v14 }
 0x239   : > { %3551 = vst.msk [vmem:[%s5297_s4 + $0x30] sm:$0xff] %vm195_vm2, %v3455_v24  ;;  %v4604_v28 = vpop.f32.mrb[58].mxu0  ;;  %2212 = vst.msk [vmem:[%s5297_s4 + $0x1d0] sm:$0xff] %vm195_vm2, %v2115_v37  ;;  %v4501_v39 = vpop.f32.mrb[108].mxu1 }
 0x23a   : > { %v3458_v57 = vadd.f32 %v4604_v28, %v3362_v51  ;;  %v2818_v36 = vpop.f32.mrb[59].mxu0  ;;  %v2118_v6 = vadd.f32 %v4501_v39, %v1477_v42  ;;  %v1878_v53 = vpop.f32.mrb[109].mxu1  ;;  %v3275_v51 = vld [vmem:[%s5297_s4 + $0x90] sm:$0xff]  ;;  %v1487_v39 = vld [vmem:[%s5297_s4 + $0x238] sm:$0xff] }
 0x23b   : > { %v3457_v48 = vadd.f32 %v3361_v9, %v2818_v36  ;;  %v2117_v4 = vadd.f32 %v1878_v53, %v1476_v3  ;;  %v1486_v36 = vld [vmem:[%s5297_s4 + $0x230] sm:$0xff]  ;;  %v3278_v53 = vld [vmem:[%s5297_s4 + $0xa8] sm:$0xff] }
 0x23c   : > { %3554 = vst.msk [vmem:[%s5297_s4 + $0x48] sm:$0xff] %vm195_vm2, %v3458_v57  ;;  %2215 = vst.msk [vmem:[%s5297_s4 + $0x1e8] sm:$0xff] %vm195_vm2, %v2118_v6  ;;  %v3372_v57 = vmul.f32 0.0625, %v3276_v22  ;;  %v3371_v6 = vmul.f32 0.0625, %v3275_v51 }
 0x23d   : > { %3553 = vst.msk [vmem:[%s5297_s4 + $0x40] sm:$0xff] %vm195_vm2, %v3457_v48  ;;  %v4607_v2 = vpop.f32.mrb[60].mxu0  ;;  %2214 = vst.msk [vmem:[%s5297_s4 + $0x1e0] sm:$0xff] %vm195_vm2, %v2117_v4  ;;  %v4504_v13 = vpop.f32.mrb[110].mxu1 }
 0x23e   : > { %v3460_v43 = vadd.f32 %v4607_v2, %v3364_v46  ;;  %v2828_v19 = vpop.f32.mrb[61].mxu0  ;;  %v2120_v44 = vadd.f32 %v4504_v13, %v1479_v15  ;;  %v1888_v31 = vpop.f32.mrb[111].mxu1  ;;  %v3277_v46 = vld [vmem:[%s5297_s4 + $0xa0] sm:$0xff]  ;;  %v1489_v13 = vld [vmem:[%s5297_s4 + $0x248] sm:$0xff] }
 0x23f   : > { %v3459_v54 = vadd.f32 %v3363_v52, %v2828_v19  ;;  %v2119_v49 = vadd.f32 %v1888_v31, %v1478_v40  ;;  %v1488_v19 = vld [vmem:[%s5297_s4 + $0x240] sm:$0xff]  ;;  %v3280_v31 = vld [vmem:[%s5297_s4 + $0xb8] sm:$0xff] }
 0x240   : > { %3556 = vst.msk [vmem:[%s5297_s4 + $0x58] sm:$0xff] %vm195_vm2, %v3460_v43  ;;  %2217 = vst.msk [vmem:[%s5297_s4 + $0x1f8] sm:$0xff] %vm195_vm2, %v2120_v44  ;;  %v3374_v43 = vmul.f32 0.0625, %v3278_v53  ;;  %v3373_v44 = vmul.f32 0.0625, %v3277_v46 }
 0x241   : > { %3555 = vst.msk [vmem:[%s5297_s4 + $0x50] sm:$0xff] %vm195_vm2, %v3459_v54  ;;  %v4610_v50 = vpop.f32.mrb[62].mxu0  ;;  %2216 = vst.msk [vmem:[%s5297_s4 + $0x1f0] sm:$0xff] %vm195_vm2, %v2119_v49  ;;  %v4507_v61 = vpop.f32.mrb[112].mxu1 }
 0x242   : > { %v3462_v45 = vadd.f32 %v4610_v50, %v3366_v30  ;;  %v2838_v63 = vpop.f32.mrb[63].mxu0  ;;  %v2122_v23 = vadd.f32 %v4507_v61, %v1481_v16  ;;  %v1898_v10 = vpop.f32.mrb[113].mxu1  ;;  %v3279_v30 = vld [vmem:[%s5297_s4 + $0xb0] sm:$0xff]  ;;  %v1491_v61 = vld [vmem:[%s5297_s4 + $0x258] sm:$0xff] }
 0x243   : > { %v3461_v29 = vadd.f32 %v3365_v25, %v2838_v63  ;;  %v2121_v7 = vadd.f32 %v1898_v10, %v1480_v55  ;;  %v1490_v63 = vld [vmem:[%s5297_s4 + $0x250] sm:$0xff]  ;;  %v3282_v10 = vld [vmem:[%s5297_s4 + $0xc8] sm:$0xff] }
 0x244   : > { %3558 = vst.msk [vmem:[%s5297_s4 + $0x68] sm:$0xff] %vm195_vm2, %v3462_v45  ;;  %2219 = vst.msk [vmem:[%s5297_s4 + $0x208] sm:$0xff] %vm195_vm2, %v2122_v23  ;;  %v3376_v45 = vmul.f32 0.0625, %v3280_v31  ;;  %v3375_v23 = vmul.f32 0.0625, %v3279_v30 }
 0x245   : > { %3557 = vst.msk [vmem:[%s5297_s4 + $0x60] sm:$0xff] %vm195_vm2, %v3461_v29  ;;  %v4613_v62 = vpop.f32.mrb[64].mxu0  ;;  %2218 = vst.msk [vmem:[%s5297_s4 + $0x200] sm:$0xff] %vm195_vm2, %v2121_v7  ;;  %v4510_v12 = vpop.f32.mrb[114].mxu1 }
 0x246   : > { %v3464_v0 = vadd.f32 %v4613_v62, %v3368_v33  ;;  %v2848_v1 = vpop.f32.mrb[65].mxu0  ;;  %v2124_v60 = vadd.f32 %v4510_v12, %v1483_v56  ;;  %v1908_v32 = vpop.f32.mrb[115].mxu1  ;;  %v3281_v33 = vld [vmem:[%s5297_s4 + $0xc0] sm:$0xff]  ;;  %v1493_v12 = vld [vmem:[%s5297_s4 + $0x268] sm:$0xff] }
 0x247   : > { %v3463_v20 = vadd.f32 %v3367_v26, %v2848_v1  ;;  %v2123_v11 = vadd.f32 %v1908_v32, %v1482_v35  ;;  %v1492_v1 = vld [vmem:[%s5297_s4 + $0x260] sm:$0xff]  ;;  %v3284_v32 = vld [vmem:[%s5297_s4 + $0xd8] sm:$0xff] }
 0x248   : > { %3560 = vst.msk [vmem:[%s5297_s4 + $0x78] sm:$0xff] %vm195_vm2, %v3464_v0  ;;  %2221 = vst.msk [vmem:[%s5297_s4 + $0x218] sm:$0xff] %vm195_vm2, %v2124_v60  ;;  %v3378_v0 = vmul.f32 0.0625, %v3282_v10  ;;  %v3377_v60 = vmul.f32 0.0625, %v3281_v33 }
 0x249   : > { %3559 = vst.msk [vmem:[%s5297_s4 + $0x70] sm:$0xff] %vm195_vm2, %v3463_v20  ;;  %v4616_v41 = vpop.f32.mrb[66].mxu0  ;;  %2220 = vst.msk [vmem:[%s5297_s4 + $0x210] sm:$0xff] %vm195_vm2, %v2123_v11  ;;  %v4513_v24 = vpop.f32.mrb[116].mxu1 }
 0x24a   : > { %v3466_v37 = vadd.f32 %v4616_v41, %v3370_v34  ;;  %v2858_v42 = vpop.f32.mrb[67].mxu0  ;;  %v2126_v3 = vadd.f32 %v4513_v24, %v1485_v59  ;;  %v1918_v28 = vpop.f32.mrb[117].mxu1  ;;  %v3283_v34 = vld [vmem:[%s5297_s4 + $0xd0] sm:$0xff]  ;;  %v1495_v24 = vld [vmem:[%s5297_s4 + $0x278] sm:$0xff] }
 0x24b   : > { %v3465_v9 = vadd.f32 %v3369_v5, %v2858_v42  ;;  %v2125_v47 = vadd.f32 %v1918_v28, %v1484_v21  ;;  %v1494_v42 = vld [vmem:[%s5297_s4 + $0x270] sm:$0xff]  ;;  %v3286_v28 = vld [vmem:[%s5297_s4 + $0xe8] sm:$0xff] }
 0x24c   : > { %3562 = vst.msk [vmem:[%s5297_s4 + $0x88] sm:$0xff] %vm195_vm2, %v3466_v37  ;;  %2223 = vst.msk [vmem:[%s5297_s4 + $0x228] sm:$0xff] %vm195_vm2, %v2126_v3  ;;  %v3380_v37 = vmul.f32 0.0625, %v3284_v32  ;;  %v3379_v3 = vmul.f32 0.0625, %v3283_v34 }
 0x24d   : > { %3561 = vst.msk [vmem:[%s5297_s4 + $0x80] sm:$0xff] %vm195_vm2, %v3465_v9  ;;  %v4619_v38 = vpop.f32.mrb[68].mxu0  ;;  %2222 = vst.msk [vmem:[%s5297_s4 + $0x220] sm:$0xff] %vm195_vm2, %v2125_v47  ;;  %v4516_v48 = vpop.f32.mrb[118].mxu1 }
 0x24e   : > { %v3468_v4 = vadd.f32 %v4619_v38, %v3372_v57  ;;  %v2868_v15 = vpop.f32.mrb[69].mxu0  ;;  %v2128_v40 = vadd.f32 %v4516_v48, %v1487_v39  ;;  %v1928_v2 = vpop.f32.mrb[119].mxu1  ;;  %v3285_v57 = vld [vmem:[%s5297_s4 + $0xe0] sm:$0xff]  ;;  %v1497_v48 = vld [vmem:[%s5297_s4 + $0x288] sm:$0xff] }
 0x24f   : > { %v3467_v52 = vadd.f32 %v3371_v6, %v2868_v15  ;;  %v2127_v18 = vadd.f32 %v1928_v2, %v1486_v36  ;;  %v1496_v15 = vld [vmem:[%s5297_s4 + $0x280] sm:$0xff]  ;;  %v3288_v2 = vld [vmem:[%s5297_s4 + $0xf8] sm:$0xff] }
 0x250   : > { %3564 = vst.msk [vmem:[%s5297_s4 + $0x98] sm:$0xff] %vm195_vm2, %v3468_v4  ;;  %2225 = vst.msk [vmem:[%s5297_s4 + $0x238] sm:$0xff] %vm195_vm2, %v2128_v40  ;;  %v3382_v4 = vmul.f32 0.0625, %v3286_v28  ;;  %v3381_v40 = vmul.f32 0.0625, %v3285_v57 }
 0x251   : > { %3563 = vst.msk [vmem:[%s5297_s4 + $0x90] sm:$0xff] %vm195_vm2, %v3467_v52  ;;  %v4622_v17 = vpop.f32.mrb[70].mxu0  ;;  %2224 = vst.msk [vmem:[%s5297_s4 + $0x230] sm:$0xff] %vm195_vm2, %v2127_v18  ;;  %v4519_v54 = vpop.f32.mrb[120].mxu1 }
 0x252   : > { %v3470_v49 = vadd.f32 %v4622_v17, %v3374_v43  ;;  %v2878_v16 = vpop.f32.mrb[71].mxu0  ;;  %v2130_v55 = vadd.f32 %v4519_v54, %v1489_v13  ;;  %v1938_v50 = vpop.f32.mrb[121].mxu1  ;;  %v3287_v43 = vld [vmem:[%s5297_s4 + $0xf0] sm:$0xff]  ;;  %v1499_v54 = vld [vmem:[%s5297_s4 + $0x298] sm:$0xff] }
 0x253   : > { %v3469_v25 = vadd.f32 %v3373_v44, %v2878_v16  ;;  %v2129_v58 = vadd.f32 %v1938_v50, %v1488_v19  ;;  %v1498_v16 = vld [vmem:[%s5297_s4 + $0x290] sm:$0xff]  ;;  %v3290_v50 = vld [vmem:[%s5297_s4 + $0x108] sm:$0xff] }
 0x254   : > { %3566 = vst.msk [vmem:[%s5297_s4 + $0xa8] sm:$0xff] %vm195_vm2, %v3470_v49  ;;  %2227 = vst.msk [vmem:[%s5297_s4 + $0x248] sm:$0xff] %vm195_vm2, %v2130_v55  ;;  %v3384_v49 = vmul.f32 0.0625, %v3288_v2  ;;  %v3383_v55 = vmul.f32 0.0625, %v3287_v43 }
 0x255   : > { %3565 = vst.msk [vmem:[%s5297_s4 + $0xa0] sm:$0xff] %vm195_vm2, %v3469_v25  ;;  %v4625_v8 = vpop.f32.mrb[72].mxu0  ;;  %2226 = vst.msk [vmem:[%s5297_s4 + $0x240] sm:$0xff] %vm195_vm2, %v2129_v58  ;;  %v4522_v29 = vpop.f32.mrb[122].mxu1 }
 0x256   : > { %v3472_v7 = vadd.f32 %v4625_v8, %v3376_v45  ;;  %v2888_v56 = vpop.f32.mrb[73].mxu0  ;;  %v2132_v35 = vadd.f32 %v4522_v29, %v1491_v61  ;;  %v1948_v62 = vpop.f32.mrb[123].mxu1  ;;  %v3289_v45 = vld [vmem:[%s5297_s4 + $0x100] sm:$0xff]  ;;  %v1501_v29 = vld [vmem:[%s5297_s4 + $0x2a8] sm:$0xff] }
 0x257   : > { %v3471_v26 = vadd.f32 %v3375_v23, %v2888_v56  ;;  %v2131_v27 = vadd.f32 %v1948_v62, %v1490_v63  ;;  %v1500_v56 = vld [vmem:[%s5297_s4 + $0x2a0] sm:$0xff]  ;;  %v3292_v62 = vld [vmem:[%s5297_s4 + $0x118] sm:$0xff] }
 0x258   : > { %3568 = vst.msk [vmem:[%s5297_s4 + $0xb8] sm:$0xff] %vm195_vm2, %v3472_v7  ;;  %2229 = vst.msk [vmem:[%s5297_s4 + $0x258] sm:$0xff] %vm195_vm2, %v2132_v35  ;;  %v3386_v7 = vmul.f32 0.0625, %v3290_v50  ;;  %v3385_v35 = vmul.f32 0.0625, %v3289_v45 }
 0x259   : > { %3567 = vst.msk [vmem:[%s5297_s4 + $0xb0] sm:$0xff] %vm195_vm2, %v3471_v26  ;;  %v4628_v14 = vpop.f32.mrb[74].mxu0  ;;  %2228 = vst.msk [vmem:[%s5297_s4 + $0x250] sm:$0xff] %vm195_vm2, %v2131_v27  ;;  %v4525_v20 = vpop.f32.mrb[124].mxu1 }
 0x25a   : > { %v3474_v11 = vadd.f32 %v4628_v14, %v3378_v0  ;;  %v2898_v59 = vpop.f32.mrb[75].mxu0  ;;  %v2134_v21 = vadd.f32 %v4525_v20, %v1493_v12  ;;  %v1958_v41 = vpop.f32.mrb[125].mxu1  ;;  %v3291_v0 = vld [vmem:[%s5297_s4 + $0x110] sm:$0xff]  ;;  %v1503_v20 = vld [vmem:[%s5297_s4 + $0x2b8] sm:$0xff] }
 0x25b   : > { %v3473_v5 = vadd.f32 %v3377_v60, %v2898_v59  ;;  %v2133_v22 = vadd.f32 %v1958_v41, %v1492_v1  ;;  %v1502_v59 = vld [vmem:[%s5297_s4 + $0x2b0] sm:$0xff]  ;;  %v3294_v41 = vld [vmem:[%s5297_s4 + $0x128] sm:$0xff] }
 0x25c   : > { %3570 = vst.msk [vmem:[%s5297_s4 + $0xc8] sm:$0xff] %vm195_vm2, %v3474_v11  ;;  %2231 = vst.msk [vmem:[%s5297_s4 + $0x268] sm:$0xff] %vm195_vm2, %v2134_v21  ;;  %v3388_v11 = vmul.f32 0.0625, %v3292_v62  ;;  %v3387_v21 = vmul.f32 0.0625, %v3291_v0 }
 0x25d   : > { %3569 = vst.msk [vmem:[%s5297_s4 + $0xc0] sm:$0xff] %vm195_vm2, %v3473_v5  ;;  %v4631_v51 = vpop.f32.mrb[76].mxu0  ;;  %2230 = vst.msk [vmem:[%s5297_s4 + $0x260] sm:$0xff] %vm195_vm2, %v2133_v22  ;;  %v4528_v9 = vpop.f32.mrb[126].mxu1 }
 0x25e   : > { %v3476_v47 = vadd.f32 %v4631_v51, %v3380_v37  ;;  %v2908_v39 = vpop.f32.mrb[77].mxu0  ;;  %v2136_v36 = vadd.f32 %v4528_v9, %v1495_v24  ;;  %v1968_v38 = vpop.f32.mrb[127].mxu1  ;;  %v3293_v37 = vld [vmem:[%s5297_s4 + $0x120] sm:$0xff]  ;;  %v1505_v9 = vld [vmem:[%s5297_s4 + $0x2c8] sm:$0xff] }
 0x25f   : > { %v3475_v6 = vadd.f32 %v3379_v3, %v2908_v39  ;;  %v2135_v53 = vadd.f32 %v1968_v38, %v1494_v42  ;;  %v1504_v39 = vld [vmem:[%s5297_s4 + $0x2c0] sm:$0xff]  ;;  %v3296_v38 = vld [vmem:[%s5297_s4 + $0x138] sm:$0xff] }
 0x260   : > { %3572 = vst.msk [vmem:[%s5297_s4 + $0xd8] sm:$0xff] %vm195_vm2, %v3476_v47  ;;  %2233 = vst.msk [vmem:[%s5297_s4 + $0x278] sm:$0xff] %vm195_vm2, %v2136_v36  ;;  %v3390_v47 = vmul.f32 0.0625, %v3294_v41  ;;  %v3389_v36 = vmul.f32 0.0625, %v3293_v37  ;;  %v3304_v37 = vld [vmem:[%s5297_s4 + $0x178] sm:$0xff] }
 0x261   : > { %3571 = vst.msk [vmem:[%s5297_s4 + $0xd0] sm:$0xff] %vm195_vm2, %v3475_v6  ;;  %v4634_v46 = vpop.f32.mrb[78].mxu0  ;;  %2232 = vst.msk [vmem:[%s5297_s4 + $0x270] sm:$0xff] %vm195_vm2, %v2135_v53  ;;  %v4531_v52 = vpop.f32.mrb[128].mxu1 }
 0x262   : > { %v3478_v18 = vadd.f32 %v4634_v46, %v3382_v4  ;;  %v2918_v13 = vpop.f32.mrb[79].mxu0  ;;  %v2138_v19 = vadd.f32 %v4531_v52, %v1497_v48  ;;  %v1978_v17 = vpop.f32.mrb[129].mxu1  ;;  %v3295_v4 = vld [vmem:[%s5297_s4 + $0x130] sm:$0xff]  ;;  %v1507_v52 = vld [vmem:[%s5297_s4 + $0x2d8] sm:$0xff] }
 0x263   : > { %v3477_v44 = vadd.f32 %v3381_v40, %v2918_v13  ;;  %v2137_v31 = vadd.f32 %v1978_v17, %v1496_v15  ;;  %v1506_v13 = vld [vmem:[%s5297_s4 + $0x2d0] sm:$0xff]  ;;  %v3298_v17 = vld [vmem:[%s5297_s4 + $0x148] sm:$0xff] }
 0x264   : > { %3574 = vst.msk [vmem:[%s5297_s4 + $0xe8] sm:$0xff] %vm195_vm2, %v3478_v18  ;;  %2235 = vst.msk [vmem:[%s5297_s4 + $0x288] sm:$0xff] %vm195_vm2, %v2138_v19  ;;  %v3392_v18 = vmul.f32 0.0625, %v3296_v38  ;;  %v3391_v19 = vmul.f32 0.0625, %v3295_v4 }
 0x265   : > { %3573 = vst.msk [vmem:[%s5297_s4 + $0xe0] sm:$0xff] %vm195_vm2, %v3477_v44  ;;  %v4637_v30 = vpop.f32.mrb[80].mxu0  ;;  %2234 = vst.msk [vmem:[%s5297_s4 + $0x280] sm:$0xff] %vm195_vm2, %v2137_v31  ;;  %v4534_v25 = vpop.f32.mrb[130].mxu1 }
 0x266   : > { %v3480_v58 = vadd.f32 %v4637_v30, %v3384_v49  ;;  %v2928_v61 = vpop.f32.mrb[81].mxu0  ;;  %v2140_v63 = vadd.f32 %v4534_v25, %v1499_v54  ;;  %v1988_v8 = vpop.f32.mrb[131].mxu1  ;;  %v3297_v49 = vld [vmem:[%s5297_s4 + $0x140] sm:$0xff]  ;;  %v1509_v25 = vld [vmem:[%s5297_s4 + $0x2e8] sm:$0xff] }
 0x267   : > { %v3479_v23 = vadd.f32 %v3383_v55, %v2928_v61  ;;  %v2139_v10 = vadd.f32 %v1988_v8, %v1498_v16  ;;  %v1508_v61 = vld [vmem:[%s5297_s4 + $0x2e0] sm:$0xff]  ;;  %v3300_v8 = vld [vmem:[%s5297_s4 + $0x158] sm:$0xff] }
 0x268   : > { %3576 = vst.msk [vmem:[%s5297_s4 + $0xf8] sm:$0xff] %vm195_vm2, %v3480_v58  ;;  %2237 = vst.msk [vmem:[%s5297_s4 + $0x298] sm:$0xff] %vm195_vm2, %v2140_v63  ;;  %v3394_v58 = vmul.f32 0.0625, %v3298_v17  ;;  %v3393_v63 = vmul.f32 0.0625, %v3297_v49  ;;  %v3310_v17 = vld [vmem:[%s5297_s4 + $0x1a8] sm:$0xff] }
 0x269   : > { %3575 = vst.msk [vmem:[%s5297_s4 + $0xf0] sm:$0xff] %vm195_vm2, %v3479_v23  ;;  %v4640_v33 = vpop.f32.mrb[82].mxu0  ;;  %2236 = vst.msk [vmem:[%s5297_s4 + $0x290] sm:$0xff] %vm195_vm2, %v2139_v10  ;;  %v4537_v26 = vpop.f32.mrb[132].mxu1 }
 0x26a   : > { %v3482_v27 = vadd.f32 %v4640_v33, %v3386_v7  ;;  %v2938_v12 = vpop.f32.mrb[83].mxu0  ;;  %v2142_v1 = vadd.f32 %v4537_v26, %v1501_v29  ;;  %v1998_v14 = vpop.f32.mrb[133].mxu1  ;;  %v3299_v7 = vld [vmem:[%s5297_s4 + $0x150] sm:$0xff]  ;;  %v1511_v26 = vld [vmem:[%s5297_s4 + $0x2f8] sm:$0xff] }
 0x26b   : > { %v3481_v60 = vadd.f32 %v3385_v35, %v2938_v12  ;;  %v2141_v32 = vadd.f32 %v1998_v14, %v1500_v56  ;;  %v1510_v12 = vld [vmem:[%s5297_s4 + $0x2f0] sm:$0xff]  ;;  %v3302_v14 = vld [vmem:[%s5297_s4 + $0x168] sm:$0xff] }
 0x26c   : > { %3578 = vst.msk [vmem:[%s5297_s4 + $0x108] sm:$0xff] %vm195_vm2, %v3482_v27  ;;  %2239 = vst.msk [vmem:[%s5297_s4 + $0x2a8] sm:$0xff] %vm195_vm2, %v2142_v1  ;;  %v3396_v27 = vmul.f32 0.0625, %v3300_v8  ;;  %v3395_v1 = vmul.f32 0.0625, %v3299_v7 }
 0x26d   : > { %3577 = vst.msk [vmem:[%s5297_s4 + $0x100] sm:$0xff] %vm195_vm2, %v3481_v60  ;;  %v4643_v34 = vpop.f32.mrb[84].mxu0  ;;  %2238 = vst.msk [vmem:[%s5297_s4 + $0x2a0] sm:$0xff] %vm195_vm2, %v2141_v32  ;;  %v4540_v5 = vpop.f32.mrb[134].mxu1 }
 0x26e   : > { %v3484_v22 = vadd.f32 %v4643_v34, %v3388_v11  ;;  %v2948_v24 = vpop.f32.mrb[85].mxu0  ;;  %v2144_v42 = vadd.f32 %v4540_v5, %v1503_v20  ;;  %v2008_v51 = vpop.f32.mrb[135].mxu1  ;;  %v3301_v11 = vld [vmem:[%s5297_s4 + $0x160] sm:$0xff]  ;;  %v3398_v5 = vmul.f32 0.0625, %v3302_v14 }
 0x26f   : > { %v3483_v3 = vadd.f32 %v3387_v21, %v2948_v24  ;;  %v2143_v28 = vadd.f32 %v2008_v51, %v1502_v59  ;;  %v3397_v24 = vmul.f32 0.0625, %v3301_v11  ;;  %v3318_v11 = vld [vmem:[%s5297_s4 + $0x1e8] sm:$0xff] }
 0x270   : > { %3580 = vst.msk [vmem:[%s5297_s4 + $0x118] sm:$0xff] %vm195_vm2, %v3484_v22  ;;  %2241 = vst.msk [vmem:[%s5297_s4 + $0x2b8] sm:$0xff] %vm195_vm2, %v2144_v42 }
 0x271   : > { %3579 = vst.msk [vmem:[%s5297_s4 + $0x110] sm:$0xff] %vm195_vm2, %v3483_v3  ;;  %v4646_v57 = vpop.f32.mrb[86].mxu0  ;;  %2240 = vst.msk [vmem:[%s5297_s4 + $0x2b0] sm:$0xff] %vm195_vm2, %v2143_v28  ;;  %v4543_v6 = vpop.f32.mrb[136].mxu1  ;;  %v3303_v3 = vld [vmem:[%s5297_s4 + $0x170] sm:$0xff] }
 0x272   : > { %v3486_v53 = vadd.f32 %v4646_v57, %v3390_v47  ;;  %v2958_v48 = vpop.f32.mrb[87].mxu0  ;;  %v2146_v15 = vadd.f32 %v4543_v6, %v1505_v9  ;;  %v2018_v46 = vpop.f32.mrb[137].mxu1  ;;  %v3400_v9 = vmul.f32 0.0625, %v3304_v37  ;;  %v3306_v57 = vld [vmem:[%s5297_s4 + $0x188] sm:$0xff]  ;;  %v3305_v6 = vld [vmem:[%s5297_s4 + $0x180] sm:$0xff]  ;;  %v3320_v37 = vld [vmem:[%s5297_s4 + $0x1f8] sm:$0xff] }
 0x273   : > { %v3485_v40 = vadd.f32 %v3389_v36, %v2958_v48  ;;  %v2145_v2 = vadd.f32 %v2018_v46, %v1504_v39  ;;  %v3399_v39 = vmul.f32 0.0625, %v3303_v3  ;;  %v3402_v48 = vmul.f32 0.0625, %v3306_v57  ;;  %v3308_v46 = vld [vmem:[%s5297_s4 + $0x198] sm:$0xff]  ;;  %v3319_v3 = vld [vmem:[%s5297_s4 + $0x1f0] sm:$0xff]  ;;  %v3322_v57 = vld [vmem:[%s5297_s4 + $0x208] sm:$0xff] }
 0x274   : > { %3582 = vst.msk [vmem:[%s5297_s4 + $0x128] sm:$0xff] %vm195_vm2, %v3486_v53  ;;  %2243 = vst.msk [vmem:[%s5297_s4 + $0x2c8] sm:$0xff] %vm195_vm2, %v2146_v15  ;;  %v3401_v15 = vmul.f32 0.0625, %v3305_v6  ;;  %v3321_v6 = vld [vmem:[%s5297_s4 + $0x200] sm:$0xff] }
 0x275   : > { %3581 = vst.msk [vmem:[%s5297_s4 + $0x120] sm:$0xff] %vm195_vm2, %v3485_v40  ;;  %v4649_v43 = vpop.f32.mrb[88].mxu0  ;;  %2242 = vst.msk [vmem:[%s5297_s4 + $0x2c0] sm:$0xff] %vm195_vm2, %v2145_v2  ;;  %v4546_v44 = vpop.f32.mrb[138].mxu1 }
 0x276   : > { %v3488_v31 = vadd.f32 %v4649_v43, %v3392_v18  ;;  %v2968_v54 = vpop.f32.mrb[89].mxu0  ;;  %v2148_v16 = vadd.f32 %v4546_v44, %v1507_v52  ;;  %v2028_v30 = vpop.f32.mrb[139].mxu1  ;;  %v3307_v52 = vld [vmem:[%s5297_s4 + $0x190] sm:$0xff] }
 0x277   : > { %v3487_v55 = vadd.f32 %v3391_v19, %v2968_v54  ;;  %v2147_v50 = vadd.f32 %v2028_v30, %v1506_v13  ;;  %v3404_v13 = vmul.f32 0.0625, %v3308_v46  ;;  %v3403_v19 = vmul.f32 0.0625, %v3307_v52  ;;  %v3309_v54 = vld [vmem:[%s5297_s4 + $0x1a0] sm:$0xff]  ;;  %v3324_v46 = vld [vmem:[%s5297_s4 + $0x218] sm:$0xff]  ;;  %v3323_v52 = vld [vmem:[%s5297_s4 + $0x210] sm:$0xff] }
 0x278   : > { %3584 = vst.msk [vmem:[%s5297_s4 + $0x138] sm:$0xff] %vm195_vm2, %v3488_v31  ;;  %2245 = vst.msk [vmem:[%s5297_s4 + $0x2d8] sm:$0xff] %vm195_vm2, %v2148_v16  ;;  %v3406_v16 = vmul.f32 0.0625, %v3310_v17  ;;  %v3326_v17 = vld [vmem:[%s5297_s4 + $0x228] sm:$0xff] }
 0x279   : > { %3583 = vst.msk [vmem:[%s5297_s4 + $0x130] sm:$0xff] %vm195_vm2, %v3487_v55  ;;  %v4652_v45 = vpop.f32.mrb[90].mxu0  ;;  %2244 = vst.msk [vmem:[%s5297_s4 + $0x2d0] sm:$0xff] %vm195_vm2, %v2147_v50  ;;  %v4549_v23 = vpop.f32.mrb[140].mxu1  ;;  %v3405_v55 = vmul.f32 0.0625, %v3309_v54  ;;  %v3312_v50 = vld [vmem:[%s5297_s4 + $0x1b8] sm:$0xff] }
 0x27a   : > { %v3490_v10 = vadd.f32 %v4652_v45, %v3394_v58  ;;  %v2978_v29 = vpop.f32.mrb[91].mxu0  ;;  %v2150_v56 = vadd.f32 %v4549_v23, %v1509_v25  ;;  %v2038_v33 = vpop.f32.mrb[141].mxu1  ;;  %v3325_v54 = vld [vmem:[%s5297_s4 + $0x220] sm:$0xff] }
 0x27b   : > { %v3489_v35 = vadd.f32 %v3393_v63, %v2978_v29  ;;  %v2149_v62 = vadd.f32 %v2038_v33, %v1508_v61  ;;  %v3311_v61 = vld [vmem:[%s5297_s4 + $0x1b0] sm:$0xff]  ;;  %v3408_v63 = vmul.f32 0.0625, %v3312_v50  ;;  %v3328_v50 = vld [vmem:[%s5297_s4 + $0x238] sm:$0xff] }
 0x27c   : > { %3586 = vst.msk [vmem:[%s5297_s4 + $0x148] sm:$0xff] %vm195_vm2, %v3490_v10  ;;  %2247 = vst.msk [vmem:[%s5297_s4 + $0x2e8] sm:$0xff] %vm195_vm2, %v2150_v56  ;;  %v3407_v23 = vmul.f32 0.0625, %v3311_v61  ;;  %v3314_v10 = vld [vmem:[%s5297_s4 + $0x1c8] sm:$0xff]  ;;  %v3313_v56 = vld [vmem:[%s5297_s4 + $0x1c0] sm:$0xff] }
 0x27d   : > { %3585 = vst.msk [vmem:[%s5297_s4 + $0x140] sm:$0xff] %vm195_vm2, %v3489_v35  ;;  %v4655_v0 = vpop.f32.mrb[92].mxu0  ;;  %2246 = vst.msk [vmem:[%s5297_s4 + $0x2e0] sm:$0xff] %vm195_vm2, %v2149_v62  ;;  %v4552_v60 = vpop.f32.mrb[142].mxu1  ;;  %v3410_v35 = vmul.f32 0.0625, %v3314_v10  ;;  %v3327_v61 = vld [vmem:[%s5297_s4 + $0x230] sm:$0xff] }
 0x27e   : > { %v3492_v32 = vadd.f32 %v4655_v0, %v3396_v27  ;;  %v2988_v20 = vpop.f32.mrb[93].mxu0  ;;  %v2152_v59 = vadd.f32 %v4552_v60, %v1511_v26  ;;  %v2048_v34 = vpop.f32.mrb[143].mxu1  ;;  %v3409_v26 = vmul.f32 0.0625, %v3313_v56  ;;  %v3316_v27 = vld [vmem:[%s5297_s4 + $0x1d8] sm:$0xff]  ;;  %v3330_v10 = vld [vmem:[%s5297_s4 + $0x248] sm:$0xff]  ;;  %v3329_v56 = vld [vmem:[%s5297_s4 + $0x240] sm:$0xff] }
 0x27f   : > { %v3491_v21 = vadd.f32 %v3395_v1, %v2988_v20  ;;  %v2151_v41 = vadd.f32 %v2048_v34, %v1510_v12  ;;  %v3315_v1 = vld [vmem:[%s5297_s4 + $0x1d0] sm:$0xff]  ;;  %v3412_v60 = vmul.f32 0.0625, %v3316_v27  ;;  %v3332_v27 = vld [vmem:[%s5297_s4 + $0x258] sm:$0xff] }
 0x280   : > { %3588 = vst.msk [vmem:[%s5297_s4 + $0x158] sm:$0xff] %vm195_vm2, %v3492_v32  ;;  %2249 = vst.msk [vmem:[%s5297_s4 + $0x2f8] sm:$0xff] %vm195_vm2, %v2152_v59  ;;  %v3411_v20 = vmul.f32 0.0625, %v3315_v1  ;;  %v3331_v1 = vld [vmem:[%s5297_s4 + $0x250] sm:$0xff] }
 0x281   : > { %3587 = vst.msk [vmem:[%s5297_s4 + $0x150] sm:$0xff] %vm195_vm2, %v3491_v21  ;;  %v4658_v22 = vpop.f32.mrb[94].mxu0  ;;  %2248 = vst.msk [vmem:[%s5297_s4 + $0x2f0] sm:$0xff] %vm195_vm2, %v2151_v41  ;;  %v3317_v21 = vld [vmem:[%s5297_s4 + $0x1e0] sm:$0xff] }
 0x282   : > { %v3494_v42 = vadd.f32 %v4658_v22, %v3398_v5  ;;  %v2998_v51 = vpop.f32.mrb[95].mxu0  ;;  %v3414_v5 = vmul.f32 0.0625, %v3318_v11  ;;  %v3334_v11 = vld [vmem:[%s5297_s4 + $0x268] sm:$0xff] }
 0x283   : > { %v3493_v28 = vadd.f32 %v3397_v24, %v2998_v51  ;;  %v3413_v24 = vmul.f32 0.0625, %v3317_v21  ;;  %v3333_v21 = vld [vmem:[%s5297_s4 + $0x260] sm:$0xff] }
 0x284   : > { %3590 = vst.msk [vmem:[%s5297_s4 + $0x168] sm:$0xff] %vm195_vm2, %v3494_v42 }
 0x285   : > { %3589 = vst.msk [vmem:[%s5297_s4 + $0x160] sm:$0xff] %vm195_vm2, %v3493_v28  ;;  %v4661_v47 = vpop.f32.mrb[96].mxu0 }
 0x286   : > { %v3496_v36 = vadd.f32 %v4661_v47, %v3400_v9  ;;  %v3008_v38 = vpop.f32.mrb[97].mxu0  ;;  %v3416_v9 = vmul.f32 0.0625, %v3320_v37  ;;  %v3336_v37 = vld [vmem:[%s5297_s4 + $0x278] sm:$0xff] }
 0x287   : > { %v3495_v53 = vadd.f32 %v3399_v39, %v3008_v38  ;;  %v3415_v39 = vmul.f32 0.0625, %v3319_v3  ;;  %v3335_v3 = vld [vmem:[%s5297_s4 + $0x270] sm:$0xff] }
 0x288   : > { %3592 = vst.msk [vmem:[%s5297_s4 + $0x178] sm:$0xff] %vm195_vm2, %v3496_v36 }
 0x289   : > { %3591 = vst.msk [vmem:[%s5297_s4 + $0x170] sm:$0xff] %vm195_vm2, %v3495_v53  ;;  %v4664_v4 = vpop.f32.mrb[98].mxu0 }
 0x28a   : > { %v3498_v40 = vadd.f32 %v4664_v4, %v3402_v48  ;;  %v3018_v2 = vpop.f32.mrb[99].mxu0  ;;  %v3418_v48 = vmul.f32 0.0625, %v3322_v57  ;;  %v3338_v57 = vld [vmem:[%s5297_s4 + $0x288] sm:$0xff] }
 0x28b   : > { %v3497_v18 = vadd.f32 %v3401_v15, %v3018_v2  ;;  %v3417_v15 = vmul.f32 0.0625, %v3321_v6  ;;  %v3337_v6 = vld [vmem:[%s5297_s4 + $0x280] sm:$0xff] }
 0x28c   : > { %3594 = vst.msk [vmem:[%s5297_s4 + $0x188] sm:$0xff] %vm195_vm2, %v3498_v40 }
 0x28d   : > { %3593 = vst.msk [vmem:[%s5297_s4 + $0x180] sm:$0xff] %vm195_vm2, %v3497_v18  ;;  %v4667_v43 = vpop.f32.mrb[100].mxu0 }
 0x28e   : > { %v3500_v44 = vadd.f32 %v4667_v43, %v3404_v13  ;;  %v3028_v31 = vpop.f32.mrb[101].mxu0  ;;  %v3420_v13 = vmul.f32 0.0625, %v3324_v46  ;;  %v3340_v46 = vld [vmem:[%s5297_s4 + $0x298] sm:$0xff] }
 0x28f   : > { %v3499_v49 = vadd.f32 %v3403_v19, %v3028_v31  ;;  %v3419_v19 = vmul.f32 0.0625, %v3323_v52  ;;  %v3339_v52 = vld [vmem:[%s5297_s4 + $0x290] sm:$0xff] }
 0x290   : > { %3596 = vst.msk [vmem:[%s5297_s4 + $0x198] sm:$0xff] %vm195_vm2, %v3500_v44 }
 0x291   : > { %3595 = vst.msk [vmem:[%s5297_s4 + $0x190] sm:$0xff] %vm195_vm2, %v3499_v49  ;;  %v4670_v30 = vpop.f32.mrb[102].mxu0 }
 0x292   : > { %v3502_v25 = vadd.f32 %v4670_v30, %v3406_v16  ;;  %v3038_v58 = vpop.f32.mrb[103].mxu0  ;;  %v3422_v16 = vmul.f32 0.0625, %v3326_v17  ;;  %v3342_v17 = vld [vmem:[%s5297_s4 + $0x2a8] sm:$0xff] }
 0x293   : > { %v3501_v45 = vadd.f32 %v3405_v55, %v3038_v58  ;;  %v3421_v55 = vmul.f32 0.0625, %v3325_v54  ;;  %v3341_v54 = vld [vmem:[%s5297_s4 + $0x2a0] sm:$0xff] }
 0x294   : > { %3598 = vst.msk [vmem:[%s5297_s4 + $0x1a8] sm:$0xff] %vm195_vm2, %v3502_v25 }
 0x295   : > { %3597 = vst.msk [vmem:[%s5297_s4 + $0x1a0] sm:$0xff] %vm195_vm2, %v3501_v45  ;;  %v4673_v8 = vpop.f32.mrb[104].mxu0 }
 0x296   : > { %v3504_v29 = vadd.f32 %v4673_v8, %v3408_v63  ;;  %v3048_v7 = vpop.f32.mrb[105].mxu0  ;;  %v3424_v63 = vmul.f32 0.0625, %v3328_v50  ;;  %v3344_v50 = vld [vmem:[%s5297_s4 + $0x2b8] sm:$0xff] }
 0x297   : > { %v3503_v33 = vadd.f32 %v3407_v23, %v3048_v7  ;;  %v3423_v23 = vmul.f32 0.0625, %v3327_v61  ;;  %v3343_v61 = vld [vmem:[%s5297_s4 + $0x2b0] sm:$0xff] }
 0x298   : > { %3600 = vst.msk [vmem:[%s5297_s4 + $0x1b8] sm:$0xff] %vm195_vm2, %v3504_v29 }
 0x299   : > { %3599 = vst.msk [vmem:[%s5297_s4 + $0x1b0] sm:$0xff] %vm195_vm2, %v3503_v33  ;;  %v4676_v62 = vpop.f32.mrb[106].mxu0 }
 0x29a   : > { %v3506_v12 = vadd.f32 %v4676_v62, %v3410_v35  ;;  %v3058_v0 = vpop.f32.mrb[107].mxu0  ;;  %v3426_v35 = vmul.f32 0.0625, %v3330_v10  ;;  %v3346_v10 = vld [vmem:[%s5297_s4 + $0x2c8] sm:$0xff] }
 0x29b   : > { %v3505_v14 = vadd.f32 %v3409_v26, %v3058_v0  ;;  %v3425_v26 = vmul.f32 0.0625, %v3329_v56  ;;  %v3345_v56 = vld [vmem:[%s5297_s4 + $0x2c0] sm:$0xff] }
 0x29c   : > { %3602 = vst.msk [vmem:[%s5297_s4 + $0x1c8] sm:$0xff] %vm195_vm2, %v3506_v12 }
 0x29d   : > { %3601 = vst.msk [vmem:[%s5297_s4 + $0x1c0] sm:$0xff] %vm195_vm2, %v3505_v14  ;;  %v4679_v32 = vpop.f32.mrb[108].mxu0 }
 0x29e   : > { %v3508_v59 = vadd.f32 %v4679_v32, %v3412_v60  ;;  %v3068_v34 = vpop.f32.mrb[109].mxu0  ;;  %v3428_v60 = vmul.f32 0.0625, %v3332_v27  ;;  %v3348_v27 = vld [vmem:[%s5297_s4 + $0x2d8] sm:$0xff] }
 0x29f   : > { %v3507_v41 = vadd.f32 %v3411_v20, %v3068_v34  ;;  %v3427_v20 = vmul.f32 0.0625, %v3331_v1  ;;  %v3347_v1 = vld [vmem:[%s5297_s4 + $0x2d0] sm:$0xff] }
 0x2a0   : > { %3604 = vst.msk [vmem:[%s5297_s4 + $0x1d8] sm:$0xff] %vm195_vm2, %v3508_v59 }
 0x2a1   : > { %3603 = vst.msk [vmem:[%s5297_s4 + $0x1d0] sm:$0xff] %vm195_vm2, %v3507_v41  ;;  %v4682_v22 = vpop.f32.mrb[110].mxu0 }
 0x2a2   : > { %v3510_v42 = vadd.f32 %v4682_v22, %v3414_v5  ;;  %v3078_v51 = vpop.f32.mrb[111].mxu0  ;;  %v3430_v5 = vmul.f32 0.0625, %v3334_v11  ;;  %v3350_v11 = vld [vmem:[%s5297_s4 + $0x2e8] sm:$0xff] }
 0x2a3   : > { %v3509_v28 = vadd.f32 %v3413_v24, %v3078_v51  ;;  %v3429_v24 = vmul.f32 0.0625, %v3333_v21  ;;  %v3349_v21 = vld [vmem:[%s5297_s4 + $0x2e0] sm:$0xff] }
 0x2a4   : > { %3606 = vst.msk [vmem:[%s5297_s4 + $0x1e8] sm:$0xff] %vm195_vm2, %v3510_v42 }
 0x2a5   : > { %3605 = vst.msk [vmem:[%s5297_s4 + $0x1e0] sm:$0xff] %vm195_vm2, %v3509_v28  ;;  %v4685_v47 = vpop.f32.mrb[112].mxu0 }
 0x2a6   : > { %v3512_v36 = vadd.f32 %v4685_v47, %v3416_v9  ;;  %v3088_v38 = vpop.f32.mrb[113].mxu0  ;;  %v3432_v9 = vmul.f32 0.0625, %v3336_v37  ;;  %v3352_v37 = vld [vmem:[%s5297_s4 + $0x2f8] sm:$0xff] }
 0x2a7   : > { %v3511_v53 = vadd.f32 %v3415_v39, %v3088_v38  ;;  %v3431_v39 = vmul.f32 0.0625, %v3335_v3  ;;  %v3351_v3 = vld [vmem:[%s5297_s4 + $0x2f0] sm:$0xff] }
 0x2a8   : > { %3608 = vst.msk [vmem:[%s5297_s4 + $0x1f8] sm:$0xff] %vm195_vm2, %v3512_v36 }
 0x2a9   : > { %3607 = vst.msk [vmem:[%s5297_s4 + $0x1f0] sm:$0xff] %vm195_vm2, %v3511_v53  ;;  %v4688_v4 = vpop.f32.mrb[114].mxu0 }
 0x2aa   : > { %v3514_v40 = vadd.f32 %v4688_v4, %v3418_v48  ;;  %v3098_v2 = vpop.f32.mrb[115].mxu0  ;;  %v3434_v48 = vmul.f32 0.0625, %v3338_v57 }
 0x2ab   : > { %v3513_v18 = vadd.f32 %v3417_v15, %v3098_v2  ;;  %v3433_v15 = vmul.f32 0.0625, %v3337_v6 }
 0x2ac   : > { %3610 = vst.msk [vmem:[%s5297_s4 + $0x208] sm:$0xff] %vm195_vm2, %v3514_v40 }
 0x2ad   : > { %3609 = vst.msk [vmem:[%s5297_s4 + $0x200] sm:$0xff] %vm195_vm2, %v3513_v18  ;;  %v4691_v43 = vpop.f32.mrb[116].mxu0 }
 0x2ae   : > { %v3516_v44 = vadd.f32 %v4691_v43, %v3420_v13  ;;  %v3108_v31 = vpop.f32.mrb[117].mxu0  ;;  %v3436_v13 = vmul.f32 0.0625, %v3340_v46 }
 0x2af   : > { %v3515_v49 = vadd.f32 %v3419_v19, %v3108_v31  ;;  %v3435_v19 = vmul.f32 0.0625, %v3339_v52 }
 0x2b0   : > { %3612 = vst.msk [vmem:[%s5297_s4 + $0x218] sm:$0xff] %vm195_vm2, %v3516_v44 }
 0x2b1   : > { %3611 = vst.msk [vmem:[%s5297_s4 + $0x210] sm:$0xff] %vm195_vm2, %v3515_v49  ;;  %v4694_v30 = vpop.f32.mrb[118].mxu0 }
 0x2b2   : > { %v3518_v25 = vadd.f32 %v4694_v30, %v3422_v16  ;;  %v3118_v58 = vpop.f32.mrb[119].mxu0  ;;  %v3438_v16 = vmul.f32 0.0625, %v3342_v17 }
 0x2b3   : > { %v3517_v45 = vadd.f32 %v3421_v55, %v3118_v58  ;;  %v3437_v55 = vmul.f32 0.0625, %v3341_v54 }
 0x2b4   : > { %3614 = vst.msk [vmem:[%s5297_s4 + $0x228] sm:$0xff] %vm195_vm2, %v3518_v25 }
 0x2b5   : > { %3613 = vst.msk [vmem:[%s5297_s4 + $0x220] sm:$0xff] %vm195_vm2, %v3517_v45  ;;  %v4697_v8 = vpop.f32.mrb[120].mxu0 }
 0x2b6   : > { %v3520_v29 = vadd.f32 %v4697_v8, %v3424_v63  ;;  %v3128_v7 = vpop.f32.mrb[121].mxu0  ;;  %v3440_v63 = vmul.f32 0.0625, %v3344_v50 }
 0x2b7   : > { %v3519_v33 = vadd.f32 %v3423_v23, %v3128_v7  ;;  %v3439_v23 = vmul.f32 0.0625, %v3343_v61 }
 0x2b8   : > { %3616 = vst.msk [vmem:[%s5297_s4 + $0x238] sm:$0xff] %vm195_vm2, %v3520_v29 }
 0x2b9   : > { %3615 = vst.msk [vmem:[%s5297_s4 + $0x230] sm:$0xff] %vm195_vm2, %v3519_v33  ;;  %v4700_v62 = vpop.f32.mrb[122].mxu0 }
 0x2ba   : > { %v3522_v12 = vadd.f32 %v4700_v62, %v3426_v35  ;;  %v3138_v0 = vpop.f32.mrb[123].mxu0  ;;  %v3442_v35 = vmul.f32 0.0625, %v3346_v10 }
 0x2bb   : > { %v3521_v14 = vadd.f32 %v3425_v26, %v3138_v0  ;;  %v3441_v26 = vmul.f32 0.0625, %v3345_v56 }
 0x2bc   : > { %3618 = vst.msk [vmem:[%s5297_s4 + $0x248] sm:$0xff] %vm195_vm2, %v3522_v12 }
 0x2bd   : > { %3617 = vst.msk [vmem:[%s5297_s4 + $0x240] sm:$0xff] %vm195_vm2, %v3521_v14  ;;  %v4703_v32 = vpop.f32.mrb[124].mxu0 }
 0x2be   : > { %v3524_v59 = vadd.f32 %v4703_v32, %v3428_v60  ;;  %v3148_v34 = vpop.f32.mrb[125].mxu0  ;;  %v3444_v60 = vmul.f32 0.0625, %v3348_v27 }
 0x2bf   : > { %v3523_v41 = vadd.f32 %v3427_v20, %v3148_v34  ;;  %v3443_v20 = vmul.f32 0.0625, %v3347_v1 }
 0x2c0   : > { %3620 = vst.msk [vmem:[%s5297_s4 + $0x258] sm:$0xff] %vm195_vm2, %v3524_v59 }
 0x2c1   : > { %3619 = vst.msk [vmem:[%s5297_s4 + $0x250] sm:$0xff] %vm195_vm2, %v3523_v41  ;;  %v4706_v22 = vpop.f32.mrb[126].mxu0 }
 0x2c2   : > { %v3526_v42 = vadd.f32 %v4706_v22, %v3430_v5  ;;  %v3158_v51 = vpop.f32.mrb[127].mxu0  ;;  %v3446_v5 = vmul.f32 0.0625, %v3350_v11 }
 0x2c3   : > { %v3525_v28 = vadd.f32 %v3429_v24, %v3158_v51  ;;  %v3445_v24 = vmul.f32 0.0625, %v3349_v21 }
 0x2c4   : > { %3622 = vst.msk [vmem:[%s5297_s4 + $0x268] sm:$0xff] %vm195_vm2, %v3526_v42 }
 0x2c5   : > { %3621 = vst.msk [vmem:[%s5297_s4 + $0x260] sm:$0xff] %vm195_vm2, %v3525_v28  ;;  %v4709_v47 = vpop.f32.mrb[128].mxu0 }
 0x2c6   : > { %v3528_v36 = vadd.f32 %v4709_v47, %v3432_v9  ;;  %v3168_v38 = vpop.f32.mrb[129].mxu0  ;;  %v3448_v9 = vmul.f32 0.0625, %v3352_v37 }
 0x2c7   : > { %v3527_v53 = vadd.f32 %v3431_v39, %v3168_v38  ;;  %v3447_v39 = vmul.f32 0.0625, %v3351_v3 }
 0x2c8   : > { %3624 = vst.msk [vmem:[%s5297_s4 + $0x278] sm:$0xff] %vm195_vm2, %v3528_v36 }
 0x2c9   : > { %3623 = vst.msk [vmem:[%s5297_s4 + $0x270] sm:$0xff] %vm195_vm2, %v3527_v53  ;;  %v4712_v4 = vpop.f32.mrb[130].mxu0 }
 0x2ca   : > { %v3530_v40 = vadd.f32 %v4712_v4, %v3434_v48  ;;  %v3178_v2 = vpop.f32.mrb[131].mxu0 }
 0x2cb   : > { %v3529_v18 = vadd.f32 %v3433_v15, %v3178_v2 }
 0x2cc   : > { %3626 = vst.msk [vmem:[%s5297_s4 + $0x288] sm:$0xff] %vm195_vm2, %v3530_v40 }
 0x2cd   : > { %3625 = vst.msk [vmem:[%s5297_s4 + $0x280] sm:$0xff] %vm195_vm2, %v3529_v18  ;;  %v4715_v43 = vpop.f32.mrb[132].mxu0 }
 0x2ce   : > { %v3532_v44 = vadd.f32 %v4715_v43, %v3436_v13  ;;  %v3188_v31 = vpop.f32.mrb[133].mxu0 }
 0x2cf   : > { %v3531_v49 = vadd.f32 %v3435_v19, %v3188_v31 }
 0x2d0   : > { %3628 = vst.msk [vmem:[%s5297_s4 + $0x298] sm:$0xff] %vm195_vm2, %v3532_v44 }
 0x2d1   : > { %3627 = vst.msk [vmem:[%s5297_s4 + $0x290] sm:$0xff] %vm195_vm2, %v3531_v49  ;;  %v4718_v30 = vpop.f32.mrb[134].mxu0 }
 0x2d2   : > { %v3534_v25 = vadd.f32 %v4718_v30, %v3438_v16  ;;  %v3198_v58 = vpop.f32.mrb[135].mxu0 }
 0x2d3   : > { %v3533_v45 = vadd.f32 %v3437_v55, %v3198_v58 }
 0x2d4   : > { %3630 = vst.msk [vmem:[%s5297_s4 + $0x2a8] sm:$0xff] %vm195_vm2, %v3534_v25 }
 0x2d5   : > { %3629 = vst.msk [vmem:[%s5297_s4 + $0x2a0] sm:$0xff] %vm195_vm2, %v3533_v45  ;;  %v4721_v8 = vpop.f32.mrb[136].mxu0 }
 0x2d6   : > { %v3536_v29 = vadd.f32 %v4721_v8, %v3440_v63  ;;  %v3208_v7 = vpop.f32.mrb[137].mxu0 }
 0x2d7   : > { %v3535_v33 = vadd.f32 %v3439_v23, %v3208_v7 }
 0x2d8   : > { %3632 = vst.msk [vmem:[%s5297_s4 + $0x2b8] sm:$0xff] %vm195_vm2, %v3536_v29 }
 0x2d9   : > { %3631 = vst.msk [vmem:[%s5297_s4 + $0x2b0] sm:$0xff] %vm195_vm2, %v3535_v33  ;;  %v4724_v62 = vpop.f32.mrb[138].mxu0 }
 0x2da   : > { %v3538_v12 = vadd.f32 %v4724_v62, %v3442_v35  ;;  %v3218_v0 = vpop.f32.mrb[139].mxu0 }
 0x2db   : > { %v3537_v14 = vadd.f32 %v3441_v26, %v3218_v0 }
 0x2dc   : > { %3634 = vst.msk [vmem:[%s5297_s4 + $0x2c8] sm:$0xff] %vm195_vm2, %v3538_v12 }
 0x2dd   : > { %3633 = vst.msk [vmem:[%s5297_s4 + $0x2c0] sm:$0xff] %vm195_vm2, %v3537_v14  ;;  %v4727_v32 = vpop.f32.mrb[140].mxu0 }
 0x2de   : > { %v3540_v59 = vadd.f32 %v4727_v32, %v3444_v60  ;;  %v3228_v34 = vpop.f32.mrb[141].mxu0 }
 0x2df   : > { %v3539_v41 = vadd.f32 %v3443_v20, %v3228_v34 }
 0x2e0   : > { %3636 = vst.msk [vmem:[%s5297_s4 + $0x2d8] sm:$0xff] %vm195_vm2, %v3540_v59 }
 0x2e1   : > { %3635 = vst.msk [vmem:[%s5297_s4 + $0x2d0] sm:$0xff] %vm195_vm2, %v3539_v41  ;;  %v4730_v22 = vpop.f32.mrb[142].mxu0 }
 0x2e2   : > { %v3542_v42 = vadd.f32 %v4730_v22, %v3446_v5  ;;  %v3238_v51 = vpop.f32.mrb[143].mxu0 }
 0x2e3   : > { %v3541_v28 = vadd.f32 %v3445_v24, %v3238_v51 }
 0x2e4   : > { %3638 = vst.msk [vmem:[%s5297_s4 + $0x2e8] sm:$0xff] %vm195_vm2, %v3542_v42 }
 0x2e5   : > { %3637 = vst.msk [vmem:[%s5297_s4 + $0x2e0] sm:$0xff] %vm195_vm2, %v3541_v28  ;;  %v4733_v47 = vpop.f32.mrb[144].mxu0 }
 0x2e6   : > { %v3544_v57 = vadd.f32 %v4733_v47, %v3448_v9  ;;  %v3248_v36 = vpop.f32.mrb[145].mxu0 }
 0x2e7   : > { %v3543_v38 = vadd.f32 %v3447_v39, %v3248_v36 }
 0x2e8   : > { %3640 = vst.msk [vmem:[%s5297_s4 + $0x2f8] sm:$0xff] %vm195_vm2, %v3544_v57 }
 0x2e9   : > { %3639 = vst.msk [vmem:[%s5297_s4 + $0x2f0] sm:$0xff] %vm195_vm2, %v3543_v38 }
 0x2ea PF: > { %s13_s14 = sadd.s32 1, %s4819_s14   ;;  %s6755_s12 = smov %s4815_s13 }
 0x2eb   : > { %p10_p5 = scmp.ge.s32.totalorder %s13_s14, 4   ;;  %s6756_s13 = smov %s6758_s15 }
 0x2ed   :  { %12 = sbr.rel (!%p10_p5) target bundleno = 2 (0x2), region = 70 }

</bundles_post_ra>
